<compile_context>
chip_gen: v7x
topology: tpu7x:2x2x1
jax: 0.10.0
libtpu: 0.0.40
codegen_flags: <defaults>
</compile_context>

<pallas_src>
import functools
from typing import NamedTuple, Tuple

import jax
import jax.numpy as jnp
import numpy as np
from jax.experimental import pallas as pl
from jax.experimental.pallas import tpu as pltpu


class LayerGeom(NamedTuple):
    cin: int
    cout: int
    k: int
    s: int
    p: int
    d: int
    h: int    # layer input spatial
    w: int
    hp: int   # padded input spatial
    wp: int
    oh: int   # layer output spatial
    ow: int


# ----------------------------------------------------------------------------
# Fused kernel: per batch element, run every layer fully in VMEM.
# ----------------------------------------------------------------------------
def _make_fused_kernel(geoms: Tuple[LayerGeom, ...]):
    L = len(geoms)

    def kernel(*refs):
        # refs layout: x, mw[0..L-1], w[0..L-1], b[0..L-1], out, pad[0..L-1], col[0..L-1]
        x_ref = refs[0]
        mw_refs = refs[1:1 + L]
        w_refs = refs[1 + L:1 + 2 * L]
        b_refs = refs[1 + 2 * L:1 + 3 * L]
        o_ref = refs[1 + 3 * L]
        pad_refs = refs[2 + 3 * L:2 + 4 * L]
        col_refs = refs[2 + 4 * L:2 + 5 * L]

        cur = x_ref[...]                       # (Cin0, H0, W0) for this batch elem
        y = None
        for l, g in enumerate(geoms):
            pr = pad_refs[l]                   # (cin, hp, wp) padded-activation scratch
            cr = col_refs[l]                   # (k*k*cin, oh, ow) im2col scratch

            # Fused zero padding: clear scratch (border stays 0), write interior.
            if g.p > 0:
                pr[...] = jnp.zeros_like(pr)
            pr[:, g.p:g.p + g.h, g.p:g.p + g.w] = cur

            # im2col-lite: pack the k*k shifted taps along the contraction axis.
            t = 0
            for dh in range(g.k):
                for dw in range(g.k):
                    h0, w0 = dh * g.d, dw * g.d
                    if g.s == 1:
                        tap = pr[:, h0:h0 + g.oh, w0:w0 + g.ow]
                    else:
                        tap = pr[:, pl.ds(h0, g.oh, g.s), pl.ds(w0, g.ow, g.s)]
                    cr[t * g.cin:(t + 1) * g.cin, :, :] = tap
                    t += 1

            xcol = cr[...].reshape(g.k * g.k * g.cin, g.oh * g.ow)

            # One fat MXU dot per layer, lane axis = OH*OW (lane-dense).
            y = jnp.dot(w_refs[l][...], xcol,
                        preferred_element_type=jnp.float32)   # (cout, oh*ow)
            y = jnp.maximum(y + b_refs[l][...], 0.0)          # bias + ReLU
            y = y * mw_refs[l][...]                           # precomputed masked weight
            cur = y.reshape(g.cout, g.oh, g.ow)

        o_ref[...] = y                         # (CoutL, OHL*OWL), full-width store

    return kernel


def _build_mapconv_call(N: int, geoms: Tuple[LayerGeom, ...]):
    L = len(geoms)
    g0, gL = geoms[0], geoms[-1]

    in_specs = [pl.BlockSpec((None, g0.cin, g0.h, g0.w), lambda n: (n, 0, 0, 0))]
    in_specs += [pl.BlockSpec((None, 1, g.oh * g.ow), lambda n: (n, 0, 0))
                 for g in geoms]                                     # masked weights
    in_specs += [pl.BlockSpec((g.cout, g.k * g.k * g.cin), lambda n: (0, 0))
                 for g in geoms]                                     # conv weights
    in_specs += [pl.BlockSpec((g.cout, 1), lambda n: (0, 0))
                 for g in geoms]                                     # biases

    out_spec = pl.BlockSpec((None, gL.cout, gL.oh * gL.ow), lambda n: (n, 0, 0))

    scratch_shapes = (
        [pltpu.VMEM((g.cin, g.hp, g.wp), jnp.float32) for g in geoms]
        + [pltpu.VMEM((g.k * g.k * g.cin, g.oh, g.ow), jnp.float32) for g in geoms]
    )

    flops = int(sum(2 * N * g.oh * g.ow * g.k * g.k * g.cin * g.cout for g in geoms))
    bytes_accessed = int(4 * (
        N * g0.cin * g0.h * g0.w
        + sum(N * g.oh * g.ow for g in geoms)
        + sum(g.cout * (g.k * g.k * g.cin + 1) for g in geoms)
        + N * gL.cout * gL.oh * gL.ow))

    # VMEM budget: BlockSpec blocks are double-buffered; scratch is single.
    block_bytes = 4 * (
        g0.cin * g0.h * g0.w
        + sum(g.oh * g.ow for g in geoms)
        + sum(g.cout * (g.k * g.k * g.cin + 1) for g in geoms)
        + gL.cout * gL.oh * gL.ow)
    scratch_bytes = 4 * sum(g.cin * g.hp * g.wp + g.k * g.k * g.cin * g.oh * g.ow
                            for g in geoms)
    vmem_limit = int(min(64 * 1024 * 1024,
                         max(8 * 1024 * 1024,
                             4 * (2 * block_bytes + scratch_bytes))))

    return pl.pallas_call(
        _make_fused_kernel(geoms),
        out_shape=jax.ShapeDtypeStruct((N, gL.cout, gL.oh * gL.ow), jnp.float32),
        grid=(N,),
        in_specs=in_specs,
        out_specs=out_spec,
        scratch_shapes=scratch_shapes,
        compiler_params=pltpu.CompilerParams(
            dimension_semantics=("parallel",),
            vmem_limit_bytes=vmem_limit),
        cost_estimate=pl.CostEstimate(
            flops=flops, transcendentals=0, bytes_accessed=bytes_accessed),
    )


# ----------------------------------------------------------------------------
# Public forward: NCHW in, NCHW out (matches the PyTorch module).
# ----------------------------------------------------------------------------
@functools.partial(jax.jit, static_argnames=("layer_cfgs",))
def map_conv_forward(x_nchw, mask_nchw, params, layer_cfgs):
    """MapConv.forward. x: (N, Cin, H, W), mask: (N, 1, H, W), params: ((W_oihw, b), ...)."""
    x = x_nchw.astype(jnp.float32)
    N, cin, h, w = x.shape
    m = mask_nchw[:, 0, :, :].astype(jnp.float32)

    geoms, w_mats, b_mats, mw_flat = [], [], [], []
    for (w_oihw, b), (k, s, p, d) in zip(params, layer_cfgs):
        cout = w_oihw.shape[0]
        hp, wp = h + 2 * p, w + 2 * p
        oh = (hp - d * (k - 1) - 1) // s + 1
        ow = (wp - d * (k - 1) - 1) // s + 1
        geoms.append(LayerGeom(cin, cout, k, s, p, d, h, w, hp, wp, oh, ow))

        # (Cout, Cin, KH, KW) -> (Cout, KH*KW*Cin), matching the kernel's tap order.
        w_mats.append(jnp.transpose(w_oihw, (0, 2, 3, 1))
                      .reshape(cout, k * k * cin).astype(jnp.float32))
        b_mats.append(b.reshape(cout, 1).astype(jnp.float32))

        # get_padded_mask_and_weight -- hoisted out of the Pallas kernel
        # (mask-only math, O(N*H*W), trivially cheap in plain JAX).
        mp = jnp.pad(m, ((0, 0), (p, p), (p, p)))
        cnt = jnp.zeros((N, oh, ow), jnp.float32)
        for dh in range(k):
            for dw in range(k):
                h0, w0 = dh * d, dw * d
                cnt = cnt + mp[:, h0:h0 + (oh - 1) * s + 1:s,
                               w0:w0 + (ow - 1) * s + 1:s]
        mwt = jnp.round(cnt)
        mwt = jnp.where(mwt > 0, 1.0 / mwt, 0.0)
        mw_flat.append(mwt.reshape(N, 1, oh * ow))
        m = (mwt > 0).astype(jnp.float32)

        cin, h, w = cout, oh, ow

    call = _build_mapconv_call(N, tuple(geoms))
    out = call(x, *mw_flat, *w_mats, *b_mats)           # (N, CoutL, OHL*OWL)
    gL = geoms[-1]
    return out.reshape(N, gL.cout, gL.oh, gL.ow)        # NCHW (free reshape)


# ----------------------------------------------------------------------------
# Pure-JAX reference (mirrors the PyTorch module exactly) for verification.
# ----------------------------------------------------------------------------
def ref_forward(x_nchw, mask_nchw, params_oihw, layer_cfgs):
    x = x_nchw.astype(jnp.float32)
    m = mask_nchw.astype(jnp.float32)
    dn = ("NCHW", "OIHW", "NCHW")
    for (w_oihw, b), (k, s, p, d) in zip(params_oihw, layer_cfgs):
        y = jax.lax.conv_general_dilated(
            x, w_oihw, (s, s), [(p, p), (p, p)],
            rhs_dilation=(d, d), dimension_numbers=dn)
        y = jax.nn.relu(y + b.reshape(1, -1, 1, 1))
        ones = jnp.ones((1, 1, k, k), jnp.float32)
        mc = jax.lax.conv_general_dilated(
            m, ones, (s, s), [(p, p), (p, p)],
            rhs_dilation=(d, d), dimension_numbers=dn)
        mw = jnp.round(mc)
        mw = jnp.where(mw > 0, 1.0 / mw, 0.0)
        x = y * mw
        m = (mw > 0).astype(jnp.float32)
    return x


# ----------------------------------------------------------------------------
if __name__ == "__main__":
    # cfg: INPUT_SIZE=4, HIDDEN_SIZES=[8, 8], KERNEL_SIZES=[3, 3],
    #      STRIDES=[1, 1], PADDINGS=[1, 1], DILATIONS=[1, 1]
    input_size = 4
    hidden_sizes = [8, 8]
    kernel_sizes = [3, 3]
    strides = [1, 1]
    paddings = [1, 1]
    dilations = [1, 1]
    layer_cfgs = tuple(zip(kernel_sizes, strides, paddings, dilations))

    N, H, W = 2, 16, 16
    key = jax.random.PRNGKey(0)
    kx, km, *kws = jax.random.split(key, 2 + 2 * len(hidden_sizes))

    x = jax.random.normal(kx, (N, input_size, H, W), dtype=jnp.float32)
    # binary valid-region mask, shape (N, 1, H, W) as in 2D-TAN
    mask = (jax.random.uniform(km, (N, 1, H, W)) > 0.3).astype(jnp.float32)

    # Conv2d parameters: weight (Cout, Cin, K, K), bias (Cout,)
    channel_sizes = [input_size] + hidden_sizes
    params = []
    for i, (k, s, p, d) in enumerate(layer_cfgs):
        cin, cout = channel_sizes[i], channel_sizes[i + 1]
        fan_in = cin * k * k
        wgt = jax.random.normal(kws[2 * i], (cout, cin, k, k), jnp.float32) / np.sqrt(fan_in)
        b = 0.01 * jax.random.normal(kws[2 * i + 1], (cout,), jnp.float32)
        params.append((wgt, b))
    params = tuple(params)

    out = map_conv_forward(x, mask, params, layer_cfgs)
    out = jax.block_until_ready(out)

    ref = jax.block_until_ready(ref_forward(x, mask, params, layer_cfgs))
    np.testing.assert_allclose(np.asarray(out), np.asarray(ref), rtol=2e-4, atol=2e-4)

    print("KERNEL_OK")
</pallas_src>

<mosaic_0001>
module attributes {stable_mosaic.version = 11 : i64} {
  func.func @kernel(%arg0: i32, %arg1: memref<1x4x16x16xf32, #tpu.memory_space<vmem>>, %arg2: memref<1x1x256xf32, #tpu.memory_space<vmem>>, %arg3: memref<1x1x256xf32, #tpu.memory_space<vmem>>, %arg4: memref<8x36xf32, #tpu.memory_space<vmem>>, %arg5: memref<8x72xf32, #tpu.memory_space<vmem>>, %arg6: memref<8x1xf32, #tpu.memory_space<vmem>>, %arg7: memref<8x1xf32, #tpu.memory_space<vmem>>, %arg8: memref<1x8x256xf32, #tpu.memory_space<vmem>>, %arg9: memref<4x18x18xf32, #tpu.memory_space<vmem>>, %arg10: memref<8x18x18xf32, #tpu.memory_space<vmem>>, %arg11: memref<36x16x16xf32, #tpu.memory_space<vmem>>, %arg12: memref<72x16x16xf32, #tpu.memory_space<vmem>>) attributes {dimension_semantics = [#tpu.dimension_semantics<parallel>], iteration_bounds = array<i64: 2>, scalar_prefetch = 0 : i64, scratch_operands = 4 : i64, tpu.core_type = #tpu.core_type<tc>, window_params = [{transform_indices = @transform_0, window_bounds = array<i64: 1, 4, 16, 16>}, {transform_indices = @transform_1, window_bounds = array<i64: 1, 1, 256>}, {transform_indices = @transform_2, window_bounds = array<i64: 1, 1, 256>}, {pipeline_mode = #tpu.pipeline_mode<synchronous>, transform_indices = @transform_3, window_bounds = array<i64: 8, 36>}, {pipeline_mode = #tpu.pipeline_mode<synchronous>, transform_indices = @transform_4, window_bounds = array<i64: 8, 72>}, {pipeline_mode = #tpu.pipeline_mode<synchronous>, transform_indices = @transform_5, window_bounds = array<i64: 8, 1>}, {pipeline_mode = #tpu.pipeline_mode<synchronous>, transform_indices = @transform_6, window_bounds = array<i64: 8, 1>}, {transform_indices = @transform_7, window_bounds = array<i64: 1, 8, 256>}]} {
    %c0 = arith.constant 0 : index
    %c0_0 = arith.constant 0 : index
    %c0_1 = arith.constant 0 : index
    %c0_2 = arith.constant 0 : index
    %0 = vector.load %arg1[%c0, %c0_0, %c0_1, %c0_2] : memref<1x4x16x16xf32, #tpu.memory_space<vmem>>, vector<1x4x16x16xf32>
    %1 = vector.shape_cast %0 : vector<1x4x16x16xf32> to vector<4x16x16xf32>
    %cst = arith.constant 0.000000e+00 : f32
    %2 = vector.broadcast %cst : f32 to vector<4x18x18xf32>
    %c0_3 = arith.constant 0 : index
    %c0_4 = arith.constant 0 : index
    %c0_5 = arith.constant 0 : index
    %3 = vector.load %arg9[%c0_3, %c0_4, %c0_5] : memref<4x18x18xf32, #tpu.memory_space<vmem>>, vector<4x18x18xf32>
    tpu.vector_store %arg9[%c0_3, %c0_4, %c0_5], %2 {strides = array<i32>} : memref<4x18x18xf32, #tpu.memory_space<vmem>>, vector<4x18x18xf32>,
    %c0_6 = arith.constant 0 : index
    %c1 = arith.constant 1 : index
    %c1_7 = arith.constant 1 : index
    %4 = vector.load %arg9[%c0_6, %c1, %c1_7] : memref<4x18x18xf32, #tpu.memory_space<vmem>>, vector<4x16x16xf32>
    tpu.vector_store %arg9[%c0_6, %c1, %c1_7], %1 {strides = array<i32>} : memref<4x18x18xf32, #tpu.memory_space<vmem>>, vector<4x16x16xf32>,
    %c0_8 = arith.constant 0 : index
    %c0_9 = arith.constant 0 : index
    %c0_10 = arith.constant 0 : index
    %5 = vector.load %arg9[%c0_8, %c0_9, %c0_10] : memref<4x18x18xf32, #tpu.memory_space<vmem>>, vector<4x16x16xf32>
    %c0_11 = arith.constant 0 : index
    %c0_12 = arith.constant 0 : index
    %c0_13 = arith.constant 0 : index
    %6 = vector.load %arg11[%c0_11, %c0_12, %c0_13] : memref<36x16x16xf32, #tpu.memory_space<vmem>>, vector<4x16x16xf32>
    tpu.vector_store %arg11[%c0_11, %c0_12, %c0_13], %5 {strides = array<i32>} : memref<36x16x16xf32, #tpu.memory_space<vmem>>, vector<4x16x16xf32>,
    %c0_14 = arith.constant 0 : index
    %c0_15 = arith.constant 0 : index
    %c1_16 = arith.constant 1 : index
    %7 = vector.load %arg9[%c0_14, %c0_15, %c1_16] : memref<4x18x18xf32, #tpu.memory_space<vmem>>, vector<4x16x16xf32>
    %c4 = arith.constant 4 : index
    %c0_17 = arith.constant 0 : index
    %c0_18 = arith.constant 0 : index
    %8 = vector.load %arg11[%c4, %c0_17, %c0_18] : memref<36x16x16xf32, #tpu.memory_space<vmem>>, vector<4x16x16xf32>
    tpu.vector_store %arg11[%c4, %c0_17, %c0_18], %7 {strides = array<i32>} : memref<36x16x16xf32, #tpu.memory_space<vmem>>, vector<4x16x16xf32>,
    %c0_19 = arith.constant 0 : index
    %c0_20 = arith.constant 0 : index
    %c2 = arith.constant 2 : index
    %9 = vector.load %arg9[%c0_19, %c0_20, %c2] : memref<4x18x18xf32, #tpu.memory_space<vmem>>, vector<4x16x16xf32>
    %c8 = arith.constant 8 : index
    %c0_21 = arith.constant 0 : index
    %c0_22 = arith.constant 0 : index
    %10 = vector.load %arg11[%c8, %c0_21, %c0_22] : memref<36x16x16xf32, #tpu.memory_space<vmem>>, vector<4x16x16xf32>
    tpu.vector_store %arg11[%c8, %c0_21, %c0_22], %9 {strides = array<i32>} : memref<36x16x16xf32, #tpu.memory_space<vmem>>, vector<4x16x16xf32>,
    %c0_23 = arith.constant 0 : index
    %c1_24 = arith.constant 1 : index
    %c0_25 = arith.constant 0 : index
    %11 = vector.load %arg9[%c0_23, %c1_24, %c0_25] : memref<4x18x18xf32, #tpu.memory_space<vmem>>, vector<4x16x16xf32>
    %c12 = arith.constant 12 : index
    %c0_26 = arith.constant 0 : index
    %c0_27 = arith.constant 0 : index
    %12 = vector.load %arg11[%c12, %c0_26, %c0_27] : memref<36x16x16xf32, #tpu.memory_space<vmem>>, vector<4x16x16xf32>
    tpu.vector_store %arg11[%c12, %c0_26, %c0_27], %11 {strides = array<i32>} : memref<36x16x16xf32, #tpu.memory_space<vmem>>, vector<4x16x16xf32>,
    %c0_28 = arith.constant 0 : index
    %c1_29 = arith.constant 1 : index
    %c1_30 = arith.constant 1 : index
    %13 = vector.load %arg9[%c0_28, %c1_29, %c1_30] : memref<4x18x18xf32, #tpu.memory_space<vmem>>, vector<4x16x16xf32>
    %c16 = arith.constant 16 : index
    %c0_31 = arith.constant 0 : index
    %c0_32 = arith.constant 0 : index
    %14 = vector.load %arg11[%c16, %c0_31, %c0_32] : memref<36x16x16xf32, #tpu.memory_space<vmem>>, vector<4x16x16xf32>
    tpu.vector_store %arg11[%c16, %c0_31, %c0_32], %13 {strides = array<i32>} : memref<36x16x16xf32, #tpu.memory_space<vmem>>, vector<4x16x16xf32>,
    %c0_33 = arith.constant 0 : index
    %c1_34 = arith.constant 1 : index
    %c2_35 = arith.constant 2 : index
    %15 = vector.load %arg9[%c0_33, %c1_34, %c2_35] : memref<4x18x18xf32, #tpu.memory_space<vmem>>, vector<4x16x16xf32>
    %c20 = arith.constant 20 : index
    %c0_36 = arith.constant 0 : index
    %c0_37 = arith.constant 0 : index
    %16 = vector.load %arg11[%c20, %c0_36, %c0_37] : memref<36x16x16xf32, #tpu.memory_space<vmem>>, vector<4x16x16xf32>
    tpu.vector_store %arg11[%c20, %c0_36, %c0_37], %15 {strides = array<i32>} : memref<36x16x16xf32, #tpu.memory_space<vmem>>, vector<4x16x16xf32>,
    %c0_38 = arith.constant 0 : index
    %c2_39 = arith.constant 2 : index
    %c0_40 = arith.constant 0 : index
    %17 = vector.load %arg9[%c0_38, %c2_39, %c0_40] : memref<4x18x18xf32, #tpu.memory_space<vmem>>, vector<4x16x16xf32>
    %c24 = arith.constant 24 : index
    %c0_41 = arith.constant 0 : index
    %c0_42 = arith.constant 0 : index
    %18 = vector.load %arg11[%c24, %c0_41, %c0_42] : memref<36x16x16xf32, #tpu.memory_space<vmem>>, vector<4x16x16xf32>
    tpu.vector_store %arg11[%c24, %c0_41, %c0_42], %17 {strides = array<i32>} : memref<36x16x16xf32, #tpu.memory_space<vmem>>, vector<4x16x16xf32>,
    %c0_43 = arith.constant 0 : index
    %c2_44 = arith.constant 2 : index
    %c1_45 = arith.constant 1 : index
    %19 = vector.load %arg9[%c0_43, %c2_44, %c1_45] : memref<4x18x18xf32, #tpu.memory_space<vmem>>, vector<4x16x16xf32>
    %c28 = arith.constant 28 : index
    %c0_46 = arith.constant 0 : index
    %c0_47 = arith.constant 0 : index
    %20 = vector.load %arg11[%c28, %c0_46, %c0_47] : memref<36x16x16xf32, #tpu.memory_space<vmem>>, vector<4x16x16xf32>
    tpu.vector_store %arg11[%c28, %c0_46, %c0_47], %19 {strides = array<i32>} : memref<36x16x16xf32, #tpu.memory_space<vmem>>, vector<4x16x16xf32>,
    %c0_48 = arith.constant 0 : index
    %c2_49 = arith.constant 2 : index
    %c2_50 = arith.constant 2 : index
    %21 = vector.load %arg9[%c0_48, %c2_49, %c2_50] : memref<4x18x18xf32, #tpu.memory_space<vmem>>, vector<4x16x16xf32>
    %c32 = arith.constant 32 : index
    %c0_51 = arith.constant 0 : index
    %c0_52 = arith.constant 0 : index
    %22 = vector.load %arg11[%c32, %c0_51, %c0_52] : memref<36x16x16xf32, #tpu.memory_space<vmem>>, vector<4x16x16xf32>
    tpu.vector_store %arg11[%c32, %c0_51, %c0_52], %21 {strides = array<i32>} : memref<36x16x16xf32, #tpu.memory_space<vmem>>, vector<4x16x16xf32>,
    %c0_53 = arith.constant 0 : index
    %c0_54 = arith.constant 0 : index
    %c0_55 = arith.constant 0 : index
    %23 = vector.load %arg11[%c0_53, %c0_54, %c0_55] : memref<36x16x16xf32, #tpu.memory_space<vmem>>, vector<36x16x16xf32>
    %24 = vector.shape_cast %23 : vector<36x16x16xf32> to vector<36x256xf32>
    %c0_56 = arith.constant 0 : index
    %c0_57 = arith.constant 0 : index
    %25 = vector.load %arg4[%c0_56, %c0_57] : memref<8x36xf32, #tpu.memory_space<vmem>>, vector<8x36xf32>
    %cst_58 = arith.constant dense<0.000000e+00> : vector<8x256xf32>
    %26 = tpu.matmul %25, %24, %cst_58 {dimension_numbers = #tpu.dot_dimension_numbers<[1], [0], [0], [1], [0, 0, 1, 1], [], []>} : vector<8x36xf32>, vector<36x256xf32>, vector<8x256xf32> -> vector<8x256xf32>
    %c0_59 = arith.constant 0 : index
    %c0_60 = arith.constant 0 : index
    %27 = vector.load %arg6[%c0_59, %c0_60] : memref<8x1xf32, #tpu.memory_space<vmem>>, vector<8x1xf32>
    %28 = vector.broadcast %27 : vector<8x1xf32> to vector<8x256xf32>
    %29 = arith.addf %26, %28 : vector<8x256xf32>
    %cst_61 = arith.constant 0.000000e+00 : f32
    %30 = vector.broadcast %cst_61 : f32 to vector<8x256xf32>
    %31 = arith.maximumf %29, %30 : vector<8x256xf32>
    %c0_62 = arith.constant 0 : index
    %c0_63 = arith.constant 0 : index
    %c0_64 = arith.constant 0 : index
    %32 = vector.load %arg2[%c0_62, %c0_63, %c0_64] : memref<1x1x256xf32, #tpu.memory_space<vmem>>, vector<1x1x256xf32>
    %33 = vector.shape_cast %32 : vector<1x1x256xf32> to vector<1x256xf32>
    %34 = vector.broadcast %33 : vector<1x256xf32> to vector<8x256xf32>
    %35 = arith.mulf %31, %34 : vector<8x256xf32>
    %36 = vector.shape_cast %35 : vector<8x256xf32> to vector<8x16x16xf32>
    %cst_65 = arith.constant 0.000000e+00 : f32
    %37 = vector.broadcast %cst_65 : f32 to vector<8x18x18xf32>
    %c0_66 = arith.constant 0 : index
    %c0_67 = arith.constant 0 : index
    %c0_68 = arith.constant 0 : index
    %38 = vector.load %arg10[%c0_66, %c0_67, %c0_68] : memref<8x18x18xf32, #tpu.memory_space<vmem>>, vector<8x18x18xf32>
    tpu.vector_store %arg10[%c0_66, %c0_67, %c0_68], %37 {strides = array<i32>} : memref<8x18x18xf32, #tpu.memory_space<vmem>>, vector<8x18x18xf32>,
    %c0_69 = arith.constant 0 : index
    %c1_70 = arith.constant 1 : index
    %c1_71 = arith.constant 1 : index
    %39 = vector.load %arg10[%c0_69, %c1_70, %c1_71] : memref<8x18x18xf32, #tpu.memory_space<vmem>>, vector<8x16x16xf32>
    tpu.vector_store %arg10[%c0_69, %c1_70, %c1_71], %36 {strides = array<i32>} : memref<8x18x18xf32, #tpu.memory_space<vmem>>, vector<8x16x16xf32>,
    %c0_72 = arith.constant 0 : index
    %c0_73 = arith.constant 0 : index
    %c0_74 = arith.constant 0 : index
    %40 = vector.load %arg10[%c0_72, %c0_73, %c0_74] : memref<8x18x18xf32, #tpu.memory_space<vmem>>, vector<8x16x16xf32>
    %c0_75 = arith.constant 0 : index
    %c0_76 = arith.constant 0 : index
    %c0_77 = arith.constant 0 : index
    %41 = vector.load %arg12[%c0_75, %c0_76, %c0_77] : memref<72x16x16xf32, #tpu.memory_space<vmem>>, vector<8x16x16xf32>
    tpu.vector_store %arg12[%c0_75, %c0_76, %c0_77], %40 {strides = array<i32>} : memref<72x16x16xf32, #tpu.memory_space<vmem>>, vector<8x16x16xf32>,
    %c0_78 = arith.constant 0 : index
    %c0_79 = arith.constant 0 : index
    %c1_80 = arith.constant 1 : index
    %42 = vector.load %arg10[%c0_78, %c0_79, %c1_80] : memref<8x18x18xf32, #tpu.memory_space<vmem>>, vector<8x16x16xf32>
    %c8_81 = arith.constant 8 : index
    %c0_82 = arith.constant 0 : index
    %c0_83 = arith.constant 0 : index
    %43 = vector.load %arg12[%c8_81, %c0_82, %c0_83] : memref<72x16x16xf32, #tpu.memory_space<vmem>>, vector<8x16x16xf32>
    tpu.vector_store %arg12[%c8_81, %c0_82, %c0_83], %42 {strides = array<i32>} : memref<72x16x16xf32, #tpu.memory_space<vmem>>, vector<8x16x16xf32>,
    %c0_84 = arith.constant 0 : index
    %c0_85 = arith.constant 0 : index
    %c2_86 = arith.constant 2 : index
    %44 = vector.load %arg10[%c0_84, %c0_85, %c2_86] : memref<8x18x18xf32, #tpu.memory_space<vmem>>, vector<8x16x16xf32>
    %c16_87 = arith.constant 16 : index
    %c0_88 = arith.constant 0 : index
    %c0_89 = arith.constant 0 : index
    %45 = vector.load %arg12[%c16_87, %c0_88, %c0_89] : memref<72x16x16xf32, #tpu.memory_space<vmem>>, vector<8x16x16xf32>
    tpu.vector_store %arg12[%c16_87, %c0_88, %c0_89], %44 {strides = array<i32>} : memref<72x16x16xf32, #tpu.memory_space<vmem>>, vector<8x16x16xf32>,
    %c0_90 = arith.constant 0 : index
    %c1_91 = arith.constant 1 : index
    %c0_92 = arith.constant 0 : index
    %46 = vector.load %arg10[%c0_90, %c1_91, %c0_92] : memref<8x18x18xf32, #tpu.memory_space<vmem>>, vector<8x16x16xf32>
    %c24_93 = arith.constant 24 : index
    %c0_94 = arith.constant 0 : index
    %c0_95 = arith.constant 0 : index
    %47 = vector.load %arg12[%c24_93, %c0_94, %c0_95] : memref<72x16x16xf32, #tpu.memory_space<vmem>>, vector<8x16x16xf32>
    tpu.vector_store %arg12[%c24_93, %c0_94, %c0_95], %46 {strides = array<i32>} : memref<72x16x16xf32, #tpu.memory_space<vmem>>, vector<8x16x16xf32>,
    %c0_96 = arith.constant 0 : index
    %c1_97 = arith.constant 1 : index
    %c1_98 = arith.constant 1 : index
    %48 = vector.load %arg10[%c0_96, %c1_97, %c1_98] : memref<8x18x18xf32, #tpu.memory_space<vmem>>, vector<8x16x16xf32>
    %c32_99 = arith.constant 32 : index
    %c0_100 = arith.constant 0 : index
    %c0_101 = arith.constant 0 : index
    %49 = vector.load %arg12[%c32_99, %c0_100, %c0_101] : memref<72x16x16xf32, #tpu.memory_space<vmem>>, vector<8x16x16xf32>
    tpu.vector_store %arg12[%c32_99, %c0_100, %c0_101], %48 {strides = array<i32>} : memref<72x16x16xf32, #tpu.memory_space<vmem>>, vector<8x16x16xf32>,
    %c0_102 = arith.constant 0 : index
    %c1_103 = arith.constant 1 : index
    %c2_104 = arith.constant 2 : index
    %50 = vector.load %arg10[%c0_102, %c1_103, %c2_104] : memref<8x18x18xf32, #tpu.memory_space<vmem>>, vector<8x16x16xf32>
    %c40 = arith.constant 40 : index
    %c0_105 = arith.constant 0 : index
    %c0_106 = arith.constant 0 : index
    %51 = vector.load %arg12[%c40, %c0_105, %c0_106] : memref<72x16x16xf32, #tpu.memory_space<vmem>>, vector<8x16x16xf32>
    tpu.vector_store %arg12[%c40, %c0_105, %c0_106], %50 {strides = array<i32>} : memref<72x16x16xf32, #tpu.memory_space<vmem>>, vector<8x16x16xf32>,
    %c0_107 = arith.constant 0 : index
    %c2_108 = arith.constant 2 : index
    %c0_109 = arith.constant 0 : index
    %52 = vector.load %arg10[%c0_107, %c2_108, %c0_109] : memref<8x18x18xf32, #tpu.memory_space<vmem>>, vector<8x16x16xf32>
    %c48 = arith.constant 48 : index
    %c0_110 = arith.constant 0 : index
    %c0_111 = arith.constant 0 : index
    %53 = vector.load %arg12[%c48, %c0_110, %c0_111] : memref<72x16x16xf32, #tpu.memory_space<vmem>>, vector<8x16x16xf32>
    tpu.vector_store %arg12[%c48, %c0_110, %c0_111], %52 {strides = array<i32>} : memref<72x16x16xf32, #tpu.memory_space<vmem>>, vector<8x16x16xf32>,
    %c0_112 = arith.constant 0 : index
    %c2_113 = arith.constant 2 : index
    %c1_114 = arith.constant 1 : index
    %54 = vector.load %arg10[%c0_112, %c2_113, %c1_114] : memref<8x18x18xf32, #tpu.memory_space<vmem>>, vector<8x16x16xf32>
    %c56 = arith.constant 56 : index
    %c0_115 = arith.constant 0 : index
    %c0_116 = arith.constant 0 : index
    %55 = vector.load %arg12[%c56, %c0_115, %c0_116] : memref<72x16x16xf32, #tpu.memory_space<vmem>>, vector<8x16x16xf32>
    tpu.vector_store %arg12[%c56, %c0_115, %c0_116], %54 {strides = array<i32>} : memref<72x16x16xf32, #tpu.memory_space<vmem>>, vector<8x16x16xf32>,
    %c0_117 = arith.constant 0 : index
    %c2_118 = arith.constant 2 : index
    %c2_119 = arith.constant 2 : index
    %56 = vector.load %arg10[%c0_117, %c2_118, %c2_119] : memref<8x18x18xf32, #tpu.memory_space<vmem>>, vector<8x16x16xf32>
    %c64 = arith.constant 64 : index
    %c0_120 = arith.constant 0 : index
    %c0_121 = arith.constant 0 : index
    %57 = vector.load %arg12[%c64, %c0_120, %c0_121] : memref<72x16x16xf32, #tpu.memory_space<vmem>>, vector<8x16x16xf32>
    tpu.vector_store %arg12[%c64, %c0_120, %c0_121], %56 {strides = array<i32>} : memref<72x16x16xf32, #tpu.memory_space<vmem>>, vector<8x16x16xf32>,
    %c0_122 = arith.constant 0 : index
    %c0_123 = arith.constant 0 : index
    %c0_124 = arith.constant 0 : index
    %58 = vector.load %arg12[%c0_122, %c0_123, %c0_124] : memref<72x16x16xf32, #tpu.memory_space<vmem>>, vector<72x16x16xf32>
    %59 = vector.shape_cast %58 : vector<72x16x16xf32> to vector<72x256xf32>
    %c0_125 = arith.constant 0 : index
    %c0_126 = arith.constant 0 : index
    %60 = vector.load %arg5[%c0_125, %c0_126] : memref<8x72xf32, #tpu.memory_space<vmem>>, vector<8x72xf32>
    %cst_127 = arith.constant dense<0.000000e+00> : vector<8x256xf32>
    %61 = tpu.matmul %60, %59, %cst_127 {dimension_numbers = #tpu.dot_dimension_numbers<[1], [0], [0], [1], [0, 0, 1, 1], [], []>} : vector<8x72xf32>, vector<72x256xf32>, vector<8x256xf32> -> vector<8x256xf32>
    %c0_128 = arith.constant 0 : index
    %c0_129 = arith.constant 0 : index
    %62 = vector.load %arg7[%c0_128, %c0_129] : memref<8x1xf32, #tpu.memory_space<vmem>>, vector<8x1xf32>
    %63 = vector.broadcast %62 : vector<8x1xf32> to vector<8x256xf32>
    %64 = arith.addf %61, %63 : vector<8x256xf32>
    %cst_130 = arith.constant 0.000000e+00 : f32
    %65 = vector.broadcast %cst_130 : f32 to vector<8x256xf32>
    %66 = arith.maximumf %64, %65 : vector<8x256xf32>
    %c0_131 = arith.constant 0 : index
    %c0_132 = arith.constant 0 : index
    %c0_133 = arith.constant 0 : index
    %67 = vector.load %arg3[%c0_131, %c0_132, %c0_133] : memref<1x1x256xf32, #tpu.memory_space<vmem>>, vector<1x1x256xf32>
    %68 = vector.shape_cast %67 : vector<1x1x256xf32> to vector<1x256xf32>
    %69 = vector.broadcast %68 : vector<1x256xf32> to vector<8x256xf32>
    %70 = arith.mulf %66, %69 : vector<8x256xf32>
    %c0_134 = arith.constant 0 : index
    %c0_135 = arith.constant 0 : index
    %c0_136 = arith.constant 0 : index
    %71 = vector.load %arg8[%c0_134, %c0_135, %c0_136] : memref<1x8x256xf32, #tpu.memory_space<vmem>>, vector<1x8x256xf32>
    %72 = vector.shape_cast %71 : vector<1x8x256xf32> to vector<8x256xf32>
    %73 = vector.shape_cast %70 : vector<8x256xf32> to vector<1x8x256xf32>
    tpu.vector_store %arg8[%c0_134, %c0_135, %c0_136], %73 {strides = array<i32>} : memref<1x8x256xf32, #tpu.memory_space<vmem>>, vector<1x8x256xf32>,
    return
  }
  func.func @transform_0(%arg0: i32) -> (i32, i32, i32, i32) {
    %c0_i32 = arith.constant 0 : i32
    %c0_i32_0 = arith.constant 0 : i32
    %c0_i32_1 = arith.constant 0 : i32
    %c0_i32_2 = arith.constant 0 : i32
    return %arg0, %c0_i32, %c0_i32_0, %c0_i32_1 : i32, i32, i32, i32
  }
  func.func @transform_1(%arg0: i32) -> (i32, i32, i32) {
    %c0_i32 = arith.constant 0 : i32
    %c0_i32_0 = arith.constant 0 : i32
    %c0_i32_1 = arith.constant 0 : i32
    return %arg0, %c0_i32, %c0_i32_0 : i32, i32, i32
  }
  func.func @transform_2(%arg0: i32) -> (i32, i32, i32) {
    %c0_i32 = arith.constant 0 : i32
    %c0_i32_0 = arith.constant 0 : i32
    %c0_i32_1 = arith.constant 0 : i32
    return %arg0, %c0_i32, %c0_i32_0 : i32, i32, i32
  }
  func.func @transform_3(%arg0: i32) -> (i32, i32) {
    %c0_i32 = arith.constant 0 : i32
    %c0_i32_0 = arith.constant 0 : i32
    %c0_i32_1 = arith.constant 0 : i32
    return %c0_i32, %c0_i32_0 : i32, i32
  }
  func.func @transform_4(%arg0: i32) -> (i32, i32) {
    %c0_i32 = arith.constant 0 : i32
    %c0_i32_0 = arith.constant 0 : i32
    %c0_i32_1 = arith.constant 0 : i32
    return %c0_i32, %c0_i32_0 : i32, i32
  }
  func.func @transform_5(%arg0: i32) -> (i32, i32) {
    %c0_i32 = arith.constant 0 : i32
    %c0_i32_0 = arith.constant 0 : i32
    %c0_i32_1 = arith.constant 0 : i32
    return %c0_i32, %c0_i32_0 : i32, i32
  }
  func.func @transform_6(%arg0: i32) -> (i32, i32) {
    %c0_i32 = arith.constant 0 : i32
    %c0_i32_0 = arith.constant 0 : i32
    %c0_i32_1 = arith.constant 0 : i32
    return %c0_i32, %c0_i32_0 : i32, i32
  }
  func.func @transform_7(%arg0: i32) -> (i32, i32, i32) {
    %c0_i32 = arith.constant 0 : i32
    %c0_i32_0 = arith.constant 0 : i32
    %c0_i32_1 = arith.constant 0 : i32
    return %arg0, %c0_i32, %c0_i32_0 : i32, i32, i32
  }
}

</mosaic_0001>

<bundles_post_ra>
// kernel: map_conv_forward.1
= control target key start
LH: loop header
LB: loop body
LE: loop exit
PB: predicated region body
PF: predicated region fallthrough
CT: control target
= control target key end

     0   :  { %s7543_s24 = smov 0   ;;  %s11571_s0 = inlined_call_operand.vmem [shape: f32[2,4,16,16], index: 0, kind: input, shape index: {}]   ;;  %s11572_s1 = inlined_call_operand.vmem [shape: f32[2,1,256], index: 1, kind: input, shape index: {}]   ;;  %s11573_s2 = inlined_call_operand.vmem [shape: f32[2,1,256], index: 2, kind: input, shape index: {}]   ;;  %s11574_s3 = inlined_call_operand.vmem [shape: f32[8,36], index: 3, kind: input, shape index: {}]   ;;  %s11575_s4 = inlined_call_operand.vmem [shape: f32[8,72], index: 4, kind: input, shape index: {}]   ;;  %s11576_s5 = inlined_call_operand.vmem [shape: f32[8,1], index: 5, kind: input, shape index: {}]   ;;  %s11577_s6 = inlined_call_operand.vmem [shape: f32[8,1], index: 6, kind: input, shape index: {}]   ;;  %s11578_s7 = inlined_call_operand.vmem [shape: f32[2,8,256], index: 7, kind: output, shape index: {}]  }
   0x1 LB: > { %s6979_s25 = sadd.s32 4294967295, %s7487_s24   ;;  %p6983_p0 = scmp.ge.s32.totalorder %s7487_s24, 1  ;;  %s7487_s24 = sphi %s7543_s24, %s17_s24  }
   0x2   : > { %p255_p1 = scmp.lt.s32.totalorder %s7487_s24, 3 }
   0x4   : > { %p256_p2 = pnand %p6983_p0, %p255_p1 }
   0x6   : > { %259 = sbr.rel (%p256_p2) target bundleno = 1772 (0x6ec), region = 48 }
   0xd   : > { %p7553_p3 = scmp.lt.s32.totalorder %s6979_s25, 1  ;;  %vm321_vm0 = vcmask 146432   ;;  %v11579_v0 = vmov 0.0   ;;  %vm324_vm1 = vcmask 140288   ;;  %s7490_s8 = smov 1   ;;  %vm367_vm2 = vcmask 138248  }
   0xe   : > { %326 = vst.msk [vmem:[#allocation2 + $0x18] sm:$0xff] %vm321_vm0, %v11579_v0  ;;  %327 = vst.msk [vmem:[#allocation2 + $0x20] sm:$0xff] %vm321_vm0, %v11579_v0  ;;  %2455 = vmatprep.mubr.f32.mxu0 %v11579_v0  ;;  %6875 = vmatprep.mubr.f32.mxu1 %v11579_v0  ;;  %vm384_vm3 = vcmask 130048   ;;  %s7491_s9 = smov 127   ;;  %s7492_s10 = smov 126   ;;  %v798_v46 = vlaneseq  ;;  %vm2302_vm4 = vcmask 261120  }
   0xf   : > { %322 = vst.msk [vmem:[#allocation2] sm:$0xff] %vm321_vm0, %v11579_v0  ;;  %323 = vst.msk [vmem:[#allocation2 + $0x8] sm:$0xff] %vm321_vm0, %v11579_v0  ;;  %s12221_s25 = smov (!%p7553_p3, %s6979_s25), 1  ;;  %v7493_v44 = vmov 1983009808   ;;  %s7495_s11 = smov 32  }
  0x10   : > { %329 = vst.msk [vmem:[#allocation2 + $0x30] sm:$0xff] %vm321_vm0, %v11579_v0  ;;  %330 = vst.msk [vmem:[#allocation2 + $0x38] sm:$0xff] %vm321_vm0, %v11579_v0  ;;  %s6996_s27 = sshll.u32 %s12221_s25, 6  ;;  %v796_v45 = vunpack.c.l.s4 %v7493_v44  ;;  %v7769_v51 = vshrl.u32 %v798_v46, 7  ;;  %v7494_v52 = vmov 1934713408  }
  0x11   : > { %332 = vst.msk [vmem:[#allocation2 + $0x48] sm:$0xff] %vm321_vm0, %v11579_v0  ;;  %333 = vst.msk [vmem:[#allocation2 + $0x50] sm:$0xff] %vm321_vm0, %v11579_v0  ;;  %s299_s30 = scalar_lea.vmem %s11571_s0, %s6996_s27  ;;  %v860_v53 = vunpack.c.l.s4 %v7494_v52  ;;  %s7496_s12 = smov 64   ;;  %vm2308_vm5 = vcmask 392192   ;;  %vm2314_vm6 = vcmask 523264   ;;  %vm2320_vm7 = vcmask 654336  }
  0x12   : > { %2794 = vst.msk [vmem:[#allocation3] sm:$0xff] %vm321_vm0, %v11579_v0  ;;  %2795 = vst.msk [vmem:[#allocation3 + $0x8] sm:$0xff] %vm321_vm0, %v11579_v0  ;;  %v315_v1 = vld [vmem:[%s299_s30 + $0x10] sm:$0xff]  ;;  %v313_v2 = vld [vmem:[%s299_s30] sm:$0xff]  ;;  %v797_v50 = vunpack.c.0.s8 %v796_v45  ;;  %s7497_s13 = smov 96   ;;  %s7498_s14 = smov 16  }
  0x13   : > { %2797 = vst.msk [vmem:[#allocation3 + $0x18] sm:$0xff] %vm321_vm0, %v11579_v0  ;;  %2798 = vst.msk [vmem:[#allocation3 + $0x20] sm:$0xff] %vm321_vm0, %v11579_v0  ;;  %347 = vrot.lane.b32.xlu1 %v315_v1, %s7490_s8  ;;  %343 = vrot.lane.b32.xlu0 %v313_v2, %s7490_s8  ;;  %v316_v3 = vld [vmem:[%s299_s30 + $0x18] sm:$0xff]  ;;  %v314_v4 = vld [vmem:[%s299_s30 + $0x8] sm:$0xff]  ;;  %v861_v63 = vunpack.c.0.s8 %v860_v53  ;;  %s7499_s15 = smov 48   ;;  %s7500_s16 = smov 80  }
  0x14   : > { %2800 = vst.msk [vmem:[#allocation3 + $0x30] sm:$0xff] %vm321_vm0, %v11579_v0  ;;  %2801 = vst.msk [vmem:[#allocation3 + $0x38] sm:$0xff] %vm321_vm0, %v11579_v0  ;;  %v318_v5 = vld [vmem:[%s299_s30 + $0x28] sm:$0xff]  ;;  %v317_v6 = vld [vmem:[%s299_s30 + $0x20] sm:$0xff]  ;;  %v7784_v61 = vsub.s32 %v797_v50, %v7769_v51  ;;  %s7501_s17 = smov 112   ;;  %vm2326_vm8 = vcmask 785408  }
  0x15   : > { %2803 = vst.msk [vmem:[#allocation3 + $0x48] sm:$0xff] %vm321_vm0, %v11579_v0  ;;  %2804 = vst.msk [vmem:[#allocation3 + $0x50] sm:$0xff] %vm321_vm0, %v11579_v0  ;;  %v320_v7 = vld [vmem:[%s299_s30 + $0x38] sm:$0xff]  ;;  %v319_v8 = vld [vmem:[%s299_s30 + $0x30] sm:$0xff]  ;;  %vm2332_vm9 = vcmask 916480   ;;  %vm2384_vm10 = vcmask 1043456  }
  0x16   : > { %2806 = vst.msk [vmem:[#allocation3 + $0x60] sm:$0xff] %vm321_vm0, %v11579_v0  ;;  %2807 = vst.msk [vmem:[#allocation3 + $0x68] sm:$0xff] %vm321_vm0, %v11579_v0  ;;  %vm2380_vm11 = vcmask 293888   ;;  %s6986_s22 = sshll.u32 %s12221_s25, 1  ;;  %vm6807_vm12 = vcmask 588800  }
  0x17   : > { %2809 = vst.msk [vmem:[#allocation3 + $0x78] sm:$0xff] %vm321_vm0, %v11579_v0  ;;  %2810 = vst.msk [vmem:[#allocation3 + $0x80] sm:$0xff] %vm321_vm0, %v11579_v0  ;;  %349 = vrot.lane.b32.xlu1 %v316_v3, %s7490_s8  ;;  %345 = vrot.lane.b32.xlu0 %v314_v4, %s7490_s8  ;;  %s303_s27 = scalar_lea.vmem %s11572_s1, %s6986_s22 }
  0x18   : > { %2812 = vst.msk [vmem:[#allocation3 + $0x90] sm:$0xff] %vm321_vm0, %v11579_v0  ;;  %2813 = vst.msk [vmem:[#allocation3 + $0x98] sm:$0xff] %vm321_vm0, %v11579_v0 }
  0x19   : > { %2815 = vst.msk [vmem:[#allocation3 + $0xa8] sm:$0xff] %vm321_vm0, %v11579_v0  ;;  %2816 = vst.msk [vmem:[#allocation3 + $0xb0] sm:$0xff] %vm321_vm0, %v11579_v0 }
  0x1a   : > { %328 = vst.msk [vmem:[#allocation2 + $0x28] sm:$0x3] %vm324_vm1, %v11579_v0  ;;  %325 = vst.msk [vmem:[#allocation2 + $0x10] sm:$0x3] %vm324_vm1, %v11579_v0 }
  0x1b   : > { %331 = vst.msk [vmem:[#allocation2 + $0x40] sm:$0x3] %vm324_vm1, %v11579_v0  ;;  %334 = vst.msk [vmem:[#allocation2 + $0x58] sm:$0x3] %vm324_vm1, %v11579_v0  ;;  %353 = vrot.lane.b32.xlu1 %v318_v5, %s7490_s8  ;;  %351 = vrot.lane.b32.xlu0 %v317_v6, %s7490_s8 }
  0x1c   : > { %2796 = vst.msk [vmem:[#allocation3 + $0x10] sm:$0x3] %vm324_vm1, %v11579_v0  ;;  %2799 = vst.msk [vmem:[#allocation3 + $0x28] sm:$0x3] %vm324_vm1, %v11579_v0 }
  0x1d   : > { %2802 = vst.msk [vmem:[#allocation3 + $0x40] sm:$0x3] %vm324_vm1, %v11579_v0  ;;  %2805 = vst.msk [vmem:[#allocation3 + $0x58] sm:$0x3] %vm324_vm1, %v11579_v0 }
  0x1e   : > { %2808 = vst.msk [vmem:[#allocation3 + $0x70] sm:$0x3] %vm324_vm1, %v11579_v0  ;;  %2811 = vst.msk [vmem:[#allocation3 + $0x88] sm:$0x3] %vm324_vm1, %v11579_v0 }
  0x1f   : > { %2814 = vst.msk [vmem:[#allocation3 + $0xa0] sm:$0x3] %vm324_vm1, %v11579_v0  ;;  %2817 = vst.msk [vmem:[#allocation3 + $0xb8] sm:$0x3] %vm324_vm1, %v11579_v0  ;;  %357 = vrot.lane.b32.xlu1 %v320_v7, %s7490_s8  ;;  %355 = vrot.lane.b32.xlu0 %v319_v8, %s7490_s8 }
  0x20   : > { %11801 = vst [vmem:[#allocation6_spill] sm:$0xff] %v7769_v51 }
  0x85   : > { %v348_v9 = vpop.permute.xlu1 %347  ;;  %v344_v10 = vpop.permute.xlu0 %343 }
  0x86   : > { %370 = vst.msk [vmem:[#allocation2 + $0x19] sm:$0xff] %vm367_vm2, %v348_v9  ;;  %368 = vst.msk [vmem:[#allocation2 + $0x1] sm:$0xff] %vm367_vm2, %v344_v10 }
  0x89   : > { %v350_v11 = vpop.permute.xlu1 %349  ;;  %v346_v12 = vpop.permute.xlu0 %345 }
  0x8a   : > { %371 = vst.msk [vmem:[#allocation2 + $0x21] sm:$0xff] %vm367_vm2, %v350_v11  ;;  %369 = vst.msk [vmem:[#allocation2 + $0x9] sm:$0xff] %vm367_vm2, %v346_v12  ;;  %v7809_v11 = vsub.s32 %v861_v63, %v7769_v51 }
  0x8d   : > { %v7641_v13 = vld [vmem:[#allocation2 + $0x18] sm:$0xff]  ;;  %v7645_v15 = vld [vmem:[#allocation2] sm:$0xff]  ;;  %v354_v16 = vpop.permute.xlu1 %353  ;;  %v352_v17 = vpop.permute.xlu0 %351 }
  0x8e   : > { %v7643_v14 = vld [vmem:[#allocation2 + $0x19] sm:$0xff]  ;;  %387 = vst.msk [vmem:[#allocation4 + $0x10] sm:$0xff] %vm384_vm3, %v7641_v13  ;;  %385 = vst.msk [vmem:[#allocation4] sm:$0xff] %vm384_vm3, %v7645_v15  ;;  %v7653_v18 = vld [vmem:[#allocation2 + $0x1] sm:$0xff] }
  0x8f   : > { %502 = vst.msk [vmem:[#allocation4 + $0xd0] sm:$0xff] %vm384_vm3, %v7643_v14  ;;  %500 = vst.msk [vmem:[#allocation4 + $0xc0] sm:$0xff] %vm384_vm3, %v7653_v18 }
  0x90   : > { %373 = vst.msk [vmem:[#allocation2 + $0x39] sm:$0xff] %vm367_vm2, %v354_v16  ;;  %372 = vst.msk [vmem:[#allocation2 + $0x31] sm:$0xff] %vm367_vm2, %v352_v17 }
  0x91   : > { %v379_v19 = vld [vmem:[#allocation2 + $0x20] sm:$0xff]  ;;  %v358_v22 = vpop.permute.xlu1 %357  ;;  %v356_v23 = vpop.permute.xlu0 %355  ;;  %v377_v25 = vld [vmem:[#allocation2 + $0x8] sm:$0xff] }
  0x92   : > { %v7659_v20 = vld [vmem:[#allocation2 + $0x21] sm:$0xff]  ;;  %388 = vst.msk [vmem:[#allocation4 + $0x18] sm:$0xff] %vm384_vm3, %v379_v19  ;;  %v492_v26 = vld [vmem:[#allocation2 + $0x9] sm:$0xff]  ;;  %415 = vrot.lane.b32.xlu1 %v379_v19, %s7491_s9  ;;  %386 = vst.msk [vmem:[#allocation4 + $0x8] sm:$0xff] %vm384_vm3, %v377_v25  ;;  %411 = vrot.lane.b32.xlu0 %v377_v25, %s7491_s9 }
  0x93   : > { %v7661_v21 = vld [vmem:[#allocation2 + $0x1a] sm:$0xff]  ;;  %503 = vst.msk [vmem:[#allocation4 + $0xd8] sm:$0xff] %vm384_vm3, %v7659_v20  ;;  %v7666_v24 = vld [vmem:[#allocation2 + $0x22] sm:$0xff]  ;;  %501 = vst.msk [vmem:[#allocation4 + $0xc8] sm:$0xff] %vm384_vm3, %v492_v26 }
  0x94   : > { %617 = vst.msk [vmem:[#allocation4 + $0x190] sm:$0xff] %vm384_vm3, %v7661_v21  ;;  %618 = vst.msk [vmem:[#allocation4 + $0x198] sm:$0xff] %vm384_vm3, %v7666_v24  ;;  %v7677_v27 = vld [vmem:[#allocation2 + $0x2] sm:$0xff]  ;;  %v7679_v28 = vld [vmem:[#allocation2 + $0xa] sm:$0xff] }
  0x95   : > { %375 = vst.msk [vmem:[#allocation2 + $0x51] sm:$0xff] %vm367_vm2, %v358_v22  ;;  %374 = vst.msk [vmem:[#allocation2 + $0x49] sm:$0xff] %vm367_vm2, %v356_v23  ;;  %v7881_v46 = vld [vmem:[#allocation4] sm:$0xff] }
  0x96   : > { %615 = vst.msk [vmem:[#allocation4 + $0x180] sm:$0xff] %vm384_vm3, %v7677_v27  ;;  %616 = vst.msk [vmem:[#allocation4 + $0x188] sm:$0xff] %vm384_vm3, %v7679_v28 }
  0x97   : > { %v496_v29 = vld [vmem:[#allocation2 + $0x39] sm:$0xff]  ;;  %v380_v31 = vld [vmem:[#allocation2 + $0x30] sm:$0xff] }
  0x98   : > { %v611_v30 = vld [vmem:[#allocation2 + $0x3a] sm:$0xff]  ;;  %505 = vst.msk [vmem:[#allocation4 + $0xe8] sm:$0xff] %vm384_vm3, %v496_v29  ;;  %389 = vst.msk [vmem:[#allocation4 + $0x20] sm:$0xff] %vm384_vm3, %v380_v31  ;;  %v495_v33 = vld [vmem:[#allocation2 + $0x31] sm:$0xff] }
  0x99   : > { %620 = vst.msk [vmem:[#allocation4 + $0x1a8] sm:$0xff] %vm384_vm3, %v611_v30  ;;  %v381_v32 = vld [vmem:[#allocation2 + $0x38] sm:$0xff]  ;;  %504 = vst.msk [vmem:[#allocation4 + $0xe0] sm:$0xff] %vm384_vm3, %v495_v33  ;;  %v7777_v59 = vld [vmem:[#allocation4 + $0x8] sm:$0xff] }
  0x9a   : > { %v610_v34 = vld [vmem:[#allocation2 + $0x32] sm:$0xff]  ;;  %390 = vst.msk [vmem:[#allocation4 + $0x28] sm:$0xff] %vm384_vm3, %v381_v32  ;;  %419 = vrot.lane.b32.xlu0 %v381_v32, %s7491_s9 }
  0x9b   : > { %619 = vst.msk [vmem:[#allocation4 + $0x1a0] sm:$0xff] %vm384_vm3, %v610_v34  ;;  %v7771_v54 = vld [vmem:[#allocation4 + $0x18] sm:$0xff] }
  0x9c   : > { %v498_v35 = vld [vmem:[#allocation2 + $0x51] sm:$0xff]  ;;  %v382_v37 = vld [vmem:[#allocation2 + $0x48] sm:$0xff] }
  0x9d   : > { %v613_v36 = vld [vmem:[#allocation2 + $0x52] sm:$0xff]  ;;  %507 = vst.msk [vmem:[#allocation4 + $0xf8] sm:$0xff] %vm384_vm3, %v498_v35  ;;  %391 = vst.msk [vmem:[#allocation4 + $0x30] sm:$0xff] %vm384_vm3, %v382_v37  ;;  %v497_v39 = vld [vmem:[#allocation2 + $0x49] sm:$0xff] }
  0x9e   : > { %622 = vst.msk [vmem:[#allocation4 + $0x1b8] sm:$0xff] %vm384_vm3, %v613_v36  ;;  %v383_v38 = vld [vmem:[#allocation2 + $0x50] sm:$0xff]  ;;  %506 = vst.msk [vmem:[#allocation4 + $0xf0] sm:$0xff] %vm384_vm3, %v497_v39  ;;  %460 = vrot.lane.b32.xlu0 %v377_v25, %s7492_s10  ;;  %v7811_v12 = vld [vmem:[#allocation4 + $0xd8] sm:$0xff] }
  0x9f   : > { %v612_v40 = vld [vmem:[#allocation2 + $0x4a] sm:$0xff]  ;;  %392 = vst.msk [vmem:[#allocation4 + $0x38] sm:$0xff] %vm384_vm3, %v383_v38  ;;  %423 = vrot.lane.b32.xlu1 %v383_v38, %s7491_s9 }
  0xa0   : > { %621 = vst.msk [vmem:[#allocation4 + $0x1b0] sm:$0xff] %vm384_vm3, %v612_v40 }
  0xa1   : > { %v7773_v55 = vld [vmem:[#allocation4 + $0x28] sm:$0xff] }
  0xa2   : > { %468 = vrot.lane.b32.xlu0 %v381_v32, %s7492_s10  ;;  %v1405_v62 = vcombine.low %v7777_v59, %v7773_v55 }
  0xa3   : > { %464 = vrot.lane.b32.xlu1 %v379_v19, %s7492_s10 }
  0xa4   : > { %v7799_v8 = vld [vmem:[#allocation4 + $0xf8] sm:$0xff]  ;;  %v7804_v9 = vrot.slane %v1405_v62, %v7784_v61 }
  0xa5   : > { %v1589_v17 = vcombine.low %v7811_v12, %v7799_v8  ;;  %v7897_v62 = vld [vmem:[#allocation4 + $0xf0] sm:$0xff] }
  0xa6   : > { %409 = vrot.lane.b32.xlu0 %v7645_v15, %s7491_s9  ;;  %v7765_v49 = vld [vmem:[#allocation4 + $0x38] sm:$0xff] }
  0xa7   : > { %472 = vrot.lane.b32.xlu1 %v383_v38, %s7492_s10  ;;  %v1421_v56 = vcombine.low %v7771_v54, %v7765_v49 }
  0xa9   : > { %v7791_v2 = vrot.slane %v1421_v56, %v7784_v61 }
  0xaa   : > { %417 = vrot.lane.b32.xlu0 %v380_v31, %s7491_s9 }
  0xab   : > { %413 = vrot.lane.b32.xlu1 %v7641_v13, %s7491_s9  ;;  %v1469_v16 = vcombine.low %v7804_v9, %v7791_v2 }
  0xad   : > { %v7838_v25 = vrot.slane %v1469_v16, %v7809_v11  ;;  %v7912_v16 = vld [vmem:[#allocation4 + $0xe0] sm:$0xff] }
  0xae   : > { %458 = vrot.lane.b32.xlu0 %v7645_v15, %s7492_s10 }
  0xaf   : > { %421 = vrot.lane.b32.xlu1 %v382_v37, %s7491_s9  ;;  %11802 = vst [vmem:[#allocation7_spill] sm:$0xff] %v7838_v25 }
  0xb2   : > { %466 = vrot.lane.b32.xlu0 %v380_v31, %s7492_s10 }
  0xb3   : > { %462 = vrot.lane.b32.xlu1 %v7641_v13, %s7492_s10  ;;  %v7813_v13 = vld [vmem:[#allocation4 + $0xe8] sm:$0xff] }
  0xb6   : > { %526 = vrot.lane.b32.xlu0 %v492_v26, %s7491_s9 }
  0xb7   : > { %470 = vrot.lane.b32.xlu1 %v382_v37, %s7492_s10 }
  0xba   : > { %534 = vrot.lane.b32.xlu0 %v496_v29, %s7491_s9 }
  0xbb   : > { %530 = vrot.lane.b32.xlu1 %v7659_v20, %s7491_s9 }
  0xbe   : > { %575 = vrot.lane.b32.xlu0 %v492_v26, %s7492_s10 }
  0xbf   : > { %538 = vrot.lane.b32.xlu1 %v498_v35, %s7491_s9 }
  0xc2   : > { %583 = vrot.lane.b32.xlu0 %v496_v29, %s7492_s10 }
  0xc3   : > { %579 = vrot.lane.b32.xlu1 %v7659_v20, %s7492_s10 }
  0xc6   : > { %641 = vrot.lane.b32.xlu0 %v7679_v28, %s7491_s9 }
  0xc7   : > { %587 = vrot.lane.b32.xlu1 %v498_v35, %s7492_s10 }
  0xca   : > { %649 = vrot.lane.b32.xlu0 %v611_v30, %s7491_s9 }
  0xcb   : > { %645 = vrot.lane.b32.xlu1 %v7666_v24, %s7491_s9 }
  0xce   : > { %524 = vrot.lane.b32.xlu0 %v7653_v18, %s7491_s9 }
  0xcf   : > { %653 = vrot.lane.b32.xlu1 %v613_v36, %s7491_s9 }
  0xd2   : > { %532 = vrot.lane.b32.xlu0 %v495_v33, %s7491_s9 }
  0xd3   : > { %528 = vrot.lane.b32.xlu1 %v7643_v14, %s7491_s9 }
  0xd6   : > { %573 = vrot.lane.b32.xlu0 %v7653_v18, %s7492_s10 }
  0xd7   : > { %536 = vrot.lane.b32.xlu1 %v497_v39, %s7491_s9 }
  0xda   : > { %581 = vrot.lane.b32.xlu0 %v495_v33, %s7492_s10 }
  0xdb   : > { %577 = vrot.lane.b32.xlu1 %v7643_v14, %s7492_s10 }
  0xde   : > { %639 = vrot.lane.b32.xlu0 %v7677_v27, %s7491_s9 }
  0xdf   : > { %585 = vrot.lane.b32.xlu1 %v497_v39, %s7492_s10 }
  0xe2   : > { %647 = vrot.lane.b32.xlu0 %v610_v34, %s7491_s9 }
  0xe3   : > { %643 = vrot.lane.b32.xlu1 %v7661_v21, %s7491_s9 }
  0xe6   : > { %690 = vrot.lane.b32.xlu0 %v7679_v28, %s7492_s10  ;;  %v7846_v28 = vrot.slane %v1589_v17, %v7784_v61 }
  0xe7   : > { %651 = vrot.lane.b32.xlu1 %v612_v40, %s7491_s9 }
  0xea   : > { %698 = vrot.lane.b32.xlu0 %v611_v30, %s7492_s10 }
  0xeb   : > { %694 = vrot.lane.b32.xlu1 %v7666_v24, %s7492_s10 }
  0xee   : > { %688 = vrot.lane.b32.xlu0 %v7677_v27, %s7492_s10 }
  0xef   : > { %702 = vrot.lane.b32.xlu1 %v613_v36, %s7492_s10  ;;  %v7861_v36 = vld [vmem:[#allocation4 + $0x30] sm:$0xff] }
  0xf2   : > { %696 = vrot.lane.b32.xlu0 %v610_v34, %s7492_s10 }
  0xf3   : > { %692 = vrot.lane.b32.xlu1 %v7661_v21, %s7492_s10  ;;  %v7827_v21 = vld [vmem:[#allocation4 + $0xc8] sm:$0xff] }
  0xf4   : > { %v1573_v23 = vcombine.low %v7827_v21, %v7813_v13 }
  0xf6   : > { %v7859_v35 = vrot.slane %v1573_v23, %v7784_v61 }
  0xf7   : > { %700 = vrot.lane.b32.xlu1 %v612_v40, %s7492_s10  ;;  %v7871_v40 = vld [vmem:[#allocation4 + $0x10] sm:$0xff] }
  0xf8   : > { %v1637_v39 = vcombine.low %v7859_v35, %v7846_v28  ;;  %v809_v44 = vcombine.low %v7871_v40, %v7861_v36 }
  0xfa   : > { %v7891_v52 = vrot.slane %v1637_v39, %v7809_v11  ;;  %v7900_v63 = vrot.slane %v809_v44, %v7784_v61 }
  0xfc   : > { %11805 = vst [vmem:[#allocation10_spill] sm:$0xff] %v7891_v52 }
 0x104   : > { %v416_v41 = vpop.permute.xlu1 %415  ;;  %v412_v42 = vpop.permute.xlu0 %411 }
 0x105   : > { %437 = vst.msk [vmem:[#allocation4 + $0x58] sm:$0xff] %vm384_vm3, %v416_v41  ;;  %435 = vst.msk [vmem:[#allocation4 + $0x48] sm:$0xff] %vm384_vm3, %v412_v42  ;;  %v7873_v41 = vld [vmem:[#allocation4 + $0x20] sm:$0xff] }
 0x10c   : > { %v420_v43 = vpop.permute.xlu0 %419  ;;  %v7788_v1 = vld [vmem:[#allocation4 + $0x48] sm:$0xff]  ;;  %v7795_v6 = vld [vmem:[#allocation4 + $0x58] sm:$0xff] }
 0x10d   : > { %439 = vst.msk [vmem:[#allocation4 + $0x68] sm:$0xff] %vm384_vm3, %v420_v43 }
 0x110   : > { %v461_v48 = vpop.permute.xlu0 %460 }
 0x111   : > { %v424_v47 = vpop.permute.xlu1 %423  ;;  %484 = vst.msk [vmem:[#allocation4 + $0x88] sm:$0xff] %vm384_vm3, %v461_v48  ;;  %v793_v48 = vcombine.low %v7881_v46, %v7873_v41 }
 0x112   : > { %441 = vst.msk [vmem:[#allocation4 + $0x78] sm:$0xff] %vm384_vm3, %v424_v47 }
 0x113   : > { %v7915_v17 = vrot.slane %v793_v48, %v7784_v61 }
 0x114   : > { %v469_v58 = vpop.permute.xlu0 %468  ;;  %v7779_v60 = vld [vmem:[#allocation4 + $0x68] sm:$0xff] }
 0x115   : > { %v465_v57 = vpop.permute.xlu1 %464  ;;  %488 = vst.msk [vmem:[#allocation4 + $0xa8] sm:$0xff] %vm384_vm3, %v469_v58  ;;  %v1437_v3 = vcombine.low %v7788_v1, %v7779_v60  ;;  %v857_v39 = vcombine.low %v7915_v17, %v7900_v63 }
 0x116   : > { %486 = vst.msk [vmem:[#allocation4 + $0x98] sm:$0xff] %vm384_vm3, %v465_v57 }
 0x117   : > { %v7816_v14 = vrot.slane %v1437_v3, %v7784_v61 }
 0x118   : > { %v410_v5 = vpop.permute.xlu0 %409  ;;  %v7835_v24 = vld [vmem:[#allocation4 + $0x88] sm:$0xff] }
 0x119   : > { %v473_v4 = vpop.permute.xlu1 %472  ;;  %v7797_v7 = vld [vmem:[#allocation4 + $0x78] sm:$0xff]  ;;  %434 = vst.msk [vmem:[#allocation4 + $0x40] sm:$0xff] %vm384_vm3, %v410_v5 }
 0x11a   : > { %490 = vst.msk [vmem:[#allocation4 + $0xb8] sm:$0xff] %vm384_vm3, %v473_v4  ;;  %v1453_v10 = vcombine.low %v7795_v6, %v7797_v7 }
 0x11c   : > { %v7819_v15 = vrot.slane %v1453_v10, %v7784_v61  ;;  %v418_v19 = vpop.permute.xlu0 %417  ;;  %v7825_v20 = vld [vmem:[#allocation4 + $0xa8] sm:$0xff]  ;;  %v7910_v10 = vld [vmem:[#allocation4 + $0xd0] sm:$0xff] }
 0x11d   : > { %v414_v18 = vpop.permute.xlu1 %413  ;;  %438 = vst.msk [vmem:[#allocation4 + $0x60] sm:$0xff] %vm384_vm3, %v418_v19  ;;  %v1541_v27 = vcombine.low %v7835_v24, %v7825_v20  ;;  %v7848_v31 = vld [vmem:[#allocation4 + $0x98] sm:$0xff]  ;;  %v977_v19 = vcombine.low %v7910_v10, %v7897_v62 }
 0x11e   : > { %436 = vst.msk [vmem:[#allocation4 + $0x50] sm:$0xff] %vm384_vm3, %v414_v18  ;;  %v1501_v22 = vcombine.low %v7816_v14, %v7819_v15 }
 0x11f   : > { %v7864_v37 = vrot.slane %v1541_v27, %v7784_v61  ;;  %v7944_v48 = vrot.slane %v977_v19, %v7784_v61 }
 0x120   : > { %v7841_v26 = vrot.slane %v1501_v22, %v7809_v11  ;;  %v459_v30 = vpop.permute.xlu0 %458  ;;  %v7893_v53 = vld [vmem:[#allocation4 + $0x40] sm:$0xff] }
 0x121   : > { %v422_v29 = vpop.permute.xlu1 %421  ;;  %v7850_v32 = vld [vmem:[#allocation4 + $0xb8] sm:$0xff]  ;;  %483 = vst.msk [vmem:[#allocation4 + $0x80] sm:$0xff] %vm384_vm3, %v459_v30  ;;  %11806 = vst [vmem:[#allocation11_spill] sm:$0xff] %v7893_v53 }
 0x122   : > { %11803 = vst [vmem:[#allocation8_spill] sm:$0xff] %v7841_v26  ;;  %440 = vst.msk [vmem:[#allocation4 + $0x70] sm:$0xff] %vm384_vm3, %v422_v29  ;;  %v1557_v34 = vcombine.low %v7848_v31, %v7850_v32  ;;  %v7923_v29 = vld [vmem:[#allocation4 + $0xc0] sm:$0xff] }
 0x124   : > { %v7867_v38 = vrot.slane %v1557_v34, %v7784_v61  ;;  %v467_v43 = vpop.permute.xlu0 %466  ;;  %v7883_v47 = vld [vmem:[#allocation4 + $0x60] sm:$0xff] }
 0x125   : > { %v463_v42 = vpop.permute.xlu1 %462  ;;  %487 = vst.msk [vmem:[#allocation4 + $0xa0] sm:$0xff] %vm384_vm3, %v467_v43  ;;  %11804 = vst [vmem:[#allocation9_spill] sm:$0xff] %v7883_v47  ;;  %v825_v3 = vcombine.low %v7893_v53, %v7883_v47  ;;  %v7908_v5 = vld [vmem:[#allocation4 + $0x50] sm:$0xff] }
 0x126   : > { %485 = vst.msk [vmem:[#allocation4 + $0x90] sm:$0xff] %vm384_vm3, %v463_v42  ;;  %v1605_v45 = vcombine.low %v7864_v37, %v7867_v38  ;;  %11808 = vst [vmem:[#allocation13_spill] sm:$0xff] %v7908_v5  ;;  %v961_v42 = vcombine.low %v7923_v29, %v7912_v16 }
 0x127   : > { %v7926_v30 = vrot.slane %v825_v3, %v7784_v61 }
 0x128   : > { %v7888_v50 = vrot.slane %v1605_v45, %v7809_v11  ;;  %v527_v57 = vpop.permute.xlu0 %526  ;;  %v7937_v43 = vld [vmem:[#allocation4 + $0x80] sm:$0xff]  ;;  %v7961_v33 = vrot.slane %v961_v42, %v7784_v61 }
 0x129   : > { %v471_v56 = vpop.permute.xlu1 %470  ;;  %v7895_v58 = vld [vmem:[#allocation4 + $0x70] sm:$0xff]  ;;  %550 = vst.msk [vmem:[#allocation4 + $0x108] sm:$0xff] %vm384_vm3, %v527_v57  ;;  %11810 = vst [vmem:[#allocation15_spill] sm:$0xff] %v7926_v30 }
 0x12a   : > { %11807 = vst [vmem:[#allocation12_spill] sm:$0xff] %v7895_v58  ;;  %489 = vst.msk [vmem:[#allocation4 + $0xb0] sm:$0xff] %vm384_vm3, %v471_v56  ;;  %v841_v18 = vcombine.low %v7908_v5, %v7895_v58  ;;  %v8145_v58 = vld [vmem:[#allocation4 + $0x180] sm:$0xff] }
 0x12b   : > { %11812 = vst [vmem:[#allocation17_spill] sm:$0xff] %v7937_v43  ;;  %11857 = vst [vmem:[#allocation62_spill] sm:$0xff] %v8145_v58 }
 0x12c   : > { %v535_v23 = vpop.permute.xlu0 %534  ;;  %v7921_v27 = vld [vmem:[#allocation4 + $0xa0] sm:$0xff]  ;;  %v7929_v34 = vrot.slane %v841_v18, %v7784_v61 }
 0x12d   : > { %v531_v22 = vpop.permute.xlu1 %530  ;;  %11809 = vst [vmem:[#allocation14_spill] sm:$0xff] %v7921_v27  ;;  %554 = vst.msk [vmem:[#allocation4 + $0x128] sm:$0xff] %vm384_vm3, %v535_v23  ;;  %v929_v45 = vcombine.low %v7937_v43, %v7921_v27  ;;  %v7946_v3 = vld [vmem:[#allocation4 + $0x90] sm:$0xff]  ;;  %v8037_v27 = vld [vmem:[#allocation4 + $0x188] sm:$0xff] }
 0x12e   : > { %11811 = vst [vmem:[#allocation16_spill] sm:$0xff] %v7929_v34  ;;  %552 = vst.msk [vmem:[#allocation4 + $0x118] sm:$0xff] %vm384_vm3, %v531_v22  ;;  %v889_v44 = vcombine.low %v7926_v30, %v7929_v34  ;;  %v7951_v22 = vrot.slane %v857_v39, %v7809_v11 }
 0x12f   : > { %v7966_v0 = vrot.slane %v929_v45, %v7784_v61  ;;  %11832 = vst [vmem:[#allocation37_spill] sm:$0xff] %v8037_v27 }
 0x130   : > { %v576_v57 = vpop.permute.xlu0 %575  ;;  %11813 = vst [vmem:[#allocation18_spill] sm:$0xff] %v7951_v22  ;;  %v7954_v23 = vrot.slane %v889_v44, %v7809_v11  ;;  %v1025_v44 = vcombine.low %v7961_v33, %v7944_v48  ;;  %v7995_v47 = vld [vmem:[#allocation4 + $0x108] sm:$0xff] }
 0x131   : > { %v539_v56 = vpop.permute.xlu1 %538  ;;  %v7948_v18 = vld [vmem:[#allocation4 + $0xb0] sm:$0xff]  ;;  %599 = vst.msk [vmem:[#allocation4 + $0x148] sm:$0xff] %vm384_vm3, %v576_v57  ;;  %11820 = vst [vmem:[#allocation25_spill] sm:$0xff] %v7995_v47 }
 0x132   : > { %11814 = vst [vmem:[#allocation19_spill] sm:$0xff] %v7954_v23  ;;  %556 = vst.msk [vmem:[#allocation4 + $0x138] sm:$0xff] %vm384_vm3, %v539_v56  ;;  %v945_v19 = vcombine.low %v7946_v3, %v7948_v18  ;;  %v7981_v45 = vrot.slane %v1025_v44, %v7809_v11 }
 0x134   : > { %v7969_v39 = vrot.slane %v945_v19, %v7784_v61  ;;  %v584_v57 = vpop.permute.xlu0 %583  ;;  %11816 = vst [vmem:[#allocation21_spill] sm:$0xff] %v7981_v45  ;;  %v7991_v23 = vld [vmem:[#allocation4 + $0x128] sm:$0xff] }
 0x135   : > { %v580_v56 = vpop.permute.xlu1 %579  ;;  %603 = vst.msk [vmem:[#allocation4 + $0x168] sm:$0xff] %vm384_vm3, %v584_v57  ;;  %v7989_v57 = vld [vmem:[#allocation4 + $0x118] sm:$0xff]  ;;  %11819 = vst [vmem:[#allocation24_spill] sm:$0xff] %v7991_v23 }
 0x136   : > { %601 = vst.msk [vmem:[#allocation4 + $0x158] sm:$0xff] %vm384_vm3, %v580_v56  ;;  %v993_v42 = vcombine.low %v7966_v0, %v7969_v39  ;;  %11818 = vst [vmem:[#allocation23_spill] sm:$0xff] %v7989_v57 }
 0x138   : > { %v7978_v4 = vrot.slane %v993_v42, %v7809_v11  ;;  %v642_v51 = vpop.permute.xlu0 %641 }
 0x139   : > { %v588_v19 = vpop.permute.xlu1 %587  ;;  %v7983_v22 = vld [vmem:[#allocation4 + $0x138] sm:$0xff]  ;;  %665 = vst.msk [vmem:[#allocation4 + $0x1c8] sm:$0xff] %vm384_vm3, %v642_v51  ;;  %v1677_v51 = vcombine.low %v7995_v47, %v7991_v23  ;;  %v8025_v23 = vld [vmem:[#allocation4 + $0x1a8] sm:$0xff] }
 0x13a   : > { %11815 = vst [vmem:[#allocation20_spill] sm:$0xff] %v7978_v4  ;;  %11817 = vst [vmem:[#allocation22_spill] sm:$0xff] %v7983_v22  ;;  %v1693_v42 = vcombine.low %v7989_v57, %v7983_v22  ;;  %v8023_v47 = vld [vmem:[#allocation4 + $0x198] sm:$0xff] }
 0x13b   : > { %605 = vst.msk [vmem:[#allocation4 + $0x178] sm:$0xff] %vm384_vm3, %v588_v19  ;;  %v8003_v19 = vld [vmem:[#allocation4 + $0x148] sm:$0xff]  ;;  %11828 = vst [vmem:[#allocation33_spill] sm:$0xff] %v8023_v47 }
 0x13c   : > { %v650_v53 = vpop.permute.xlu0 %649  ;;  %v7997_v30 = vld [vmem:[#allocation4 + $0x168] sm:$0xff]  ;;  %11822 = vst [vmem:[#allocation27_spill] sm:$0xff] %v8003_v19  ;;  %v8006_v56 = vrot.slane %v1693_v42, %v7784_v61  ;;  %11829 = vst [vmem:[#allocation34_spill] sm:$0xff] %v8025_v23 }
 0x13d   : > { %v646_v44 = vpop.permute.xlu1 %645  ;;  %11821 = vst [vmem:[#allocation26_spill] sm:$0xff] %v7997_v30  ;;  %669 = vst.msk [vmem:[#allocation4 + $0x1e8] sm:$0xff] %vm384_vm3, %v650_v53  ;;  %v1709_v57 = vcombine.low %v8003_v19, %v7997_v30  ;;  %v8010_v45 = vld [vmem:[#allocation4 + $0x158] sm:$0xff]  ;;  %v8019_v53 = vrot.slane %v1677_v51, %v7784_v61 }
 0x13e   : > { %667 = vst.msk [vmem:[#allocation4 + $0x1d8] sm:$0xff] %vm384_vm3, %v646_v44  ;;  %11823 = vst [vmem:[#allocation28_spill] sm:$0xff] %v8006_v56  ;;  %v8014_v44 = vld [vmem:[#allocation4 + $0x1b8] sm:$0xff] }
 0x13f   : > { %11824 = vst [vmem:[#allocation29_spill] sm:$0xff] %v8010_v45  ;;  %11826 = vst [vmem:[#allocation31_spill] sm:$0xff] %v8014_v44  ;;  %v8028_v19 = vrot.slane %v1709_v57, %v7784_v61 }
 0x140   : > { %v525_v4 = vpop.permute.xlu0 %524  ;;  %11827 = vst [vmem:[#allocation32_spill] sm:$0xff] %v8019_v53 }
 0x141   : > { %v654_v22 = vpop.permute.xlu1 %653  ;;  %549 = vst.msk [vmem:[#allocation4 + $0x100] sm:$0xff] %vm384_vm3, %v525_v4  ;;  %11830 = vst [vmem:[#allocation35_spill] sm:$0xff] %v8028_v19  ;;  %v1829_v4 = vcombine.low %v8023_v47, %v8014_v44 }
 0x142   : > { %v8012_v34 = vld [vmem:[#allocation4 + $0x178] sm:$0xff]  ;;  %671 = vst.msk [vmem:[#allocation4 + $0x1f8] sm:$0xff] %vm384_vm3, %v654_v22  ;;  %v1741_v22 = vcombine.low %v8019_v53, %v8006_v56 }
 0x143   : > { %11825 = vst [vmem:[#allocation30_spill] sm:$0xff] %v8012_v34  ;;  %v1725_v42 = vcombine.low %v8010_v45, %v8012_v34  ;;  %v8047_v34 = vld [vmem:[#allocation4 + $0x1c8] sm:$0xff]  ;;  %v8056_v47 = vrot.slane %v1829_v4, %v7784_v61 }
 0x144   : > { %v533_v43 = vpop.permute.xlu0 %532  ;;  %v8039_v45 = vld [vmem:[#allocation4 + $0x1e8] sm:$0xff]  ;;  %11834 = vst [vmem:[#allocation39_spill] sm:$0xff] %v8047_v34  ;;  %v8050_v53 = vrot.slane %v1741_v22, %v7809_v11 }
 0x145   : > { %v8031_v30 = vrot.slane %v1725_v42, %v7784_v61  ;;  %v529_v51 = vpop.permute.xlu1 %528  ;;  %11833 = vst [vmem:[#allocation38_spill] sm:$0xff] %v8039_v45  ;;  %553 = vst.msk [vmem:[#allocation4 + $0x120] sm:$0xff] %vm384_vm3, %v533_v43  ;;  %v1813_v42 = vcombine.low %v8037_v27, %v8025_v23  ;;  %v1845_v43 = vcombine.low %v8047_v34, %v8039_v45 }
 0x146   : > { %551 = vst.msk [vmem:[#allocation4 + $0x110] sm:$0xff] %vm384_vm3, %v529_v51  ;;  %11835 = vst [vmem:[#allocation40_spill] sm:$0xff] %v8050_v53 }
 0x147   : > { %11831 = vst [vmem:[#allocation36_spill] sm:$0xff] %v8031_v30  ;;  %v1773_v57 = vcombine.low %v8028_v19, %v8031_v30  ;;  %v8060_v19 = vld [vmem:[#allocation4 + $0x1d8] sm:$0xff]  ;;  %v8074_v34 = vrot.slane %v1845_v43, %v7784_v61 }
 0x148   : > { %v574_v44 = vpop.permute.xlu0 %573  ;;  %11837 = vst [vmem:[#allocation42_spill] sm:$0xff] %v8060_v19 }
 0x149   : > { %v8053_v56 = vrot.slane %v1773_v57, %v7809_v11  ;;  %v537_v51 = vpop.permute.xlu1 %536  ;;  %v8062_v30 = vld [vmem:[#allocation4 + $0x1f8] sm:$0xff]  ;;  %598 = vst.msk [vmem:[#allocation4 + $0x140] sm:$0xff] %vm384_vm3, %v574_v44  ;;  %v8069_v57 = vrot.slane %v1813_v42, %v7784_v61  ;;  %11839 = vst [vmem:[#allocation44_spill] sm:$0xff] %v8074_v34 }
 0x14a   : > { %11838 = vst [vmem:[#allocation43_spill] sm:$0xff] %v8062_v30  ;;  %555 = vst.msk [vmem:[#allocation4 + $0x130] sm:$0xff] %vm384_vm3, %v537_v51  ;;  %v1861_v4 = vcombine.low %v8060_v19, %v8062_v30 }
 0x14b   : > { %11836 = vst [vmem:[#allocation41_spill] sm:$0xff] %v8053_v56  ;;  %v1877_v51 = vcombine.low %v8069_v57, %v8056_v47 }
 0x14c   : > { %v8077_v45 = vrot.slane %v1861_v4, %v7784_v61  ;;  %v582_v44 = vpop.permute.xlu0 %581  ;;  %v8099_v53 = vld [vmem:[#allocation4 + $0x120] sm:$0xff] }
 0x14d   : > { %v578_v27 = vpop.permute.xlu1 %577  ;;  %602 = vst.msk [vmem:[#allocation4 + $0x160] sm:$0xff] %vm384_vm3, %v582_v44  ;;  %v8086_v22 = vrot.slane %v1877_v51, %v7809_v11  ;;  %v8097_v44 = vld [vmem:[#allocation4 + $0x110] sm:$0xff]  ;;  %11845 = vst [vmem:[#allocation50_spill] sm:$0xff] %v8099_v53 }
 0x14e   : > { %11840 = vst [vmem:[#allocation45_spill] sm:$0xff] %v8077_v45  ;;  %600 = vst.msk [vmem:[#allocation4 + $0x150] sm:$0xff] %vm384_vm3, %v578_v27  ;;  %v1909_v42 = vcombine.low %v8074_v34, %v8077_v45  ;;  %v8103_v34 = vld [vmem:[#allocation4 + $0x100] sm:$0xff] }
 0x14f   : > { %11841 = vst [vmem:[#allocation46_spill] sm:$0xff] %v8086_v22  ;;  %11844 = vst [vmem:[#allocation49_spill] sm:$0xff] %v8097_v44 }
 0x150   : > { %v8089_v43 = vrot.slane %v1909_v42, %v7809_v11  ;;  %v640_v19 = vpop.permute.xlu0 %639  ;;  %11846 = vst [vmem:[#allocation51_spill] sm:$0xff] %v8103_v34 }
 0x151   : > { %v586_v4 = vpop.permute.xlu1 %585  ;;  %v8091_v30 = vld [vmem:[#allocation4 + $0x130] sm:$0xff]  ;;  %664 = vst.msk [vmem:[#allocation4 + $0x1c0] sm:$0xff] %vm384_vm3, %v640_v19  ;;  %v1065_v19 = vcombine.low %v8103_v34, %v8099_v53  ;;  %v8133_v53 = vld [vmem:[#allocation4 + $0x1a0] sm:$0xff] }
 0x152   : > { %11842 = vst [vmem:[#allocation47_spill] sm:$0xff] %v8089_v43  ;;  %11843 = vst [vmem:[#allocation48_spill] sm:$0xff] %v8091_v30  ;;  %v1081_v51 = vcombine.low %v8097_v44, %v8091_v30  ;;  %v8131_v34 = vld [vmem:[#allocation4 + $0x190] sm:$0xff] }
 0x153   : > { %604 = vst.msk [vmem:[#allocation4 + $0x170] sm:$0xff] %vm384_vm3, %v586_v4  ;;  %v8111_v4 = vld [vmem:[#allocation4 + $0x140] sm:$0xff]  ;;  %11854 = vst [vmem:[#allocation59_spill] sm:$0xff] %v8131_v34 }
 0x154   : > { %v648_v56 = vpop.permute.xlu0 %647  ;;  %v8105_v45 = vld [vmem:[#allocation4 + $0x160] sm:$0xff]  ;;  %11848 = vst [vmem:[#allocation53_spill] sm:$0xff] %v8111_v4  ;;  %v8114_v27 = vrot.slane %v1081_v51, %v7784_v61 }
 0x155   : > { %v644_v42 = vpop.permute.xlu1 %643  ;;  %11847 = vst [vmem:[#allocation52_spill] sm:$0xff] %v8105_v45  ;;  %668 = vst.msk [vmem:[#allocation4 + $0x1e0] sm:$0xff] %vm384_vm3, %v648_v56  ;;  %v1097_v44 = vcombine.low %v8111_v4, %v8105_v45  ;;  %v8118_v43 = vld [vmem:[#allocation4 + $0x150] sm:$0xff]  ;;  %v8127_v56 = vrot.slane %v1065_v19, %v7784_v61 }
 0x156   : > { %666 = vst.msk [vmem:[#allocation4 + $0x1d0] sm:$0xff] %vm384_vm3, %v644_v42  ;;  %11849 = vst [vmem:[#allocation54_spill] sm:$0xff] %v8114_v27  ;;  %v8122_v42 = vld [vmem:[#allocation4 + $0x1b0] sm:$0xff] }
 0x157   : > { %11850 = vst [vmem:[#allocation55_spill] sm:$0xff] %v8118_v43  ;;  %11852 = vst [vmem:[#allocation57_spill] sm:$0xff] %v8122_v42  ;;  %v8136_v4 = vrot.slane %v1097_v44, %v7784_v61 }
 0x158   : > { %v691_v22 = vpop.permute.xlu0 %690  ;;  %11853 = vst [vmem:[#allocation58_spill] sm:$0xff] %v8127_v56 }
 0x159   : > { %v652_v30 = vpop.permute.xlu1 %651  ;;  %714 = vst.msk [vmem:[#allocation4 + $0x208] sm:$0xff] %vm384_vm3, %v691_v22  ;;  %11855 = vst [vmem:[#allocation60_spill] sm:$0xff] %v8136_v4  ;;  %v1217_v22 = vcombine.low %v8131_v34, %v8122_v42 }
 0x15a   : > { %v8120_v23 = vld [vmem:[#allocation4 + $0x170] sm:$0xff]  ;;  %670 = vst.msk [vmem:[#allocation4 + $0x1f0] sm:$0xff] %vm384_vm3, %v652_v30  ;;  %v1129_v30 = vcombine.low %v8127_v56, %v8114_v27 }
 0x15b   : > { %11851 = vst [vmem:[#allocation56_spill] sm:$0xff] %v8120_v23  ;;  %v1113_v51 = vcombine.low %v8118_v43, %v8120_v23  ;;  %v8155_v23 = vld [vmem:[#allocation4 + $0x1c0] sm:$0xff]  ;;  %v8164_v34 = vrot.slane %v1217_v22, %v7784_v61 }
 0x15c   : > { %v699_v5 = vpop.permute.xlu0 %698  ;;  %v8147_v43 = vld [vmem:[#allocation4 + $0x1e0] sm:$0xff]  ;;  %11859 = vst [vmem:[#allocation64_spill] sm:$0xff] %v8155_v23  ;;  %v8158_v56 = vrot.slane %v1129_v30, %v7809_v11 }
 0x15d   : > { %v8139_v45 = vrot.slane %v1113_v51, %v7784_v61  ;;  %v695_v19 = vpop.permute.xlu1 %694  ;;  %11858 = vst [vmem:[#allocation63_spill] sm:$0xff] %v8147_v43  ;;  %718 = vst.msk [vmem:[#allocation4 + $0x228] sm:$0xff] %vm384_vm3, %v699_v5  ;;  %v1201_v51 = vcombine.low %v8145_v58, %v8133_v53  ;;  %v1233_v5 = vcombine.low %v8155_v23, %v8147_v43 }
 0x15e   : > { %716 = vst.msk [vmem:[#allocation4 + $0x218] sm:$0xff] %vm384_vm3, %v695_v19  ;;  %11860 = vst [vmem:[#allocation65_spill] sm:$0xff] %v8158_v56 }
 0x15f   : > { %11856 = vst [vmem:[#allocation61_spill] sm:$0xff] %v8139_v45  ;;  %v1161_v44 = vcombine.low %v8136_v4, %v8139_v45  ;;  %v1590_v4 = vcombine.high %v7811_v12, %v7799_v8  ;;  %v8170_v45 = vld [vmem:[#allocation4 + $0x1d0] sm:$0xff]  ;;  %v8179_v22 = vrot.slane %v1201_v51, %v7784_v61  ;;  %v1422_v8 = vcombine.high %v7771_v54, %v7765_v49 }
 0x160   : > { %v689_v42 = vpop.permute.xlu0 %688  ;;  %11862 = vst [vmem:[#allocation67_spill] sm:$0xff] %v8170_v45  ;;  %v1574_v12 = vcombine.high %v7827_v21, %v7813_v13 }
 0x161   : > { %v8161_v27 = vrot.slane %v1161_v44, %v7809_v11  ;;  %v703_v19 = vpop.permute.xlu1 %702  ;;  %v8172_v58 = vld [vmem:[#allocation4 + $0x1f0] sm:$0xff]  ;;  %713 = vst.msk [vmem:[#allocation4 + $0x200] sm:$0xff] %vm384_vm3, %v689_v42  ;;  %v8190_v42 = vrot.slane %v1233_v5, %v7784_v61  ;;  %v1265_v51 = vcombine.low %v8179_v22, %v8164_v34  ;;  %v8198_v49 = vrot.slane %v1590_v4, %v7784_v61 }
 0x162   : > { %11863 = vst [vmem:[#allocation68_spill] sm:$0xff] %v8172_v58  ;;  %720 = vst.msk [vmem:[#allocation4 + $0x238] sm:$0xff] %vm384_vm3, %v703_v19  ;;  %v1249_v44 = vcombine.low %v8170_v45, %v8172_v58  ;;  %v1406_v19 = vcombine.high %v7777_v59, %v7773_v55  ;;  %v786_v55 = vld [vmem:[#allocation4 + $0x208] sm:$0xff]  ;;  %v8205_v59 = vrot.slane %v1422_v8, %v7784_v61 }
 0x163   : > { %11861 = vst [vmem:[#allocation66_spill] sm:$0xff] %v8161_v27  ;;  %11864 = vst [vmem:[#allocation69_spill] sm:$0xff] %v8190_v42  ;;  %v8208_v13 = vrot.slane %v1574_v12, %v7784_v61  ;;  %v8214_v4 = vrot.slane %v1265_v51, %v7809_v11  ;;  %v1470_v8 = vcombine.high %v7804_v9, %v7791_v2 }
 0x164   : > { %v8193_v30 = vrot.slane %v1249_v44, %v7784_v61  ;;  %v697_v43 = vpop.permute.xlu0 %696  ;;  %v790_v45 = vld [vmem:[#allocation4 + $0x228] sm:$0xff]  ;;  %v8211_v5 = vrot.slane %v1406_v19, %v7784_v61  ;;  %v1638_v12 = vcombine.high %v7859_v35, %v7846_v28  ;;  %v810_v19 = vcombine.high %v7871_v40, %v7861_v36 }
 0x165   : > { %v693_v23 = vpop.permute.xlu1 %692  ;;  %717 = vst.msk [vmem:[#allocation4 + $0x220] sm:$0xff] %vm384_vm3, %v697_v43  ;;  %v1949_v21 = vcombine.low %v786_v55, %v790_v45  ;;  %11865 = vst [vmem:[#allocation70_spill] sm:$0xff] %v8214_v4  ;;  %v788_v44 = vld [vmem:[#allocation4 + $0x218] sm:$0xff]  ;;  %v1653_v56 = vcombine.low %v8208_v13, %v8198_v49  ;;  %v858_v9 = vcombine.high %v7915_v17, %v7900_v63 }
 0x166   : > { %715 = vst.msk [vmem:[#allocation4 + $0x210] sm:$0xff] %vm384_vm3, %v693_v23  ;;  %v1297_v54 = vcombine.low %v8190_v42, %v8193_v30  ;;  %v1485_v2 = vcombine.low %v8211_v5, %v8205_v59  ;;  %v794_v28 = vcombine.high %v7881_v46, %v7873_v41  ;;  %v8249_v63 = vrot.slane %v1638_v12, %v7809_v11 }
 0x167   : > { %v8237_v35 = vrot.slane %v1949_v21, %v7784_v61  ;;  %v8252_v41 = vrot.slane %v810_v19, %v7784_v61  ;;  %v962_v46 = vcombine.high %v7923_v29, %v7912_v16  ;;  %v1878_v29 = vcombine.high %v8069_v57, %v8056_v47 }
 0x168   : > { %v8217_v23 = vrot.slane %v1297_v54, %v7809_v11  ;;  %v1950_v54 = vcombine.high %v786_v55, %v790_v45  ;;  %v8246_v55 = vrot.slane %v1470_v8, %v7809_v11  ;;  %v785_v21 = vld [vmem:[#allocation4 + $0x200] sm:$0xff]  ;;  %v8271_v16 = vrot.slane %v794_v28, %v7784_v61 }
 0x169   : > { %v701_v43 = vpop.permute.xlu1 %700  ;;  %v792_v58 = vld [vmem:[#allocation4 + $0x238] sm:$0xff]  ;;  %v1654_v47 = vcombine.high %v8208_v13, %v8198_v49 }
 0x16a   : > { %11866 = vst [vmem:[#allocation71_spill] sm:$0xff] %v8217_v23  ;;  %719 = vst.msk [vmem:[#allocation4 + $0x230] sm:$0xff] %vm384_vm3, %v701_v43  ;;  %v1965_v51 = vcombine.low %v788_v44, %v792_v58  ;;  %v1966_v27 = vcombine.high %v788_v44, %v792_v58  ;;  %v1026_v58 = vcombine.high %v7961_v33, %v7944_v48 }
 0x16b   : > { %v8260_v33 = vrot.slane %v1653_v56, %v7809_v11  ;;  %v978_v48 = vcombine.high %v7910_v10, %v7897_v62  ;;  %v8265_v43 = vrot.slane %v1485_v2, %v7809_v11  ;;  %v8268_v44 = vrot.slane %v858_v9, %v7809_v11 }
 0x16c   : > { %v8240_v36 = vrot.slane %v1965_v51, %v7784_v61  ;;  %v1980_v40 = vrot.slane %v1966_v27, %v7784_v61  ;;  %v789_v45 = vld [vmem:[#allocation4 + $0x220] sm:$0xff]  ;;  %v1964_v27 = vrot.slane %v1950_v54, %v7784_v61  ;;  %v8279_v62 = vrot.slane %v1026_v58, %v7809_v11 }
 0x16d   : > { %v1337_v12 = vcombine.low %v785_v21, %v789_v45  ;;  %v787_v10 = vld [vmem:[#allocation4 + $0x210] sm:$0xff]  ;;  %v873_v51 = vcombine.low %v8271_v16, %v8252_v41  ;;  %v8284_v54 = vrot.slane %v962_v46, %v7784_v61  ;;  %v1486_v2 = vcombine.high %v8211_v5, %v8205_v59 }
 0x16e   : > { %v1982_v17 = vcombine.high %v8237_v35, %v8240_v36  ;;  %v1997_v56 = vcombine.low %v1964_v27, %v1980_v40  ;;  %v1338_v9 = vcombine.high %v785_v21, %v789_v45  ;;  %v8293_v58 = vrot.slane %v978_v48, %v7784_v61 }
 0x16f   : > { %v1606_v46 = vcombine.high %v7864_v37, %v7867_v38  ;;  %v1558_v59 = vcombine.high %v7848_v31, %v7850_v32  ;;  %v8300_v5 = vrot.slane %v1878_v29, %v7809_v11  ;;  %v8306_v13 = vrot.slane %v1337_v12, %v7784_v61 }
 0x170   : > { %v8276_v8 = vrot.slane %v1982_v17, %v7809_v11  ;;  %v1998_v17 = vcombine.high %v1964_v27, %v1980_v40  ;;  %v8303_v49 = vrot.slane %v1997_v56, %v7809_v11  ;;  %v1454_v37 = vcombine.high %v7795_v6, %v7797_v7 }
 0x171   : > { %v791_v19 = vld [vmem:[#allocation4 + $0x230] sm:$0xff]  ;;  %v1542_v31 = vcombine.high %v7835_v24, %v7825_v20  ;;  %v1266_v32 = vcombine.high %v8179_v22, %v8164_v34  ;;  %v8319_v38 = vrot.slane %v1486_v2, %v7809_v11  ;;  %v1352_v48 = vrot.slane %v1338_v9, %v7784_v61 }
 0x172   : > { %2190 = vrot.lane.b32.xlu0 %v8276_v8, %s7495_s11  ;;  %v1353_v57 = vcombine.low %v787_v10, %v791_v19  ;;  %v1354_v28 = vcombine.high %v787_v10, %v791_v19  ;;  %v1502_v6 = vcombine.high %v7816_v14, %v7819_v15  ;;  %v8329_v7 = vrot.slane %v1654_v47, %v7809_v11 }
 0x173   : > { %v1620_v20 = vrot.slane %v1606_v46, %v7809_v11  ;;  %v1438_v24 = vcombine.high %v7788_v1, %v7779_v60  ;;  %v8335_v34 = vrot.slane %v1558_v59, %v7784_v61  ;;  %v8338_v22 = vrot.slane %v873_v51, %v7809_v11  ;;  %v11867_v59 = vld [vmem:[#allocation12_spill] sm:$0xff] }
 0x174   : > { %v8309_v45 = vrot.slane %v1353_v57, %v7784_v61  ;;  %v1368_v40 = vrot.slane %v1354_v28, %v7784_v61  ;;  %v8341_v21 = vrot.slane %v1998_v17, %v7809_v11  ;;  %v1670_v14 = vcombine.high %v7888_v50, %v7891_v52 }
 0x175   : > { %v8349_v56 = vrot.slane %v1454_v37, %v7784_v61  ;;  %v8352_v60 = vrot.slane %v1542_v31, %v7784_v61  ;;  %v1041_v1 = vcombine.low %v8284_v54, %v8293_v58  ;;  %v874_v12 = vcombine.high %v8271_v16, %v8252_v41  ;;  %v11868_v37 = vld [vmem:[#allocation13_spill] sm:$0xff] }
 0x176   : > { %2230 = vrot.lane.b32.xlu0 %v8303_v49, %s7496_s12  ;;  %v1370_v27 = vcombine.high %v8306_v13, %v8309_v45  ;;  %v1385_v15 = vcombine.low %v1352_v48, %v1368_v40  ;;  %v1534_v10 = vcombine.high %v7838_v25, %v7841_v26  ;;  %v1516_v19 = vrot.slane %v1502_v6, %v7809_v11  ;;  %v11888_v26 = vld [vmem:[#allocation45_spill] sm:$0xff]  ;;  %v11889_v25 = vld [vmem:[#allocation44_spill] sm:$0xff] }
 0x177   : > { %v8366_v51 = vrot.slane %v1266_v32, %v7809_v11  ;;  %v1671_v2 = vcombine.low %v1620_v20, %v8249_v63  ;;  %v8370_v47 = vrot.slane %v1438_v24, %v7784_v61  ;;  %v1621_v41 = vcombine.low %v8352_v60, %v8335_v34  ;;  %v11869_v32 = vld [vmem:[#allocation14_spill] sm:$0xff]  ;;  %v11874_v24 = vld [vmem:[#allocation33_spill] sm:$0xff] }
 0x178   : > { %v8344_v29 = vrot.slane %v1370_v27, %v7809_v11  ;;  %v946_v16 = vcombine.high %v7946_v3, %v7948_v18  ;;  %v7044_v57 = vpack.i.bf16 %v1670_v14, %v1534_v10  ;;  %v8377_v9 = vrot.slane %v1385_v15, %v7809_v11  ;;  %v11870_v27 = vld [vmem:[#allocation17_spill] sm:$0xff]  ;;  %v11871_v18 = vld [vmem:[#allocation16_spill] sm:$0xff] }
 0x179   : > { %v1386_v28 = vcombine.high %v1352_v48, %v1368_v40  ;;  %v994_v17 = vcombine.high %v7966_v0, %v7969_v39  ;;  %v1517_v46 = vcombine.low %v8370_v47, %v8349_v56  ;;  %v842_v31 = vcombine.high %v11868_v37, %v11867_v59  ;;  %v11872_v39 = vld [vmem:[#allocation15_spill] sm:$0xff] }
 0x17a   : > { %2270 = vrot.lane.b32.xlu0 %v8341_v21, %s7497_s13  ;;  %2050 = vrot.lane.b32.xlu1 %v8344_v29, %s7495_s11  ;;  %v930_v6 = vcombine.high %v11870_v27, %v11869_v32  ;;  %v1042_v3 = vcombine.high %v8284_v54, %v8293_v58  ;;  %v1535_v0 = vcombine.low %v8246_v55, %v1516_v19  ;;  %v11873_v48 = vld [vmem:[#allocation31_spill] sm:$0xff]  ;;  %v11875_v54 = vld [vmem:[#allocation9_spill] sm:$0xff] }
 0x17b   : > { %v890_v40 = vcombine.high %v11872_v39, %v11871_v18  ;;  %v1830_v14 = vcombine.high %v11874_v24, %v11873_v48  ;;  %v1672_v15 = vcombine.high %v1620_v20, %v8249_v63  ;;  %v8399_v10 = vrot.slane %v1621_v41, %v7809_v11  ;;  %v11876_v58 = vld [vmem:[#allocation11_spill] sm:$0xff]  ;;  %v11877_v27 = vld [vmem:[#allocation21_spill] sm:$0xff]  ;;  %v11878_v18 = vld [vmem:[#allocation20_spill] sm:$0xff] }
 0x17c   : > { %v826_v59 = vcombine.high %v11876_v58, %v11875_v54  ;;  %v7054_v37 = vpack.i.bf16 %v1671_v2, %v1535_v0  ;;  %v8407_v32 = vrot.slane %v1386_v28, %v7809_v11  ;;  %v1058_v39 = vcombine.high %v11878_v18, %v11877_v27  ;;  %v11880_v24 = vld [vmem:[#allocation37_spill] sm:$0xff]  ;;  %v11882_v0 = vld [vmem:[#allocation18_spill] sm:$0xff] }
 0x17d   : > { %v1008_v48 = vrot.slane %v994_v17, %v7809_v11  ;;  %v8413_v63 = vrot.slane %v1517_v46, %v7809_v11  ;;  %v8416_v20 = vrot.slane %v842_v31, %v7784_v61  ;;  %v8419_v41 = vrot.slane %v930_v6, %v7784_v61  ;;  %v11881_v17 = vld [vmem:[#allocation19_spill] sm:$0xff]  ;;  %v11887_v27 = vld [vmem:[#allocation46_spill] sm:$0xff] }
 0x17e   : > { %7045 = vrot.lane.b32.xlu0 %v7044_v57, %s7498_s14  ;;  %2090 = vrot.lane.b32.xlu1 %v8377_v9, %s7496_s12  ;;  %v8404_v57 = vrot.slane %v946_v16, %v7784_v61  ;;  %v11879_v16 = vld [vmem:[#allocation34_spill] sm:$0xff]  ;;  %v1536_v28 = vcombine.high %v8246_v55, %v1516_v19  ;;  %v922_v46 = vcombine.high %v11882_v0, %v11881_v17  ;;  %v11886_v0 = vld [vmem:[#allocation47_spill] sm:$0xff] }
 0x17f   : > { %v1814_v2 = vcombine.high %v11880_v24, %v11879_v16  ;;  %v904_v54 = vrot.slane %v890_v40, %v7809_v11  ;;  %v8431_v31 = vrot.slane %v826_v59, %v7784_v61  ;;  %v8436_v58 = vrot.slane %v1041_v1, %v7809_v11  ;;  %v11883_v1 = vld [vmem:[#allocation62_spill] sm:$0xff] }
 0x180   : > { %v1009_v6 = vcombine.low %v8419_v41, %v8404_v57  ;;  %v7064_v16 = vpack.i.bf16 %v1672_v15, %v1536_v28  ;;  %v7049_v24 = vpack.i.bf16 %v1058_v39, %v922_v46  ;;  %v1673_v55 = vcombine.low %v8399_v10, %v8260_v33  ;;  %v11884_v28 = vld [vmem:[#allocation57_spill] sm:$0xff]  ;;  %v11885_v46 = vld [vmem:[#allocation59_spill] sm:$0xff] }
 0x181   : > { %v1059_v19 = vcombine.low %v1008_v48, %v8279_v62  ;;  %v905_v40 = vcombine.low %v8431_v31, %v8416_v20  ;;  %v8447_v59 = vrot.slane %v874_v12, %v7809_v11  ;;  %v8450_v42 = vrot.slane %v1814_v2, %v7784_v61 }
 0x182   : > { %7055 = vrot.lane.b32.xlu0 %v7054_v37, %s7495_s11  ;;  %2130 = vrot.lane.b32.xlu1 %v8407_v32, %s7497_s13  ;;  %v8439_v37 = vrot.slane %v1830_v14, %v7784_v61  ;;  %v1202_v14 = vcombine.high %v11883_v1, %v8133_v53  ;;  %v1537_v15 = vcombine.low %v8265_v43, %v8413_v63 }
 0x183   : > { %v923_v39 = vcombine.low %v8268_v44, %v904_v54  ;;  %v1218_v12 = vcombine.high %v11885_v46, %v11884_v28  ;;  %v1060_v17 = vcombine.high %v1008_v48, %v8279_v62  ;;  %v8463_v2 = vrot.slane %v1009_v6, %v7809_v11  ;;  %v11890_v6 = vld [vmem:[#allocation41_spill] sm:$0xff] }
 0x184   : > { %v8466_v53 = vrot.slane %v1042_v3, %v7809_v11  ;;  %v1942_v18 = vcombine.high %v11887_v27, %v11886_v0  ;;  %v1910_v52 = vcombine.high %v11889_v25, %v11888_v26  ;;  %v924_v28 = vcombine.high %v8268_v44, %v904_v54  ;;  %v11893_v25 = vld [vmem:[#allocation35_spill] sm:$0xff] }
 0x185   : > { %v7059_v1 = vpack.i.bf16 %v1059_v19, %v923_v39  ;;  %v8476_v62 = vrot.slane %v905_v40, %v7809_v11  ;;  %v1622_v3 = vcombine.high %v8352_v60, %v8335_v34  ;;  %v8481_v48 = vrot.slane %v1202_v14, %v7784_v61  ;;  %v11894_v60 = vld [vmem:[#allocation28_spill] sm:$0xff] }
 0x186   : > { %7065 = vrot.lane.b32.xlu0 %v7064_v16, %s7499_s15  ;;  %7050 = vrot.lane.b32.xlu1 %v7049_v24, %s7498_s14  ;;  %v1893_v16 = vcombine.low %v8450_v42, %v8439_v37  ;;  %v7074_v24 = vpack.i.bf16 %v1673_v55, %v1537_v15  ;;  %v11891_v55 = vld [vmem:[#allocation40_spill] sm:$0xff]  ;;  %v8490_v44 = vrot.slane %v1218_v12, %v7784_v61  ;;  %v11896_v12 = vld [vmem:[#allocation69_spill] sm:$0xff] }
 0x187   : > { %v1806_v19 = vcombine.high %v11891_v55, %v11890_v6  ;;  %v11892_v15 = vld [vmem:[#allocation36_spill] sm:$0xff]  ;;  %v7069_v54 = vpack.i.bf16 %v1060_v17, %v924_v28  ;;  %v1061_v34 = vcombine.low %v8463_v2, %v8436_v58  ;;  %v925_v17 = vcombine.low %v8338_v22, %v8476_v62  ;;  %v11911_v6 = vld [vmem:[#allocation26_spill] sm:$0xff]  ;;  %v11912_v55 = vld [vmem:[#allocation27_spill] sm:$0xff] }
 0x188   : > { %v1774_v26 = vcombine.high %v11893_v25, %v11892_v15  ;;  %v11895_v40 = vld [vmem:[#allocation32_spill] sm:$0xff]  ;;  %v8497_v39 = vrot.slane %v1893_v16, %v7809_v11  ;;  %v1298_v15 = vcombine.high %v11896_v12, %v8193_v30  ;;  %v1674_v28 = vcombine.high %v8399_v10, %v8260_v33  ;;  %v11902_v10 = vld [vmem:[#allocation42_spill] sm:$0xff] }
 0x189   : > { %v1742_v14 = vcombine.high %v11895_v40, %v11894_v60  ;;  %v7084_v46 = vpack.i.bf16 %v1942_v18, %v1806_v19  ;;  %v1518_v16 = vcombine.high %v8370_v47, %v8349_v56  ;;  %v8513_v18 = vrot.slane %v1622_v3, %v7809_v11  ;;  %v11898_v19 = vld [vmem:[#allocation65_spill] sm:$0xff]  ;;  %v11900_v40 = vld [vmem:[#allocation60_spill] sm:$0xff]  ;;  %v11901_v47 = vld [vmem:[#allocation43_spill] sm:$0xff] }
 0x18a   : > { %7075 = vrot.lane.b32.xlu0 %v7074_v24, %s7496_s12  ;;  %7060 = vrot.lane.b32.xlu1 %v7059_v1, %s7495_s11  ;;  %v1330_v24 = vcombine.high %v8214_v4, %v8217_v23  ;;  %v8502_v1 = vrot.slane %v1910_v52, %v7809_v11  ;;  %v11897_v52 = vld [vmem:[#allocation66_spill] sm:$0xff]  ;;  %v1788_v30 = vrot.slane %v1774_v26, %v7809_v11  ;;  %v11899_v60 = vld [vmem:[#allocation61_spill] sm:$0xff] }
 0x18b   : > { %v1194_v25 = vcombine.high %v11898_v19, %v11897_v52  ;;  %v1162_v12 = vcombine.high %v11900_v40, %v11899_v60  ;;  %v7079_v23 = vpack.i.bf16 %v1061_v34, %v925_v17  ;;  %v1756_v33 = vrot.slane %v1742_v14, %v7809_v11  ;;  %v11903_v4 = vld [vmem:[#allocation54_spill] sm:$0xff] }
 0x18c   : > { %v1538_v56 = vcombine.high %v8265_v43, %v8413_v63  ;;  %v1862_v3 = vcombine.high %v11902_v10, %v11901_v47  ;;  %v11904_v52 = vld [vmem:[#allocation58_spill] sm:$0xff]  ;;  %v8532_v26 = vrot.slane %v1298_v15, %v7809_v11  ;;  %v8535_v34 = vrot.slane %v1518_v16, %v7809_v11  ;;  %v11906_v63 = vld [vmem:[#allocation29_spill] sm:$0xff]  ;;  %v11910_v47 = vld [vmem:[#allocation23_spill] sm:$0xff] }
 0x18d   : > { %v1130_v19 = vcombine.high %v11904_v52, %v11903_v4  ;;  %v1675_v14 = vcombine.low %v8513_v18, %v8329_v7  ;;  %v11905_v43 = vld [vmem:[#allocation30_spill] sm:$0xff]  ;;  %v1807_v4 = vcombine.low %v1756_v33, %v1788_v30  ;;  %v1176_v15 = vrot.slane %v1162_v12, %v7809_v11  ;;  %v11914_v12 = vld [vmem:[#allocation25_spill] sm:$0xff] }
 0x18e   : > { %7085 = vrot.lane.b32.xlu0 %v7084_v46, %s7498_s14  ;;  %7070 = vrot.lane.b32.xlu1 %v7069_v54, %s7499_s15  ;;  %v7094_v46 = vpack.i.bf16 %v1330_v24, %v1194_v25  ;;  %v1943_v54 = vcombine.low %v8300_v5, %v8502_v1  ;;  %v1726_v17 = vcombine.high %v11906_v63, %v11905_v43  ;;  %v11907_v60 = vld [vmem:[#allocation38_spill] sm:$0xff]  ;;  %v11908_v24 = vld [vmem:[#allocation39_spill] sm:$0xff] }
 0x18f   : > { %v1846_v25 = vcombine.high %v11908_v24, %v11907_v60  ;;  %v7089_v52 = vpack.i.bf16 %v1674_v28, %v1538_v56  ;;  %v1010_v16 = vcombine.high %v8419_v41, %v8404_v57  ;;  %v11909_v40 = vld [vmem:[#allocation22_spill] sm:$0xff]  ;;  %v1710_v43 = vcombine.high %v11912_v55, %v11911_v6  ;;  %v11913_v41 = vld [vmem:[#allocation24_spill] sm:$0xff] }
 0x190   : > { %v1694_v10 = vcombine.high %v11910_v47, %v11909_v40  ;;  %v8553_v63 = vrot.slane %v1862_v3, %v7784_v61  ;;  %v7104_v60 = vpack.i.bf16 %v1943_v54, %v1807_v4  ;;  %v1062_v28 = vcombine.high %v8463_v2, %v8436_v58  ;;  %v11915_v4 = vld [vmem:[#allocation68_spill] sm:$0xff] }
 0x191   : > { %v906_v57 = vcombine.high %v8431_v31, %v8416_v20  ;;  %v1678_v56 = vcombine.high %v11914_v12, %v11913_v41  ;;  %v8565_v6 = vrot.slane %v1726_v17, %v7784_v61  ;;  %v1860_v55 = vrot.slane %v1846_v25, %v7784_v61  ;;  %v11921_v12 = vld [vmem:[#allocation48_spill] sm:$0xff] }
 0x192   : > { %7095 = vrot.lane.b32.xlu0 %v7094_v46, %s7498_s14  ;;  %7080 = vrot.lane.b32.xlu1 %v7079_v23, %s7496_s12  ;;  %v1144_v46 = vrot.slane %v1130_v19, %v7809_v11  ;;  %v1331_v23 = vcombine.low %v8366_v51, %v8532_v26  ;;  %v926_v58 = vcombine.high %v8338_v22, %v8476_v62  ;;  %v11916_v22 = vld [vmem:[#allocation67_spill] sm:$0xff] }
 0x193   : > { %v1539_v20 = vcombine.low %v8319_v38, %v8535_v34  ;;  %v8575_v31 = vrot.slane %v1010_v16, %v7809_v11  ;;  %v8578_v2 = vrot.slane %v1694_v10, %v7784_v61  ;;  %v1724_v3 = vrot.slane %v1710_v43, %v7784_v61  ;;  %v11917_v43 = vld [vmem:[#allocation56_spill] sm:$0xff] }
 0x194   : > { %v1195_v19 = vcombine.low %v1144_v46, %v1176_v15  ;;  %v1925_v54 = vcombine.low %v1860_v55, %v8553_v63  ;;  %v7099_v24 = vpack.i.bf16 %v1062_v28, %v926_v58  ;;  %v1944_v25 = vcombine.high %v8300_v5, %v8502_v1  ;;  %v11919_v28 = vld [vmem:[#allocation63_spill] sm:$0xff]  ;;  %v11920_v5 = vld [vmem:[#allocation64_spill] sm:$0xff] }
 0x195   : > { %v1250_v62 = vcombine.high %v11916_v22, %v11915_v4  ;;  %v920_v40 = vrot.slane %v906_v57, %v7809_v11  ;;  %v1692_v16 = vrot.slane %v1678_v56, %v7784_v61  ;;  %v1789_v47 = vcombine.low %v1724_v3, %v8565_v6  ;;  %v11922_v56 = vld [vmem:[#allocation49_spill] sm:$0xff] }
 0x196   : > { %7105 = vrot.lane.b32.xlu0 %v7104_v60, %s7495_s11  ;;  %7090 = vrot.lane.b32.xlu1 %v7089_v52, %s7500_s16  ;;  %v7114_v17 = vpack.i.bf16 %v1331_v23, %v1195_v19  ;;  %v7109_v52 = vpack.i.bf16 %v1675_v14, %v1539_v20  ;;  %v1808_v10 = vcombine.high %v1756_v33, %v1788_v30  ;;  %v11918_v60 = vld [vmem:[#allocation55_spill] sm:$0xff]  ;;  %v11923_v33 = vld [vmem:[#allocation52_spill] sm:$0xff]  ;;  %v11924_v20 = vld [vmem:[#allocation53_spill] sm:$0xff] }
 0x197   : > { %v1114_v23 = vcombine.high %v11918_v60, %v11917_v43  ;;  %v1234_v1 = vcombine.high %v11920_v5, %v11919_v28  ;;  %v1063_v14 = vcombine.low %v8575_v31, %v8466_v53  ;;  %v1757_v57 = vcombine.low %v1692_v16, %v8578_v2  ;;  %v11926_v60 = vld [vmem:[#allocation51_spill] sm:$0xff] }
 0x198   : > { %v1933_v41 = vrot.slane %v1925_v54, %v7809_v11  ;;  %v1082_v19 = vcombine.high %v11922_v56, %v11921_v12  ;;  %v7124_v58 = vpack.i.bf16 %v1944_v25, %v1808_v10  ;;  %v1332_v30 = vcombine.high %v8366_v51, %v8532_v26  ;;  %v11925_v54 = vld [vmem:[#allocation50_spill] sm:$0xff] }
 0x199   : > { %v927_v4 = vcombine.low %v8447_v59, %v920_v40  ;;  %v1797_v22 = vrot.slane %v1789_v47, %v7809_v11  ;;  %v1676_v43 = vcombine.high %v8513_v18, %v8329_v7  ;;  %v1066_v28 = vcombine.high %v11926_v60, %v11925_v54 }
 0x19a   : > { %7115 = vrot.lane.b32.xlu0 %v7114_v17, %s7495_s11  ;;  %7100 = vrot.lane.b32.xlu1 %v7099_v24, %s7500_s16  ;;  %v1098_v17 = vcombine.high %v11924_v20, %v11923_v33  ;;  %v1264_v24 = vrot.slane %v1250_v62, %v7784_v61  ;;  %v1196_v51 = vcombine.high %v1144_v46, %v1176_v15 }
 0x19b   : > { %v1128_v26 = vrot.slane %v1114_v23, %v7784_v61  ;;  %v1248_v25 = vrot.slane %v1234_v1, %v7784_v61  ;;  %v7119_v62 = vpack.i.bf16 %v1063_v14, %v927_v4  ;;  %v1765_v10 = vrot.slane %v1757_v57, %v7809_v11 }
 0x19c   : > { %v1945_v47 = vcombine.low %v8497_v39, %v1933_v41  ;;  %v1926_v5 = vcombine.high %v1860_v55, %v8553_v63  ;;  %v7134_v7 = vpack.i.bf16 %v1332_v30, %v1196_v51  ;;  %v1096_v18 = vrot.slane %v1082_v19, %v7784_v61 }
 0x19d   : > { %v1112_v12 = vrot.slane %v1098_v17, %v7784_v61  ;;  %v1313_v56 = vcombine.low %v1248_v25, %v1264_v24  ;;  %v1540_v15 = vcombine.high %v8319_v38, %v8535_v34  ;;  %v1790_v46 = vcombine.high %v1724_v3, %v8565_v6 }
 0x19e   : > { %7125 = vrot.lane.b32.xlu0 %v7124_v58, %s7499_s15  ;;  %7110 = vrot.lane.b32.xlu1 %v7109_v52, %s7497_s13  ;;  %v1894_v52 = vcombine.high %v8450_v42, %v8439_v37  ;;  %v1281_v23 = vcombine.low %v8481_v48, %v8490_v44  ;;  %v1809_v63 = vcombine.low %v1765_v10, %v1797_v22 }
 0x19f   : > { %v1080_v55 = vrot.slane %v1066_v28, %v7784_v61  ;;  %v1177_v1 = vcombine.low %v1112_v12, %v1128_v26  ;;  %v7129_v14 = vpack.i.bf16 %v1676_v43, %v1540_v15  ;;  %v1064_v38 = vcombine.high %v8575_v31, %v8466_v53 }
 0x1a0   : > { %v1758_v34 = vcombine.high %v1692_v16, %v8578_v2  ;;  %v1940_v6 = vrot.slane %v1926_v5, %v7809_v11  ;;  %v7144_v42 = vpack.i.bf16 %v1945_v47, %v1809_v63  ;;  %v1946_v37 = vcombine.high %v8497_v39, %v1933_v41 }
 0x1a1   : > { %v1145_v3 = vcombine.low %v1080_v55, %v1096_v18  ;;  %v1321_v57 = vrot.slane %v1313_v56, %v7809_v11  ;;  %v928_v19 = vcombine.high %v8447_v59, %v920_v40  ;;  %v1804_v58 = vrot.slane %v1790_v46, %v7809_v11 }
 0x1a2   : > { %7135 = vrot.lane.b32.xlu0 %v7134_v7, %s7499_s15  ;;  %7120 = vrot.lane.b32.xlu1 %v7119_v62, %s7497_s13  ;;  %v1908_v30 = vrot.slane %v1894_v52, %v7809_v11  ;;  %v1810_v53 = vcombine.high %v1765_v10, %v1797_v22  ;;  %v1185_v31 = vrot.slane %v1177_v1, %v7809_v11  ;;  %v11927_v10 = vmov 0.0  }
 0x1a3   : > { %v1289_v2 = vrot.slane %v1281_v23, %v7809_v11  ;;  %v7139_v39 = vpack.i.bf16 %v1064_v38, %v928_v19  ;;  %v1772_v16 = vrot.slane %v1758_v34, %v7809_v11  ;;  %v1314_v33 = vcombine.high %v1248_v25, %v1264_v24 }
 0x1a4   : > { %v1947_v41 = vcombine.low %v1908_v30, %v1940_v6  ;;  %v7154_v59 = vpack.i.bf16 %v1946_v37, %v1810_v53  ;;  %v1153_v40 = vrot.slane %v1145_v3, %v7809_v11  ;;  %v1981_v17 = vcombine.low %v8237_v35, %v8240_v36 }
 0x1a5   : > { %v1333_v20 = vcombine.low %v1289_v2, %v1321_v57  ;;  %v1811_v4 = vcombine.low %v1772_v16, %v1804_v58  ;;  %v1178_v43 = vcombine.high %v1112_v12, %v1128_v26  ;;  %v1282_v54 = vcombine.high %v8481_v48, %v8490_v44 }
 0x1a6   : > { %7145 = vrot.lane.b32.xlu0 %v7144_v42, %s7496_s12  ;;  %7130 = vrot.lane.b32.xlu1 %v7129_v14, %s7501_s17  ;;  %v1197_v22 = vcombine.low %v1153_v40, %v1185_v31  ;;  %v1146_v28 = vcombine.high %v1080_v55, %v1096_v18  ;;  %v1328_v24 = vrot.slane %v1314_v33, %v7809_v11  ;;  %v7502_v38 = vmov 0  }
 0x1a7   : > { %v7164_v60 = vpack.i.bf16 %v1947_v41, %v1811_v4  ;;  %v8654_v25 = vrot.slane %v1981_v17, %v7809_v11  ;;  %v1334_v62 = vcombine.high %v1289_v2, %v1321_v57  ;;  %v1369_v35 = vcombine.low %v8306_v13, %v8309_v45  ;;  %7184 = vset.pattern.permute.xlu0 %v7502_v38 }
 0x1a8   : > { %v7149_v51 = vpack.i.bf16 %v1333_v20, %v1197_v22  ;;  %v1198_v36 = vcombine.high %v1153_v40, %v1185_v31  ;;  %v1192_v26 = vrot.slane %v1178_v43, %v7809_v11  ;;  %v1296_v48 = vrot.slane %v1282_v54, %v7809_v11 }
 0x1a9   : > { %v1160_v44 = vrot.slane %v1146_v28, %v7809_v11  ;;  %v2013_v47 = vcombine.high %v8654_v25, %v11927_v10  ;;  %v8666_v18 = vrot.slane %v1369_v35, %v7809_v11  ;;  %v1948_v56 = vcombine.high %v1908_v30, %v1940_v6 }
 0x1aa   : > { %7155 = vrot.lane.b32.xlu0 %v7154_v59, %s7500_s16  ;;  %7140 = vrot.lane.b32.xlu1 %v7139_v39, %s7501_s17  ;;  %v7159_v5 = vpack.i.bf16 %v1334_v62, %v1198_v36  ;;  %v1335_v7 = vcombine.low %v1296_v48, %v1328_v24  ;;  %v1812_v15 = vcombine.high %v1772_v16, %v1804_v58  ;;  %v11928_v36 = vld [vmem:[#allocation10_spill] sm:$0xff] }
 0x1ab   : > { %v1199_v13 = vcombine.low %v1160_v44, %v1192_v26  ;;  %v1401_v12 = vcombine.high %v8666_v18, %v11927_v10  ;;  %v2014_v52 = vcombine.high %v8276_v8, %v11927_v10  ;;  %v1336_v23 = vcombine.high %v1296_v48, %v1328_v24 }
 0x1ac   : > { %v7174_v46 = vpack.i.bf16 %v1948_v56, %v1812_v15  ;;  %v1200_v63 = vcombine.high %v1160_v44, %v1192_v26  ;;  %v2015_v1 = vcombine.high %v8303_v49, %v11927_v10  ;;  %v1402_v14 = vcombine.high %v8344_v29, %v11927_v10  ;;  %v2374_v49 = vld [vmem:[%s11576_s5] sm:$0xff]  ;;  %v11930_v44 = vld [vmem:[#allocation7_spill] sm:$0xff] }
 0x1ad   : > { %v7169_v45 = vpack.i.bf16 %v1335_v7, %v1199_v13  ;;  %v2016_v8 = vcombine.high %v8341_v21, %v11927_v10  ;;  %v1403_v34 = vcombine.high %v8377_v9, %v11927_v10  ;;  %v1404_v29 = vcombine.high %v8407_v32, %v11927_v10  ;;  %v11931_v10 = vld [vmem:[#allocation8_spill] sm:$0xff] }
 0x1ae   : > { %7165 = vrot.lane.b32.xlu0 %v7164_v60, %s7497_s13  ;;  %7150 = vrot.lane.b32.xlu1 %v7149_v51, %s7496_s12  ;;  %v7179_v55 = vpack.i.bf16 %v1336_v23, %v1200_v63  ;;  %v11929_v26 = vcombine.low %v7888_v50, %v11928_v36  ;;  %v11933_v23 = vld [vmem:[#allocation20_spill] sm:$0xff]  ;;  %v11934_v50 = vld [vmem:[#allocation21_spill] sm:$0xff] }
 0x1af   : > { %v11935_v63 = vcombine.low %v11933_v23, %v11934_v50 }
 0x1b2   : > { %2170 = vrot.lane.b32.xlu0 %v2013_v47, %s7498_s14  ;;  %7160 = vrot.lane.b32.xlu1 %v7159_v5, %s7500_s16  ;;  %v11932_v47 = vcombine.low %v11930_v44, %v11931_v10 }
 0x1b6   : > { %7170 = vrot.lane.b32.xlu1 %v7169_v45, %s7497_s13  ;;  %2030 = vrot.lane.b32.xlu0 %v1401_v12, %s7498_s14 }
 0x1ba   : > { %7175 = vrot.lane.b32.xlu1 %v7174_v46, %s7501_s17  ;;  %2210 = vrot.lane.b32.xlu0 %v2014_v52, %s7499_s15 }
 0x1be   : > { %7180 = vrot.lane.b32.xlu1 %v7179_v55, %s7501_s17  ;;  %2250 = vrot.lane.b32.xlu0 %v2015_v1, %s7500_s16  ;;  %v11936_v1 = vld [vmem:[#allocation18_spill] sm:$0xff] }
 0x1c2   : > { %2070 = vrot.lane.b32.xlu1 %v1402_v14, %s7499_s15  ;;  %2290 = vrot.lane.b32.xlu0 %v2016_v8, %s7501_s17  ;;  %v11937_v14 = vld [vmem:[#allocation19_spill] sm:$0xff] }
 0x1c3   : > { %v11938_v8 = vcombine.low %v11936_v1, %v11937_v14 }
 0x1c6   : > { %2110 = vrot.lane.b32.xlu1 %v1403_v34, %s7500_s16  ;;  %2377 = vperm.xlu0 %7184, %v2374_v49  }
 0x1ca   : > { %2150 = vrot.lane.b32.xlu1 %v1404_v29, %s7501_s17 }
 0x1e4   : > { %v8697_v21 = vpop.permute.xlu0 %2190 }
 0x1e8   : > { %v8699_v6 = vpop.permute.xlu0 %2230 }
 0x1ec   : > { %v8701_v42 = vpop.permute.xlu1 %2050  ;;  %v8703_v37 = vpop.permute.xlu0 %2270 }
 0x1f0   : > { %v8705_v3 = vpop.permute.xlu1 %2090  ;;  %v7046_v57 = vpop.permute.xlu0 %7045 }
 0x1f1   : > { %v7048_v20 = vunpack.i.h.bf16 %v7046_v57  ;;  %v7047_v17 = vunpack.i.l.bf16 %v7046_v57 }
 0x1f3   : > { %v2339_v48 = vsel %vm384_vm3, %v11929_v26, %v7048_v20  ;;  %v2338_v5 = vsel %vm384_vm3, %v11932_v47, %v7047_v17 }
 0x1f4   : > { %v8707_v9 = vpop.permute.xlu1 %2130  ;;  %v7056_v19 = vpop.permute.xlu0 %7055 }
 0x1f5   : > { %v7058_v4 = vunpack.i.h.bf16 %v7056_v19  ;;  %v7057_v22 = vunpack.i.l.bf16 %v7056_v19 }
 0x1f7   : > { %v2343_v45 = vsel %vm2302_vm4, %v2338_v5, %v7057_v22  ;;  %v2344_v12 = vsel %vm2302_vm4, %v2339_v48, %v7058_v4 }
 0x1f8   : > { %v7051_v58 = vpop.permute.xlu1 %7050  ;;  %v7066_v30 = vpop.permute.xlu0 %7065 }
 0x1f9   : > { %v7053_v60 = vunpack.i.h.bf16 %v7051_v58  ;;  %v7052_v28 = vunpack.i.l.bf16 %v7051_v58  ;;  %v7068_v24 = vunpack.i.h.bf16 %v7066_v30  ;;  %v7067_v51 = vunpack.i.l.bf16 %v7066_v30 }
 0x1fb   : > { %v2298_v55 = vsel %vm384_vm3, %v11935_v63, %v7053_v60  ;;  %v2297_v38 = vsel %vm384_vm3, %v11938_v8, %v7052_v28  ;;  %v2348_v49 = vsel %vm2308_vm5, %v2343_v45, %v7067_v51  ;;  %v2349_v34 = vsel %vm2308_vm5, %v2344_v12, %v7068_v24 }
 0x1fc   : > { %v7061_v53 = vpop.permute.xlu1 %7060  ;;  %v7076_v32 = vpop.permute.xlu0 %7075 }
 0x1fd   : > { %v7063_v62 = vunpack.i.h.bf16 %v7061_v53  ;;  %v7062_v35 = vunpack.i.l.bf16 %v7061_v53  ;;  %v7078_v7 = vunpack.i.h.bf16 %v7076_v32  ;;  %v7077_v13 = vunpack.i.l.bf16 %v7076_v32 }
 0x1ff   : > { %v2303_v29 = vsel %vm2302_vm4, %v2297_v38, %v7062_v35  ;;  %v2304_v57 = vsel %vm2302_vm4, %v2298_v55, %v7063_v62  ;;  %v2353_v32 = vsel %vm2314_vm6, %v2348_v49, %v7077_v13 }
 0x200   : > { %v8709_v31 = vpop.permute.xlu1 %7070  ;;  %v8711_v2 = vpop.permute.xlu0 %7085 }
 0x201   : > { %v7073_v30 = vunpack.i.h.bf16 %v8709_v31  ;;  %v7072_v53 = vunpack.i.l.bf16 %v8709_v31  ;;  %v7088_v8 = vunpack.i.h.bf16 %v8711_v2  ;;  %v7087_v38 = vunpack.i.l.bf16 %v8711_v2 }
 0x203   : > { %v2310_v48 = vsel %vm2308_vm5, %v2304_v57, %v7073_v30 }
 0x204   : > { %v8713_v39 = vpop.permute.xlu1 %7080  ;;  %v8715_v16 = vpop.permute.xlu0 %7095 }
 0x205   : > { %v7083_v20 = vunpack.i.h.bf16 %v8713_v39  ;;  %v7082_v17 = vunpack.i.l.bf16 %v8713_v39  ;;  %v2309_v39 = vsel %vm2308_vm5, %v2303_v29, %v7072_v53  ;;  %v7098_v49 = vunpack.i.h.bf16 %v8715_v16 }
 0x207   : > { %v2315_v47 = vsel %vm2314_vm6, %v2309_v39, %v7082_v17  ;;  %v11941_v17 = vld [vmem:[#allocation41_spill] sm:$0xff] }
 0x208   : > { %v7091_v41 = vpop.permute.xlu1 %7090  ;;  %v8717_v33 = vpop.permute.xlu0 %7105 }
 0x209   : > { %v7093_v56 = vunpack.i.h.bf16 %v7091_v41  ;;  %v7092_v15 = vunpack.i.l.bf16 %v7091_v41  ;;  %v2354_v41 = vsel %vm2314_vm6, %v2349_v34, %v7078_v7  ;;  %v7097_v34 = vunpack.i.l.bf16 %v8715_v16  ;;  %v11940_v16 = vld [vmem:[#allocation40_spill] sm:$0xff] }
 0x20a   : > { %v7107_v29 = vunpack.i.l.bf16 %v8717_v33  ;;  %v7108_v57 = vunpack.i.h.bf16 %v8717_v33 }
 0x20b   : > { %v2358_v60 = vsel %vm2320_vm7, %v2353_v32, %v7092_v15  ;;  %v2359_v28 = vsel %vm2320_vm7, %v2354_v41, %v7093_v56  ;;  %v11939_v32 = vcombine.low %v11887_v27, %v11886_v0  ;;  %v11946_v0 = vld [vmem:[#allocation65_spill] sm:$0xff] }
 0x20c   : > { %v8719_v59 = vpop.permute.xlu1 %7100  ;;  %v8721_v40 = vpop.permute.xlu0 %7115 }
 0x20d   : > { %v7102_v24 = vunpack.i.l.bf16 %v8719_v59  ;;  %v2341_v2 = vsel %vm384_vm3, %v11939_v32, %v7088_v8 }
 0x20f   : > { %v2321_v56 = vsel %vm2320_vm7, %v2315_v47, %v7102_v24 }
 0x210   : > { %v7111_v43 = vpop.permute.xlu1 %7110  ;;  %v8723_v54 = vpop.permute.xlu0 %7125 }
 0x211   : > { %v7113_v19 = vunpack.i.h.bf16 %v7111_v43  ;;  %v7112_v58 = vunpack.i.l.bf16 %v7111_v43  ;;  %v7103_v43 = vunpack.i.h.bf16 %v8719_v59  ;;  %v2316_v59 = vsel %vm2314_vm6, %v2310_v48, %v7083_v20 }
 0x212   : > { %v7128_v41 = vunpack.i.h.bf16 %v8723_v54  ;;  %v7127_v20 = vunpack.i.l.bf16 %v8723_v54 }
 0x213   : > { %v2363_v36 = vsel %vm2326_vm8, %v2358_v60, %v7112_v58  ;;  %v2364_v26 = vsel %vm2326_vm8, %v2359_v28, %v7113_v19  ;;  %v2322_v15 = vsel %vm2320_vm7, %v2316_v59, %v7103_v43  ;;  %v7118_v19 = vunpack.i.h.bf16 %v8721_v40  ;;  %v11943_v60 = vld [vmem:[#allocation70_spill] sm:$0xff]  ;;  %v11944_v28 = vld [vmem:[#allocation71_spill] sm:$0xff] }
 0x214   : > { %v7121_v46 = vpop.permute.xlu1 %7120  ;;  %v8735_v52 = vpop.permute.xlu0 %7135  ;;  %v7117_v58 = vunpack.i.l.bf16 %v8721_v40  ;;  %v11945_v43 = vcombine.low %v11943_v60, %v11944_v28 }
 0x215   : > { %v7123_v62 = vunpack.i.h.bf16 %v7121_v46  ;;  %v7122_v35 = vunpack.i.l.bf16 %v7121_v46  ;;  %v7138_v24 = vunpack.i.h.bf16 %v8735_v52  ;;  %v7137_v27 = vunpack.i.l.bf16 %v8735_v52 }
 0x216   : > { %v2300_v40 = vsel %vm384_vm3, %v11945_v43, %v7098_v49 }
 0x217   : > { %v2327_v46 = vsel %vm2326_vm8, %v2321_v56, %v7122_v35  ;;  %v2328_v23 = vsel %vm2326_vm8, %v2322_v15, %v7123_v62  ;;  %v2306_v48 = vsel %vm2302_vm4, %v2300_v40, %v7118_v19 }
 0x218   : > { %v7131_v4 = vpop.permute.xlu1 %7130  ;;  %v8755_v22 = vpop.permute.xlu0 %7145 }
 0x219   : > { %v7133_v31 = vunpack.i.h.bf16 %v7131_v4  ;;  %v7132_v51 = vunpack.i.l.bf16 %v7131_v4  ;;  %v11942_v4 = vcombine.low %v11940_v16, %v11941_v17  ;;  %v7148_v35 = vunpack.i.h.bf16 %v8755_v22 }
 0x21b   : > { %v2368_v44 = vsel %vm2332_vm9, %v2363_v36, %v7132_v51  ;;  %v2369_v10 = vsel %vm2332_vm9, %v2364_v26, %v7133_v31  ;;  %v2340_v33 = vsel %vm384_vm3, %v11942_v4, %v7087_v38  ;;  %v11947_v31 = vld [vmem:[#allocation66_spill] sm:$0xff]  ;;  %v7147_v36 = vunpack.i.l.bf16 %v8755_v22 }
 0x21c   : > { %v7141_v5 = vpop.permute.xlu1 %7140  ;;  %v7156_v7 = vpop.permute.xlu0 %7155  ;;  %v6998_v13 = vpack.c.bf16 %v2369_v10, %v2368_v44  ;;  %v11948_v51 = vcombine.low %v11946_v0, %v11947_v31  ;;  %v2345_v54 = vsel %vm2302_vm4, %v2340_v33, %v7107_v29  ;;  %v2346_v26 = vsel %vm2302_vm4, %v2341_v2, %v7108_v57 }
 0x21d   : > { %v7143_v45 = vunpack.i.h.bf16 %v7141_v5  ;;  %v7142_v12 = vunpack.i.l.bf16 %v7141_v5  ;;  %v7157_v44 = vunpack.i.l.bf16 %v7156_v7  ;;  %v2350_v47 = vsel %vm2308_vm5, %v2345_v54, %v7127_v20 }
 0x21e   : > { %6999 = vmatprep.subr.bf16.mxu0 %v6998_v13  ;;  %v2299_v62 = vsel %vm384_vm3, %v11948_v51, %v7097_v34  ;;  %v2351_v59 = vsel %vm2308_vm5, %v2346_v26, %v7128_v41  ;;  %v7158_v5 = vunpack.i.h.bf16 %v7156_v7  ;;  %v2312_v22 = vsel %vm2308_vm5, %v2306_v48, %v7138_v24  ;;  %v2373_v48 = vld [vmem:[%s11574_s3] sm:$0xff] }
 0x21f   : > { %v2333_v50 = vsel %vm2332_vm9, %v2327_v46, %v7142_v12  ;;  %v2334_v63 = vsel %vm2332_vm9, %v2328_v23, %v7143_v45  ;;  %v2305_v39 = vsel %vm2302_vm4, %v2299_v62, %v7117_v58  ;;  %v2355_v15 = vsel %vm2314_vm6, %v2350_v47, %v7147_v36  ;;  %v2464_v47 = vld [vmem:[%s303_s27] sm:$0x3] }
 0x220   : > { %v7151_v55 = vpop.permute.xlu1 %7150  ;;  %v7166_v1 = vpop.permute.xlu0 %7165  ;;  %v7000_v14 = vpack.c.bf16 %v2334_v63, %v2333_v50  ;;  %v2311_v45 = vsel %vm2308_vm5, %v2305_v39, %v7137_v27  ;;  %v2356_v46 = vsel %vm2314_vm6, %v2351_v59, %v7148_v35  ;;  %v2360_v63 = vsel %vm2320_vm7, %v2355_v15, %v7157_v44 }
 0x221   : > { %v7168_v12 = vunpack.i.h.bf16 %v7166_v1  ;;  %v7167_v56 = vunpack.i.l.bf16 %v7166_v1  ;;  %v7153_v23 = vunpack.i.h.bf16 %v7151_v55  ;;  %v7152_v50 = vunpack.i.l.bf16 %v7151_v55 }
 0x222   : > { %7001 = vmatpush1.bf16.msra.mxu0 %v7000_v14  ;;  %v2361_v49 = vsel %vm2320_vm7, %v2356_v46, %v7158_v5 }
 0x223   : > { %v2365_v58 = vsel %vm2326_vm8, %v2360_v63, %v7167_v56  ;;  %v2366_v55 = vsel %vm2326_vm8, %v2361_v49, %v7168_v12 }
 0x224   : > { %v7161_v30 = vpop.permute.xlu1 %7160  ;;  %v2171_v53 = vpop.permute.xlu0 %2170 }
 0x225   : > { %v2342_v13 = vsel %vm384_vm3, %v8654_v25, %v2171_v53  ;;  %v7163_v14 = vunpack.i.h.bf16 %v7161_v30  ;;  %v7162_v8 = vunpack.i.l.bf16 %v7161_v30  ;;  %v2317_v53 = vsel %vm2314_vm6, %v2311_v45, %v7152_v50 }
 0x226   : > { %v2347_v25 = vsel %vm2302_vm4, %v2342_v13, %v8697_v21  ;;  %v2318_v30 = vsel %vm2314_vm6, %v2312_v22, %v7153_v23 }
 0x227   : > { %v2323_v2 = vsel %vm2320_vm7, %v2317_v53, %v7162_v8  ;;  %v2324_v41 = vsel %vm2320_vm7, %v2318_v30, %v7163_v14 }
 0x228   : > { %v7171_v10 = vpop.permute.xlu1 %7170  ;;  %v2031_v52 = vpop.permute.xlu0 %2030 }
 0x229   : > { %v7173_v57 = vunpack.i.h.bf16 %v7171_v10  ;;  %v7172_v19 = vunpack.i.l.bf16 %v7171_v10  ;;  %v2301_v33 = vsel %vm384_vm3, %v8666_v18, %v2031_v52 }
 0x22b   : > { %v2329_v40 = vsel %vm2326_vm8, %v2323_v2, %v7172_v19  ;;  %v2330_v24 = vsel %vm2326_vm8, %v2324_v41, %v7173_v57 }
 0x22c   : > { %v7176_v7 = vpop.permute.xlu1 %7175  ;;  %v2211_v38 = vpop.permute.xlu0 %2210 }
 0x22d   : > { %v7178_v34 = vunpack.i.h.bf16 %v7176_v7  ;;  %v7177_v29 = vunpack.i.l.bf16 %v7176_v7  ;;  %v2352_v1 = vsel %vm2308_vm5, %v2347_v25, %v2211_v38 }
 0x22e   : > { %v2357_v16 = vsel %vm2314_vm6, %v2352_v1, %v8699_v6  ;;  %v2307_v6 = vsel %vm2302_vm4, %v2301_v33, %v8701_v42 }
 0x22f   : > { %v2370_v32 = vsel %vm2332_vm9, %v2365_v58, %v7177_v29  ;;  %v2371_v21 = vsel %vm2332_vm9, %v2366_v55, %v7178_v34 }
 0x230   : > { %v7181_v20 = vpop.permute.xlu1 %7180  ;;  %v2251_v17 = vpop.permute.xlu0 %2250  ;;  %v7002_v4 = vpack.c.bf16 %v2371_v21, %v2370_v32 }
 0x231   : > { %v7183_v60 = vunpack.i.h.bf16 %v7181_v20  ;;  %v7182_v28 = vunpack.i.l.bf16 %v7181_v20  ;;  %v2362_v43 = vsel %vm2320_vm7, %v2357_v16, %v2251_v17 }
 0x232   : > { %7003 = vmatprep.subr.bf16.mxu0 %v7002_v4  ;;  %v2367_v18 = vsel %vm2326_vm8, %v2362_v43, %v8703_v37 }
 0x233   : > { %v2335_v27 = vsel %vm2332_vm9, %v2329_v40, %v7182_v28  ;;  %v2336_v0 = vsel %vm2332_vm9, %v2330_v24, %v7183_v60 }
 0x234   : > { %v2071_v31 = vpop.permute.xlu1 %2070  ;;  %v2291_v51 = vpop.permute.xlu0 %2290  ;;  %v7004_v62 = vpack.c.bf16 %v2336_v0, %v2335_v27 }
 0x235   : > { %v2313_v54 = vsel %vm2308_vm5, %v2307_v6, %v2071_v31  ;;  %v2372_v35 = vsel %vm2332_vm9, %v2367_v18, %v2291_v51 }
 0x236   : > { %7005 = vmatpush1.bf16.msra.mxu0 %v7004_v62  ;;  %v2319_v26 = vsel %vm2314_vm6, %v2313_v54, %v8705_v3  ;;  %v11949_v3 = vld [vmem:[#allocation6_spill] sm:$0xff] }
 0x237   : > { %6990 = vmatprep.subr.msk.mxu0 %vm2384_vm10, %v2372_v35  ;;  %v11659_v10 = vsub.s32 0, %v11949_v3  ;;  %v11658_v56 = vsub.s32 1, %v11949_v3 }
 0x238   : > { %v2111_v36 = vpop.permute.xlu1 %2110 }
 0x239   : > { %v2325_v42 = vsel %vm2320_vm7, %v2319_v26, %v2111_v36  ;;  %v2469_v5 = vrot.slane %v2464_v47, %v11659_v10  ;;  %v2473_v46 = vrot.slane %v2464_v47, %v11658_v56 }
 0x23a   : > { %v2331_v37 = vsel %vm2326_vm8, %v2325_v42, %v8707_v9 }
 0x23c   : > { %v2151_v39 = vpop.permute.xlu1 %2150 }
 0x23d   : > { %v2337_v44 = vsel %vm2332_vm9, %v2331_v37, %v2151_v39 }
 0x23e   : > { %6991 = vmatpush1.msk.msra.mxu0 %vm2384_vm10, %v2337_v44 }
 0x23f   : > { %6992 = vmatmul.mubr.msk.f32.vlgmr.msra.gmra.mrb[0].mxu0 %vm2380_vm11, %v2373_v48 }
 0x245   : > { %v2378_v52 = vpop.permute.xlu0 %2377 }
 0x312   : > { %v2457_v9 = vpop.f32.mrb[0].mxu0 }
 0x313   : > { %v2458_v59 = vadd.f32 %v2457_v9, %v2378_v52  ;;  %v2459_v13 = vpop.f32.mrb[1].mxu0 }
 0x314   : > { %v2460_v12 = vadd.f32 %v2459_v13, %v2378_v52 }
 0x315   : > { %v2462_v45 = vmax.f32 %v2458_v59, 0.0 }
 0x316   : > { %v2463_v15 = vmax.f32 %v2460_v12, 0.0 }
 0x317   : > { %v2476_v22 = vmul.f32 %v2469_v5, %v2462_v45 }
 0x318   : > { %v8872_v23 = vmul.f32 %v2473_v46, %v2463_v15 }
 0x319   : > { %2485 = vrot.lane.b32.xlu0 %v2476_v22, %s7500_s16  ;;  %2479 = vrot.lane.b32.xlu1 %v2476_v22, %s7501_s17 }
 0x31d   : > { %2491 = vrot.lane.b32.xlu0 %v2476_v22, %s7499_s15  ;;  %2482 = vrot.lane.b32.xlu1 %v2476_v22, %s7497_s13 }
 0x321   : > { %2497 = vrot.lane.b32.xlu0 %v2476_v22, %s7498_s14  ;;  %2488 = vrot.lane.b32.xlu1 %v2476_v22, %s7496_s12 }
 0x325   : > { %2504 = vrot.lane.b32.xlu0 %v8872_v23, %s7497_s13  ;;  %2494 = vrot.lane.b32.xlu1 %v2476_v22, %s7495_s11 }
 0x329   : > { %2510 = vrot.lane.b32.xlu0 %v8872_v23, %s7496_s12  ;;  %2501 = vrot.lane.b32.xlu1 %v8872_v23, %s7501_s17 }
 0x32d   : > { %2516 = vrot.lane.b32.xlu0 %v8872_v23, %s7495_s11  ;;  %2507 = vrot.lane.b32.xlu1 %v8872_v23, %s7500_s16 }
 0x331   : > { %2513 = vrot.lane.b32.xlu1 %v8872_v23, %s7499_s15 }
 0x335   : > { %2519 = vrot.lane.b32.xlu1 %v8872_v23, %s7498_s14 }
 0x38b   : > { %v2486_v50 = vpop.permute.xlu0 %2485  ;;  %v2480_v63 = vpop.permute.xlu1 %2479 }
 0x38c   : > { %v2538_v49 = vcombine.low %v2480_v63, %v2486_v50  ;;  %v2539_v31 = vcombine.high %v2480_v63, %v2486_v50 }
 0x38e   : > { %v2546_v58 = vrot.slane %v2538_v49, %v7784_v61  ;;  %v2553_v48 = vrot.slane %v2539_v31, %v7784_v61 }
 0x38f   : > { %v2492_v14 = vpop.permute.xlu0 %2491  ;;  %v2483_v8 = vpop.permute.xlu1 %2482 }
 0x390   : > { %v2522_v7 = vcombine.low %v2476_v22, %v2483_v8  ;;  %v2523_v28 = vcombine.high %v2476_v22, %v2483_v8 }
 0x392   : > { %v2530_v29 = vrot.slane %v2522_v7, %v7784_v61  ;;  %v2537_v35 = vrot.slane %v2523_v28, %v7784_v61 }
 0x393   : > { %v2498_v25 = vpop.permute.xlu0 %2497  ;;  %v2489_v38 = vpop.permute.xlu1 %2488 }
 0x394   : > { %v2570_v34 = vcombine.low %v2492_v14, %v2498_v25  ;;  %v2586_v30 = vcombine.low %v2530_v29, %v2546_v58  ;;  %v2587_v43 = vcombine.high %v2530_v29, %v2546_v58  ;;  %v2571_v40 = vcombine.high %v2492_v14, %v2498_v25 }
 0x395   : > { %v2602_v5 = vcombine.low %v2537_v35, %v2553_v48 }
 0x396   : > { %v2578_v55 = vrot.slane %v2570_v34, %v7784_v61  ;;  %v2594_v16 = vrot.slane %v2586_v30, %v7809_v11  ;;  %v2585_v36 = vrot.slane %v2571_v40, %v7784_v61  ;;  %v2601_v42 = vrot.slane %v2587_v43, %v7809_v11 }
 0x397   : > { %v8890_v1 = vpop.permute.xlu0 %2504  ;;  %v2495_v57 = vpop.permute.xlu1 %2494  ;;  %v2610_v46 = vrot.slane %v2602_v5, %v7809_v11  ;;  %v2603_v34 = vcombine.high %v2537_v35, %v2553_v48 }
 0x398   : > { %v2554_v19 = vcombine.low %v2489_v38, %v2495_v57  ;;  %v2555_v17 = vcombine.high %v2489_v38, %v2495_v57  ;;  %v2658_v0 = vcombine.low %v8872_v23, %v8890_v1  ;;  %v2659_v29 = vcombine.high %v8872_v23, %v8890_v1 }
 0x399   : > { %v2617_v23 = vrot.slane %v2603_v34, %v7809_v11 }
 0x39a   : > { %v2562_v53 = vrot.slane %v2554_v19, %v7784_v61  ;;  %v2569_v6 = vrot.slane %v2555_v17, %v7784_v61  ;;  %v2666_v39 = vrot.slane %v2658_v0, %v7784_v61  ;;  %v2673_v1 = vrot.slane %v2659_v29, %v7784_v61 }
 0x39b   : > { %v8895_v32 = vpop.permute.xlu1 %2501  ;;  %v2511_v2 = vpop.permute.xlu0 %2510 }
 0x39c   : > { %v2618_v21 = vcombine.low %v2562_v53, %v2578_v55  ;;  %v2619_v4 = vcombine.high %v2562_v53, %v2578_v55  ;;  %v2634_v44 = vcombine.low %v2569_v6, %v2585_v36  ;;  %v2635_v8 = vcombine.high %v2569_v6, %v2585_v36 }
 0x39e   : > { %v2626_v41 = vrot.slane %v2618_v21, %v7809_v11  ;;  %v2633_v51 = vrot.slane %v2619_v4, %v7809_v11  ;;  %v2642_v22 = vrot.slane %v2634_v44, %v7809_v11  ;;  %v2649_v53 = vrot.slane %v2635_v8, %v7809_v11 }
 0x39f   : > { %v2508_v20 = vpop.permute.xlu1 %2507  ;;  %v2517_v24 = vpop.permute.xlu0 %2516 }
 0x3a0   : > { %v2650_v33 = vcombine.low %v2594_v16, %v2626_v41  ;;  %v2674_v60 = vcombine.low %v8895_v32, %v2508_v20  ;;  %v2651_v18 = vcombine.high %v2594_v16, %v2626_v41  ;;  %v2690_v62 = vcombine.low %v2511_v2, %v2517_v24 }
 0x3a1   : > { %v2652_v52 = vcombine.low %v2601_v42, %v2633_v51  ;;  %v2653_v45 = vcombine.high %v2601_v42, %v2633_v51  ;;  %v2654_v7 = vcombine.low %v2610_v46, %v2642_v22  ;;  %v2691_v25 = vcombine.high %v2511_v2, %v2517_v24 }
 0x3a2   : > { %2834 = vrot.lane.b32.xlu0 %v2650_v33, %s7490_s8  ;;  %v2682_v54 = vrot.slane %v2674_v60, %v7784_v61  ;;  %v2698_v47 = vrot.slane %v2690_v62, %v7784_v61  ;;  %v2675_v38 = vcombine.high %v8895_v32, %v2508_v20  ;;  %v2655_v55 = vcombine.high %v2610_v46, %v2642_v22 }
 0x3a3   : > { %v2514_v27 = vpop.permute.xlu1 %2513  ;;  %v2705_v30 = vrot.slane %v2691_v25, %v7784_v61  ;;  %v2656_v20 = vcombine.low %v2617_v23, %v2649_v53  ;;  %v2657_v33 = vcombine.high %v2617_v23, %v2649_v53 }
 0x3a4   : > { %v2722_v9 = vcombine.low %v2666_v39, %v2682_v54  ;;  %v2723_v49 = vcombine.high %v2666_v39, %v2682_v54  ;;  %v2689_v32 = vrot.slane %v2675_v38, %v7784_v61 }
 0x3a6   : > { %2838 = vrot.lane.b32.xlu0 %v2651_v18, %s7490_s8  ;;  %v2730_v12 = vrot.slane %v2722_v9, %v7809_v11  ;;  %v2737_v21 = vrot.slane %v2723_v49, %v7809_v11  ;;  %v2738_v16 = vcombine.low %v2673_v1, %v2689_v32  ;;  %v2739_v40 = vcombine.high %v2673_v1, %v2689_v32 }
 0x3a7   : > { %v2520_v26 = vpop.permute.xlu1 %2519 }
 0x3a8   : > { %v2706_v37 = vcombine.low %v2514_v27, %v2520_v26  ;;  %v2707_v50 = vcombine.high %v2514_v27, %v2520_v26  ;;  %v2746_v60 = vrot.slane %v2738_v16, %v7809_v11  ;;  %v2753_v0 = vrot.slane %v2739_v40, %v7809_v11 }
 0x3aa   : > { %v2714_v59 = vrot.slane %v2706_v37, %v7784_v61  ;;  %2842 = vrot.lane.b32.xlu0 %v2652_v52, %s7490_s8  ;;  %v2721_v57 = vrot.slane %v2707_v50, %v7784_v61 }
 0x3ac   : > { %v2754_v13 = vcombine.low %v2698_v47, %v2714_v59  ;;  %v2755_v63 = vcombine.high %v2698_v47, %v2714_v59  ;;  %v2770_v2 = vcombine.low %v2705_v30, %v2721_v57  ;;  %v2771_v28 = vcombine.high %v2705_v30, %v2721_v57 }
 0x3ae   : > { %v2762_v15 = vrot.slane %v2754_v13, %v7809_v11  ;;  %2846 = vrot.lane.b32.xlu0 %v2653_v45, %s7490_s8  ;;  %v2769_v58 = vrot.slane %v2755_v63, %v7809_v11  ;;  %v2778_v4 = vrot.slane %v2770_v2, %v7809_v11  ;;  %v2785_v27 = vrot.slane %v2771_v28, %v7809_v11 }
 0x3b0   : > { %v2786_v14 = vcombine.low %v2730_v12, %v2762_v15  ;;  %v2787_v19 = vcombine.high %v2730_v12, %v2762_v15  ;;  %v2788_v41 = vcombine.low %v2737_v21, %v2769_v58  ;;  %v2789_v17 = vcombine.high %v2737_v21, %v2769_v58 }
 0x3b1   : > { %v2790_v43 = vcombine.low %v2746_v60, %v2778_v4  ;;  %v2791_v24 = vcombine.high %v2746_v60, %v2778_v4  ;;  %v2792_v31 = vcombine.low %v2753_v0, %v2785_v27  ;;  %v2793_v6 = vcombine.high %v2753_v0, %v2785_v27 }
 0x3b2   : > { %2836 = vrot.lane.b32.xlu1 %v2786_v14, %s7490_s8  ;;  %2850 = vrot.lane.b32.xlu0 %v2654_v7, %s7490_s8 }
 0x3b6   : > { %2840 = vrot.lane.b32.xlu1 %v2787_v19, %s7490_s8  ;;  %2854 = vrot.lane.b32.xlu0 %v2655_v55, %s7490_s8 }
 0x3ba   : > { %2844 = vrot.lane.b32.xlu1 %v2788_v41, %s7490_s8  ;;  %2858 = vrot.lane.b32.xlu0 %v2656_v20, %s7490_s8 }
 0x3be   : > { %2848 = vrot.lane.b32.xlu1 %v2789_v17, %s7490_s8  ;;  %2862 = vrot.lane.b32.xlu0 %v2657_v33, %s7490_s8 }
 0x3c2   : > { %2852 = vrot.lane.b32.xlu1 %v2790_v43, %s7490_s8 }
 0x3c6   : > { %2856 = vrot.lane.b32.xlu1 %v2791_v24, %s7490_s8 }
 0x3ca   : > { %2860 = vrot.lane.b32.xlu1 %v2792_v31, %s7490_s8 }
 0x3ce   : > { %2864 = vrot.lane.b32.xlu1 %v2793_v6, %s7490_s8 }
 0x414   : > { %v2835_v18 = vpop.permute.xlu0 %2834 }
 0x415   : > { %2882 = vst.msk [vmem:[#allocation3 + $0x1] sm:$0xff] %vm367_vm2, %v2835_v18 }
 0x418   : > { %v2839_v51 = vpop.permute.xlu0 %2838 }
 0x419   : > { %2884 = vst.msk [vmem:[#allocation3 + $0x19] sm:$0xff] %vm367_vm2, %v2839_v51 }
 0x41c   : > { %v8949_v62 = vld [vmem:[#allocation3] sm:$0xff]  ;;  %v2843_v35 = vpop.permute.xlu0 %2842 }
 0x41d   : > { %v8951_v54 = vld [vmem:[#allocation3 + $0x1] sm:$0xff]  ;;  %2914 = vst.msk [vmem:[#allocation5] sm:$0xff] %vm384_vm3, %v8949_v62  ;;  %2962 = vrot.lane.b32.xlu0 %v8949_v62, %s7491_s9 }
 0x41e   : > { %3141 = vst.msk [vmem:[#allocation5 + $0x180] sm:$0xff] %vm384_vm3, %v8951_v54 }
 0x41f   : > { %2886 = vst.msk [vmem:[#allocation3 + $0x31] sm:$0xff] %vm367_vm2, %v2843_v35 }
 0x420   : > { %v8960_v36 = vld [vmem:[#allocation3 + $0x18] sm:$0xff]  ;;  %v2847_v42 = vpop.permute.xlu0 %2846 }
 0x421   : > { %v8962_v26 = vld [vmem:[#allocation3 + $0x19] sm:$0xff]  ;;  %2916 = vst.msk [vmem:[#allocation5 + $0x10] sm:$0xff] %vm384_vm3, %v8960_v36  ;;  %2966 = vrot.lane.b32.xlu0 %v8960_v36, %s7491_s9 }
 0x422   : > { %3143 = vst.msk [vmem:[#allocation5 + $0x190] sm:$0xff] %vm384_vm3, %v8962_v26 }
 0x423   : > { %2888 = vst.msk [vmem:[#allocation3 + $0x49] sm:$0xff] %vm367_vm2, %v2847_v42 }
 0x424   : > { %v2837_v39 = vpop.permute.xlu1 %2836  ;;  %v2851_v44 = vpop.permute.xlu0 %2850 }
 0x425   : > { %2883 = vst.msk [vmem:[#allocation3 + $0x9] sm:$0xff] %vm367_vm2, %v2837_v39  ;;  %2890 = vst.msk [vmem:[#allocation3 + $0x61] sm:$0xff] %vm367_vm2, %v2851_v44 }
 0x426   : > { %v8971_v37 = vld [vmem:[#allocation3 + $0x30] sm:$0xff] }
 0x427   : > { %v8973_v48 = vld [vmem:[#allocation3 + $0x31] sm:$0xff]  ;;  %2918 = vst.msk [vmem:[#allocation5 + $0x20] sm:$0xff] %vm384_vm3, %v8971_v37  ;;  %2970 = vrot.lane.b32.xlu0 %v8971_v37, %s7491_s9 }
 0x428   : > { %3145 = vst.msk [vmem:[#allocation5 + $0x1a0] sm:$0xff] %vm384_vm3, %v8973_v48  ;;  %v2841_v52 = vpop.permute.xlu1 %2840  ;;  %v2855_v59 = vpop.permute.xlu0 %2854 }
 0x429   : > { %2885 = vst.msk [vmem:[#allocation3 + $0x21] sm:$0xff] %vm367_vm2, %v2841_v52  ;;  %2892 = vst.msk [vmem:[#allocation3 + $0x79] sm:$0xff] %vm367_vm2, %v2855_v59 }
 0x42a   : > { %v8983_v47 = vld [vmem:[#allocation3 + $0x48] sm:$0xff] }
 0x42b   : > { %v8985_v9 = vld [vmem:[#allocation3 + $0x49] sm:$0xff]  ;;  %2920 = vst.msk [vmem:[#allocation5 + $0x30] sm:$0xff] %vm384_vm3, %v8983_v47  ;;  %2974 = vrot.lane.b32.xlu0 %v8983_v47, %s7491_s9 }
 0x42c   : > { %3147 = vst.msk [vmem:[#allocation5 + $0x1b0] sm:$0xff] %vm384_vm3, %v8985_v9  ;;  %3201 = vrot.lane.b32.xlu1 %v8985_v9, %s7491_s9  ;;  %v8997_v5 = vld [vmem:[#allocation3 + $0x8] sm:$0xff]  ;;  %v2845_v22 = vpop.permute.xlu1 %2844  ;;  %v9003_v12 = vld [vmem:[#allocation3 + $0x60] sm:$0xff]  ;;  %v2859_v50 = vpop.permute.xlu0 %2858 }
 0x42d   : > { %v8999_v13 = vld [vmem:[#allocation3 + $0x9] sm:$0xff]  ;;  %v9005_v15 = vld [vmem:[#allocation3 + $0x61] sm:$0xff]  ;;  %2915 = vst.msk [vmem:[#allocation5 + $0x8] sm:$0xff] %vm384_vm3, %v8997_v5  ;;  %2922 = vst.msk [vmem:[#allocation5 + $0x40] sm:$0xff] %vm384_vm3, %v9003_v12 }
 0x42e   : > { %v9001_v45 = vld [vmem:[#allocation3 + $0x2] sm:$0xff]  ;;  %3142 = vst.msk [vmem:[#allocation5 + $0x188] sm:$0xff] %vm384_vm3, %v8999_v13  ;;  %v9011_v46 = vld [vmem:[#allocation3 + $0xa] sm:$0xff]  ;;  %3149 = vst.msk [vmem:[#allocation5 + $0x1c0] sm:$0xff] %vm384_vm3, %v9005_v15 }
 0x42f   : > { %3368 = vst.msk [vmem:[#allocation5 + $0x300] sm:$0xff] %vm384_vm3, %v9001_v45  ;;  %3369 = vst.msk [vmem:[#allocation5 + $0x308] sm:$0xff] %vm384_vm3, %v9011_v46  ;;  %2978 = vrot.lane.b32.xlu0 %v9003_v12, %s7491_s9 }
 0x430   : > { %2887 = vst.msk [vmem:[#allocation3 + $0x39] sm:$0xff] %vm367_vm2, %v2845_v22  ;;  %2894 = vst.msk [vmem:[#allocation3 + $0x91] sm:$0xff] %vm367_vm2, %v2859_v50  ;;  %v9025_v63 = vld [vmem:[#allocation3 + $0x20] sm:$0xff]  ;;  %v2849_v7 = vpop.permute.xlu1 %2848  ;;  %v9031_v25 = vld [vmem:[#allocation3 + $0x78] sm:$0xff]  ;;  %v2863_v34 = vpop.permute.xlu0 %2862 }
 0x431   : > { %v9027_v14 = vld [vmem:[#allocation3 + $0x21] sm:$0xff]  ;;  %v9033_v38 = vld [vmem:[#allocation3 + $0x79] sm:$0xff]  ;;  %2917 = vst.msk [vmem:[#allocation5 + $0x18] sm:$0xff] %vm384_vm3, %v9025_v63  ;;  %2924 = vst.msk [vmem:[#allocation5 + $0x50] sm:$0xff] %vm384_vm3, %v9031_v25 }
 0x432   : > { %v9029_v8 = vld [vmem:[#allocation3 + $0x1a] sm:$0xff]  ;;  %3144 = vst.msk [vmem:[#allocation5 + $0x198] sm:$0xff] %vm384_vm3, %v9027_v14  ;;  %v9039_v49 = vld [vmem:[#allocation3 + $0x22] sm:$0xff]  ;;  %3151 = vst.msk [vmem:[#allocation5 + $0x1d0] sm:$0xff] %vm384_vm3, %v9033_v38  ;;  %3209 = vrot.lane.b32.xlu1 %v9033_v38, %s7491_s9 }
 0x433   : > { %11950 = vst [vmem:[#allocation12_spill] sm:$0xff] %v9029_v8  ;;  %3370 = vst.msk [vmem:[#allocation5 + $0x310] sm:$0xff] %vm384_vm3, %v9029_v8  ;;  %2982 = vrot.lane.b32.xlu0 %v9031_v25, %s7491_s9  ;;  %v9194_v39 = vld [vmem:[#allocation5 + $0x1b0] sm:$0xff]  ;;  %v9216_v50 = vld [vmem:[#allocation5 + $0x180] sm:$0xff] }
 0x434   : > { %2889 = vst.msk [vmem:[#allocation3 + $0x51] sm:$0xff] %vm367_vm2, %v2849_v7  ;;  %2896 = vst.msk [vmem:[#allocation3 + $0xa9] sm:$0xff] %vm367_vm2, %v2863_v34  ;;  %v2853_v58 = vpop.permute.xlu1 %2852  ;;  %v9256_v56 = vld [vmem:[#allocation5 + $0x40] sm:$0xff] }
 0x435   : > { %3371 = vst.msk [vmem:[#allocation5 + $0x318] sm:$0xff] %vm384_vm3, %v9039_v49  ;;  %11960 = vst [vmem:[#allocation34_spill] sm:$0xff] %v9194_v39  ;;  %v9210_v59 = vld [vmem:[#allocation5 + $0x1c0] sm:$0xff] }
 0x436   : > { %2891 = vst.msk [vmem:[#allocation3 + $0x69] sm:$0xff] %vm367_vm2, %v2853_v58  ;;  %11965 = vst [vmem:[#allocation47_spill] sm:$0xff] %v9210_v59 }
 0x437   : > { %v9055_v29 = vld [vmem:[#allocation3 + $0x38] sm:$0xff]  ;;  %v9061_v55 = vld [vmem:[#allocation3 + $0x90] sm:$0xff]  ;;  %11966 = vst [vmem:[#allocation46_spill] sm:$0xff] %v9216_v50  ;;  %11975 = vst [vmem:[#allocation60_spill] sm:$0xff] %v9256_v56 }
 0x438   : > { %v9057_v57 = vld [vmem:[#allocation3 + $0x39] sm:$0xff]  ;;  %v9063_v53 = vld [vmem:[#allocation3 + $0x91] sm:$0xff]  ;;  %2919 = vst.msk [vmem:[#allocation5 + $0x28] sm:$0xff] %vm384_vm3, %v9055_v29  ;;  %2926 = vst.msk [vmem:[#allocation5 + $0x60] sm:$0xff] %vm384_vm3, %v9061_v55  ;;  %2986 = vrot.lane.b32.xlu0 %v9061_v55, %s7491_s9  ;;  %v2857_v1 = vpop.permute.xlu1 %2856 }
 0x439   : > { %v9059_v19 = vld [vmem:[#allocation3 + $0x32] sm:$0xff]  ;;  %3146 = vst.msk [vmem:[#allocation5 + $0x1a8] sm:$0xff] %vm384_vm3, %v9057_v57  ;;  %v9069_v30 = vld [vmem:[#allocation3 + $0x3a] sm:$0xff]  ;;  %3153 = vst.msk [vmem:[#allocation5 + $0x1e0] sm:$0xff] %vm384_vm3, %v9063_v53 }
 0x43a   : > { %3372 = vst.msk [vmem:[#allocation5 + $0x320] sm:$0xff] %vm384_vm3, %v9059_v19  ;;  %3373 = vst.msk [vmem:[#allocation5 + $0x328] sm:$0xff] %vm384_vm3, %v9069_v30  ;;  %v9262_v3 = vld [vmem:[#allocation5 + $0x50] sm:$0xff] }
 0x43b   : > { %v9082_v32 = vld [vmem:[#allocation3 + $0x50] sm:$0xff]  ;;  %v9088_v2 = vld [vmem:[#allocation3 + $0xa8] sm:$0xff]  ;;  %2893 = vst.msk [vmem:[#allocation3 + $0x81] sm:$0xff] %vm367_vm2, %v2857_v1  ;;  %11978 = vst [vmem:[#allocation54_spill] sm:$0xff] %v9262_v3 }
 0x43c   : > { %v9084_v21 = vld [vmem:[#allocation3 + $0x51] sm:$0xff]  ;;  %v3138_v41 = vld [vmem:[#allocation3 + $0xa9] sm:$0xff]  ;;  %2921 = vst.msk [vmem:[#allocation5 + $0x38] sm:$0xff] %vm384_vm3, %v9082_v32  ;;  %2928 = vst.msk [vmem:[#allocation5 + $0x70] sm:$0xff] %vm384_vm3, %v9088_v2  ;;  %2990 = vrot.lane.b32.xlu0 %v9088_v2, %s7491_s9  ;;  %v2861_v33 = vpop.permute.xlu1 %2860 }
 0x43d   : > { %v9086_v23 = vld [vmem:[#allocation3 + $0x4a] sm:$0xff]  ;;  %3148 = vst.msk [vmem:[#allocation5 + $0x1b8] sm:$0xff] %vm384_vm3, %v9084_v21  ;;  %v9094_v20 = vld [vmem:[#allocation3 + $0x52] sm:$0xff]  ;;  %3155 = vst.msk [vmem:[#allocation5 + $0x1f0] sm:$0xff] %vm384_vm3, %v3138_v41  ;;  %3217 = vrot.lane.b32.xlu1 %v3138_v41, %s7491_s9 }
 0x43e   : > { %11951 = vst [vmem:[#allocation13_spill] sm:$0xff] %v9086_v23  ;;  %11952 = vst [vmem:[#allocation14_spill] sm:$0xff] %v9094_v20  ;;  %v9107_v16 = vld [vmem:[#allocation3 + $0x68] sm:$0xff]  ;;  %v9235_v1 = vld [vmem:[#allocation5 + $0x10] sm:$0xff] }
 0x43f   : > { %3374 = vst.msk [vmem:[#allocation5 + $0x330] sm:$0xff] %vm384_vm3, %v9086_v23  ;;  %3375 = vst.msk [vmem:[#allocation5 + $0x338] sm:$0xff] %vm384_vm3, %v9094_v20  ;;  %v9109_v17 = vld [vmem:[#allocation3 + $0x69] sm:$0xff] }
 0x440   : > { %v9111_v4 = vld [vmem:[#allocation3 + $0x62] sm:$0xff]  ;;  %2923 = vst.msk [vmem:[#allocation5 + $0x48] sm:$0xff] %vm384_vm3, %v9107_v16  ;;  %3150 = vst.msk [vmem:[#allocation5 + $0x1c8] sm:$0xff] %vm384_vm3, %v9109_v17  ;;  %v9117_v60 = vld [vmem:[#allocation3 + $0x6a] sm:$0xff]  ;;  %3059 = vrot.lane.b32.xlu0 %v8949_v62, %s7492_s10  ;;  %v2865_v24 = vpop.permute.xlu1 %2864 }
 0x441   : > { %11953 = vst [vmem:[#allocation17_spill] sm:$0xff] %v9111_v4  ;;  %3376 = vst.msk [vmem:[#allocation5 + $0x340] sm:$0xff] %vm384_vm3, %v9111_v4  ;;  %3290 = vrot.lane.b32.xlu1 %v8962_v26, %s7492_s10  ;;  %v9198_v44 = vld [vmem:[#allocation5 + $0x1e0] sm:$0xff]  ;;  %v9260_v10 = vld [vmem:[#allocation5 + $0x28] sm:$0xff] }
 0x442   : > { %2895 = vst.msk [vmem:[#allocation3 + $0x99] sm:$0xff] %vm367_vm2, %v2861_v33  ;;  %v9128_v28 = vld [vmem:[#allocation3 + $0x80] sm:$0xff]  ;;  %2897 = vst.msk [vmem:[#allocation3 + $0xb1] sm:$0xff] %vm367_vm2, %v2865_v24 }
 0x443   : > { %3377 = vst.msk [vmem:[#allocation5 + $0x348] sm:$0xff] %vm384_vm3, %v9117_v60  ;;  %v9130_v43 = vld [vmem:[#allocation3 + $0x81] sm:$0xff]  ;;  %2925 = vst.msk [vmem:[#allocation5 + $0x58] sm:$0xff] %vm384_vm3, %v9128_v28 }
 0x444   : > { %v9132_v40 = vld [vmem:[#allocation3 + $0x7a] sm:$0xff]  ;;  %3152 = vst.msk [vmem:[#allocation5 + $0x1d8] sm:$0xff] %vm384_vm3, %v9130_v43  ;;  %v9138_v27 = vld [vmem:[#allocation3 + $0x82] sm:$0xff]  ;;  %3063 = vrot.lane.b32.xlu0 %v8960_v36, %s7492_s10  ;;  %v9192_v42 = vld [vmem:[#allocation5 + $0x1f0] sm:$0xff] }
 0x445   : > { %11954 = vst [vmem:[#allocation16_spill] sm:$0xff] %v9132_v40  ;;  %11955 = vst [vmem:[#allocation15_spill] sm:$0xff] %v9138_v27  ;;  %3298 = vrot.lane.b32.xlu1 %v8985_v9, %s7492_s10  ;;  %v9208_v9 = vld [vmem:[#allocation5 + $0x1a0] sm:$0xff] }
 0x446   : > { %3378 = vst.msk [vmem:[#allocation5 + $0x350] sm:$0xff] %vm384_vm3, %v9132_v40  ;;  %3379 = vst.msk [vmem:[#allocation5 + $0x358] sm:$0xff] %vm384_vm3, %v9138_v27  ;;  %v4130_v7 = vcombine.low %v9216_v50, %v9208_v9  ;;  %v9278_v40 = vld [vmem:[#allocation5 + $0x198] sm:$0xff]  ;;  %v9297_v50 = vld [vmem:[#allocation5 + $0x1a8] sm:$0xff] }
 0x447   : > { %11959 = vst [vmem:[#allocation11_spill] sm:$0xff] %v9192_v42  ;;  %11962 = vst [vmem:[#allocation62_spill] sm:$0xff] %v9198_v44  ;;  %v3680_v27 = vld [vmem:[#allocation5 + $0x330] sm:$0xff] }
 0x448   : > { %3067 = vrot.lane.b32.xlu0 %v8971_v37, %s7492_s10  ;;  %v9196_v37 = vld [vmem:[#allocation5 + $0x1d0] sm:$0xff]  ;;  %11964 = vst [vmem:[#allocation59_spill] sm:$0xff] %v9208_v9  ;;  %11971 = vst [vmem:[#allocation28_spill] sm:$0xff] %v9235_v1  ;;  %v9242_v24 = vrot.slane %v4130_v7, %v7784_v61  ;;  %v9258_v7 = vld [vmem:[#allocation5 + $0x60] sm:$0xff] }
 0x449   : > { %v9149_v0 = vld [vmem:[#allocation3 + $0x98] sm:$0xff]  ;;  %3306 = vrot.lane.b32.xlu1 %v9033_v38, %s7492_s10  ;;  %v9169_v51 = vld [vmem:[#allocation3 + $0xb0] sm:$0xff]  ;;  %11961 = vst [vmem:[#allocation37_spill] sm:$0xff] %v9196_v37  ;;  %v4178_v52 = vcombine.low %v9196_v37, %v9192_v42  ;;  %11976 = vst [vmem:[#allocation43_spill] sm:$0xff] %v9258_v7 }
 0x44a   : > { %v9151_v31 = vld [vmem:[#allocation3 + $0x99] sm:$0xff]  ;;  %2927 = vst.msk [vmem:[#allocation5 + $0x68] sm:$0xff] %vm384_vm3, %v9149_v0  ;;  %v9171_v62 = vld [vmem:[#allocation3 + $0xb1] sm:$0xff]  ;;  %2929 = vst.msk [vmem:[#allocation5 + $0x78] sm:$0xff] %vm384_vm3, %v9169_v51 }
 0x44b   : > { %v9153_v6 = vld [vmem:[#allocation3 + $0x92] sm:$0xff]  ;;  %3154 = vst.msk [vmem:[#allocation5 + $0x1e8] sm:$0xff] %vm384_vm3, %v9151_v31  ;;  %v9159_v18 = vld [vmem:[#allocation3 + $0x9a] sm:$0xff]  ;;  %v9173_v35 = vld [vmem:[#allocation3 + $0xaa] sm:$0xff] }
 0x44c   : > { %11956 = vst [vmem:[#allocation31_spill] sm:$0xff] %v9153_v6  ;;  %3380 = vst.msk [vmem:[#allocation5 + $0x360] sm:$0xff] %vm384_vm3, %v9153_v6  ;;  %v9179_v36 = vld [vmem:[#allocation3 + $0xb2] sm:$0xff]  ;;  %3071 = vrot.lane.b32.xlu0 %v8983_v47, %s7492_s10  ;;  %v9295_v42 = vld [vmem:[#allocation5 + $0x188] sm:$0xff] }
 0x44d   : > { %3381 = vst.msk [vmem:[#allocation5 + $0x368] sm:$0xff] %vm384_vm3, %v9159_v18  ;;  %11957 = vst [vmem:[#allocation33_spill] sm:$0xff] %v9173_v35  ;;  %3314 = vrot.lane.b32.xlu1 %v3138_v41, %s7492_s10  ;;  %v9206_v47 = vld [vmem:[#allocation5 + $0x190] sm:$0xff]  ;;  %v9237_v41 = vld [vmem:[#allocation5 + $0x20] sm:$0xff] }
 0x44e   : > { %3156 = vst.msk [vmem:[#allocation5 + $0x1f8] sm:$0xff] %vm384_vm3, %v9171_v62  ;;  %11958 = vst [vmem:[#allocation9_spill] sm:$0xff] %v9179_v36  ;;  %v4146_v22 = vcombine.low %v9206_v47, %v9194_v39  ;;  %v9223_v38 = vld [vmem:[#allocation5 + $0x30] sm:$0xff]  ;;  %v3685_v8 = vld [vmem:[#allocation5 + $0x358] sm:$0xff] }
 0x44f   : > { %3382 = vst.msk [vmem:[#allocation5 + $0x370] sm:$0xff] %vm384_vm3, %v9173_v35  ;;  %3383 = vst.msk [vmem:[#allocation5 + $0x378] sm:$0xff] %vm384_vm3, %v9179_v36  ;;  %v3738_v33 = vcombine.low %v9235_v1, %v9223_v38  ;;  %v9264_v35 = vld [vmem:[#allocation5 + $0x70] sm:$0xff] }
 0x450   : > { %3075 = vrot.lane.b32.xlu0 %v9003_v12, %s7492_s10  ;;  %11963 = vst [vmem:[#allocation57_spill] sm:$0xff] %v9206_v47  ;;  %v4162_v12 = vcombine.low %v9210_v59, %v9198_v44  ;;  %11968 = vst [vmem:[#allocation44_spill] sm:$0xff] %v9223_v38  ;;  %v9230_v34 = vrot.slane %v4146_v22, %v7784_v61  ;;  %v9274_v59 = vld [vmem:[#allocation5 + $0x18] sm:$0xff]  ;;  %v3676_v36 = vld [vmem:[#allocation5 + $0x310] sm:$0xff] }
 0x451   : > { %2964 = vrot.lane.b32.xlu1 %v8997_v5, %s7491_s9  ;;  %11972 = vst [vmem:[#allocation32_spill] sm:$0xff] %v9237_v41  ;;  %11973 = vst [vmem:[#allocation69_spill] sm:$0xff] %v9242_v24  ;;  %v9276_v44 = vld [vmem:[#allocation5 + $0x38] sm:$0xff]  ;;  %v4554_v20 = vcombine.low %v3676_v36, %v3680_v27 }
 0x452   : > { %11969 = vst [vmem:[#allocation36_spill] sm:$0xff] %v9230_v34  ;;  %v9233_v58 = vrot.slane %v4162_v12, %v7784_v61  ;;  %v4194_v12 = vcombine.low %v9242_v24, %v9230_v34  ;;  %11977 = vst [vmem:[#allocation42_spill] sm:$0xff] %v9260_v10  ;;  %v9280_v24 = vld [vmem:[#allocation5 + $0x1b8] sm:$0xff]  ;;  %v9316_v39 = vld [vmem:[#allocation5 + $0x1e8] sm:$0xff] }
 0x453   : > { %11979 = vst [vmem:[#allocation58_spill] sm:$0xff] %v9264_v35  ;;  %11982 = vst [vmem:[#allocation38_spill] sm:$0xff] %v9274_v59  ;;  %v9291_v34 = vld [vmem:[#allocation5 + $0x78] sm:$0xff] }
 0x454   : > { %3079 = vrot.lane.b32.xlu0 %v9031_v25, %s7492_s10  ;;  %v9221_v25 = vrot.slane %v4178_v52, %v7784_v61  ;;  %11970 = vst [vmem:[#allocation35_spill] sm:$0xff] %v9233_v58  ;;  %v9246_v52 = vld [vmem:[#allocation5] sm:$0xff]  ;;  %11983 = vst [vmem:[#allocation39_spill] sm:$0xff] %v9276_v44  ;;  %v9302_v23 = vrot.slane %v4194_v12, %v7809_v11  ;;  %v9314_v47 = vld [vmem:[#allocation5 + $0x1d8] sm:$0xff]  ;;  %v5370_v12 = vcombine.low %v9278_v40, %v9280_v24 }
 0x455   : > { %2968 = vrot.lane.b32.xlu1 %v9025_v63, %s7491_s9  ;;  %11974 = vst [vmem:[#allocation61_spill] sm:$0xff] %v9246_v52  ;;  %v3722_v22 = vcombine.low %v9246_v52, %v9237_v41  ;;  %11984 = vst [vmem:[#allocation22_spill] sm:$0xff] %v9278_v40  ;;  %v9299_v9 = vld [vmem:[#allocation5 + $0x1f8] sm:$0xff]  ;;  %v5354_v41 = vcombine.low %v9295_v42, %v9297_v50 }
 0x456   : > { %11967 = vst [vmem:[#allocation45_spill] sm:$0xff] %v9221_v25  ;;  %11985 = vst [vmem:[#allocation23_spill] sm:$0xff] %v9280_v24  ;;  %v9306_v52 = vld [vmem:[#allocation5 + $0x58] sm:$0xff]  ;;  %v5402_v38 = vcombine.low %v9314_v47, %v9299_v9  ;;  %v9335_v24 = vld [vmem:[#allocation5 + $0x48] sm:$0xff]  ;;  %v9353_v6 = vrot.slane %v5370_v12, %v7784_v61 }
 0x457   : > { %11986 = vst [vmem:[#allocation26_spill] sm:$0xff] %v9291_v34  ;;  %11987 = vst [vmem:[#allocation27_spill] sm:$0xff] %v9295_v42  ;;  %v4994_v1 = vcombine.low %v9306_v52, %v9291_v34  ;;  %v3678_v42 = vld [vmem:[#allocation5 + $0x320] sm:$0xff] }
 0x458   : > { %3083 = vrot.lane.b32.xlu0 %v9061_v55, %s7492_s10  ;;  %v4226_v55 = vcombine.low %v9233_v58, %v9221_v25  ;;  %v9269_v58 = vld [vmem:[#allocation5 + $0x8] sm:$0xff]  ;;  %11988 = vst [vmem:[#allocation24_spill] sm:$0xff] %v9297_v50  ;;  %11989 = vst [vmem:[#allocation25_spill] sm:$0xff] %v9299_v9  ;;  %v3688_v50 = vld [vmem:[#allocation5 + $0x370] sm:$0xff] }
 0x459   : > { %2972 = vrot.lane.b32.xlu1 %v9055_v29, %s7491_s9  ;;  %11980 = vst [vmem:[#allocation30_spill] sm:$0xff] %v9269_v58  ;;  %v4946_v37 = vcombine.low %v9269_v58, %v9260_v10  ;;  %11990 = vst [vmem:[#allocation68_spill] sm:$0xff] %v9302_v23  ;;  %v9310_v58 = vld [vmem:[#allocation5 + $0x68] sm:$0xff]  ;;  %v4962_v10 = vcombine.low %v9274_v59, %v9276_v44  ;;  %v3686_v44 = vld [vmem:[#allocation5 + $0x360] sm:$0xff]  ;;  %v9356_v4 = vrot.slane %v4994_v1, %v7784_v61 }
 0x45a   : > { %v9272_v25 = vrot.slane %v4226_v55, %v7809_v11  ;;  %v3754_v55 = vcombine.low %v9256_v56, %v9258_v7  ;;  %11991 = vst [vmem:[#allocation67_spill] sm:$0xff] %v9306_v52  ;;  %v3681_v56 = vld [vmem:[#allocation5 + $0x338] sm:$0xff]  ;;  %11992 = vst [vmem:[#allocation56_spill] sm:$0xff] %v9314_v47  ;;  %v3687_v59 = vld [vmem:[#allocation5 + $0x368] sm:$0xff] }
 0x45b   : > { %v3689_v7 = vld [vmem:[#allocation5 + $0x378] sm:$0xff]  ;;  %11993 = vst [vmem:[#allocation55_spill] sm:$0xff] %v9316_v39  ;;  %11994 = vst [vmem:[#allocation63_spill] sm:$0xff] %v9335_v24  ;;  %v9338_v47 = vrot.slane %v4946_v37, %v7784_v61  ;;  %v9340_v9 = vld [vmem:[#allocation5 + $0x1c8] sm:$0xff]  ;;  %v9350_v37 = vrot.slane %v4962_v10, %v7784_v61 }
 0x45c   : > { %3087 = vrot.lane.b32.xlu0 %v9088_v2, %s7492_s10  ;;  %v9267_v2 = vrot.slane %v3738_v33, %v7784_v61  ;;  %11981 = vst [vmem:[#allocation29_spill] sm:$0xff] %v9272_v25  ;;  %v9287_v33 = vrot.slane %v3722_v22, %v7784_v61  ;;  %v3770_v22 = vcombine.low %v9262_v3, %v9264_v35  ;;  %v3677_v3 = vld [vmem:[#allocation5 + $0x318] sm:$0xff]  ;;  %v3679_v35 = vld [vmem:[#allocation5 + $0x328] sm:$0xff]  ;;  %11995 = vst [vmem:[#allocation64_spill] sm:$0xff] %v9340_v9 }
 0x45d   : > { %2976 = vrot.lane.b32.xlu1 %v9082_v32, %s7491_s9  ;;  %v9333_v40 = vrot.slane %v3754_v55, %v7784_v61  ;;  %v5810_v52 = vcombine.low %v3685_v8, %v3689_v7  ;;  %v5386_v23 = vcombine.low %v9340_v9, %v9316_v39  ;;  %v3683_v55 = vld [vmem:[#allocation5 + $0x348] sm:$0xff]  ;;  %v5778_v25 = vcombine.low %v3677_v3, %v3681_v56  ;;  %v3674_v3 = vld [vmem:[#allocation5 + $0x300] sm:$0xff]  ;;  %v3684_v56 = vld [vmem:[#allocation5 + $0x350] sm:$0xff] }
 0x45e   : > { %v9343_v34 = vrot.slane %v3770_v22, %v7784_v61  ;;  %v3675_v8 = vld [vmem:[#allocation5 + $0x308] sm:$0xff]  ;;  %v5794_v7 = vcombine.low %v3683_v55, %v3687_v59  ;;  %v3682_v22 = vld [vmem:[#allocation5 + $0x340] sm:$0xff]  ;;  %v4538_v27 = vcombine.low %v3674_v3, %v3678_v42  ;;  %v4586_v36 = vcombine.low %v3684_v56, %v3688_v50 }
 0x45f   : > { %v5762_v9 = vcombine.low %v3675_v8, %v3679_v35  ;;  %v4570_v39 = vcombine.low %v3682_v22, %v3686_v44  ;;  %v9366_v10 = vrot.slane %v5810_v52, %v7784_v61  ;;  %v9374_v35 = vrot.slane %v5386_v23, %v7784_v61 }
 0x460   : > { %3189 = vrot.lane.b32.xlu0 %v8951_v54, %s7491_s9  ;;  %v3818_v59 = vcombine.low %v9333_v40, %v9343_v34  ;;  %v9377_v44 = vrot.slane %v5778_v25, %v7784_v61  ;;  %v9380_v1 = vrot.slane %v5794_v7, %v7784_v61  ;;  %v9383_v52 = vrot.slane %v4554_v20, %v7784_v61 }
 0x461   : > { %2980 = vrot.lane.b32.xlu1 %v9107_v16, %s7491_s9  ;;  %11996 = vst [vmem:[#allocation48_spill] sm:$0xff] %v9366_v10  ;;  %v9386_v42 = vrot.slane %v4570_v39, %v7784_v61  ;;  %v9389_v50 = vrot.slane %v4586_v36, %v7784_v61  ;;  %v9394_v23 = vrot.slane %v5354_v41, %v7784_v61 }
 0x462   : > { %11997 = vst [vmem:[#allocation49_spill] sm:$0xff] %v9377_v44  ;;  %11998 = vst [vmem:[#allocation52_spill] sm:$0xff] %v9380_v1  ;;  %v5858_v20 = vcombine.low %v9380_v1, %v9366_v10  ;;  %v9408_v39 = vrot.slane %v4538_v27, %v7784_v61  ;;  %v5010_v55 = vcombine.low %v9338_v47, %v9350_v37  ;;  %v12035_v1 = vld [vmem:[#allocation59_spill] sm:$0xff] }
 0x463   : > { %11999 = vst [vmem:[#allocation53_spill] sm:$0xff] %v9383_v52  ;;  %12000 = vst [vmem:[#allocation50_spill] sm:$0xff] %v9386_v42  ;;  %v4634_v41 = vcombine.low %v9386_v42, %v9389_v50  ;;  %v5418_v8 = vcombine.low %v9394_v23, %v9353_v6  ;;  %v12005_v3 = vcombine.low %v9287_v33, %v9267_v2 }
 0x464   : > { %3193 = vrot.lane.b32.xlu0 %v8962_v26, %s7491_s9  ;;  %v4978_v26 = vcombine.low %v9335_v24, %v9310_v58  ;;  %v9359_v24 = vrot.slane %v5402_v38, %v7784_v61  ;;  %12001 = vst [vmem:[#allocation51_spill] sm:$0xff] %v9389_v50  ;;  %12003 = vst [vmem:[#allocation7_spill] sm:$0xff] %v9408_v39  ;;  %v4602_v22 = vcombine.low %v9408_v39, %v9383_v52  ;;  %v12031_v39 = vld [vmem:[#allocation57_spill] sm:$0xff] }
 0x465   : > { %2984 = vrot.lane.b32.xlu1 %v9128_v28, %s7491_s9  ;;  %v9427_v56 = vrot.slane %v12005_v3, %v7809_v11  ;;  %v9443_v42 = vrot.slane %v4634_v41, %v7809_v11  ;;  %v9446_v3 = vrot.slane %v5010_v55, %v7809_v11 }
 0x466   : > { %v9371_v38 = vrot.slane %v4978_v26, %v7784_v61  ;;  %v5450_v25 = vcombine.low %v9374_v35, %v9359_v24  ;;  %v9399_v26 = vrot.slane %v5762_v9, %v7784_v61  ;;  %v9415_v9 = vrot.slane %v3818_v59, %v7809_v11 }
 0x467   : > { %12006 = vst [vmem:[#allocation20_spill] sm:$0xff] %v9427_v56  ;;  %v9440_v59 = vrot.slane %v5858_v20, %v7809_v11  ;;  %12010 = vst [vmem:[#allocation40_spill] sm:$0xff] %v9443_v42  ;;  %v12030_v42 = vld [vmem:[#allocation34_spill] sm:$0xff] }
 0x468   : > { %3197 = vrot.lane.b32.xlu0 %v8973_v48, %s7491_s9  ;;  %v5042_v12 = vcombine.low %v9371_v38, %v9356_v4  ;;  %12002 = vst [vmem:[#allocation10_spill] sm:$0xff] %v9399_v26  ;;  %12004 = vst [vmem:[#allocation8_spill] sm:$0xff] %v9415_v9  ;;  %v5826_v7 = vcombine.low %v9399_v26, %v9377_v44  ;;  %v9437_v36 = vrot.slane %v5450_v25, %v7809_v11  ;;  %v12037_v26 = vld [vmem:[#allocation58_spill] sm:$0xff] }
 0x469   : > { %2988 = vrot.lane.b32.xlu1 %v9149_v0, %s7491_s9  ;;  %12009 = vst [vmem:[#allocation19_spill] sm:$0xff] %v9440_v59  ;;  %12011 = vst [vmem:[#allocation41_spill] sm:$0xff] %v9446_v3  ;;  %v4147_v52 = vcombine.high %v12031_v39, %v12030_v42  ;;  %v12038_v42 = vld [vmem:[#allocation54_spill] sm:$0xff]  ;;  %v12042_v59 = vld [vmem:[#allocation69_spill] sm:$0xff] }
 0x46a   : > { %v9430_v27 = vrot.slane %v5042_v12, %v7809_v11  ;;  %12008 = vst [vmem:[#allocation18_spill] sm:$0xff] %v9437_v36  ;;  %v9449_v12 = vrot.slane %v5418_v8, %v7809_v11  ;;  %v9452_v50 = vrot.slane %v5826_v7, %v7809_v11  ;;  %v3771_v39 = vcombine.high %v12038_v42, %v12037_v26  ;;  %v12046_v26 = vld [vmem:[#allocation62_spill] sm:$0xff]  ;;  %v12047_v42 = vld [vmem:[#allocation47_spill] sm:$0xff] }
 0x46b   : > { %v12102_v36 = vcombine.high %v9427_v56, %v9415_v9 }
 0x46c   : > { %3205 = vrot.lane.b32.xlu0 %v9005_v15, %s7491_s9  ;;  %12007 = vst [vmem:[#allocation21_spill] sm:$0xff] %v9430_v27  ;;  %12012 = vst [vmem:[#allocation70_spill] sm:$0xff] %v9449_v12 }
 0x46d   : > { %2992 = vrot.lane.b32.xlu1 %v9169_v51, %s7491_s9  ;;  %12013 = vst [vmem:[#allocation71_spill] sm:$0xff] %v9452_v50  ;;  %v12039_v50 = vld [vmem:[#allocation11_spill] sm:$0xff] }
 0x470   : > { %3213 = vrot.lane.b32.xlu0 %v9063_v53, %s7491_s9 }
 0x471   : > { %3061 = vrot.lane.b32.xlu1 %v8997_v5, %s7492_s10  ;;  %v9455_v5 = vrot.slane %v4602_v22, %v7809_v11 }
 0x473   : > { %12014 = vst [vmem:[#allocation65_spill] sm:$0xff] %v9455_v5 }
 0x474   : > { %3286 = vrot.lane.b32.xlu0 %v8951_v54, %s7492_s10 }
 0x475   : > { %3065 = vrot.lane.b32.xlu1 %v9025_v63, %s7492_s10 }
 0x478   : > { %3294 = vrot.lane.b32.xlu0 %v8973_v48, %s7492_s10 }
 0x479   : > { %3069 = vrot.lane.b32.xlu1 %v9055_v29, %s7492_s10 }
 0x47c   : > { %3302 = vrot.lane.b32.xlu0 %v9005_v15, %s7492_s10 }
 0x47d   : > { %3073 = vrot.lane.b32.xlu1 %v9082_v32, %s7492_s10 }
 0x480   : > { %3310 = vrot.lane.b32.xlu0 %v9063_v53, %s7492_s10 }
 0x481   : > { %3077 = vrot.lane.b32.xlu1 %v9107_v16, %s7492_s10 }
 0x484   : > { %3203 = vrot.lane.b32.xlu0 %v9084_v21, %s7491_s9 }
 0x485   : > { %3081 = vrot.lane.b32.xlu1 %v9128_v28, %s7492_s10 }
 0x488   : > { %3211 = vrot.lane.b32.xlu0 %v9130_v43, %s7491_s9 }
 0x489   : > { %3085 = vrot.lane.b32.xlu1 %v9149_v0, %s7492_s10 }
 0x48c   : > { %3219 = vrot.lane.b32.xlu0 %v9171_v62, %s7491_s9 }
 0x48d   : > { %3089 = vrot.lane.b32.xlu1 %v9169_v51, %s7492_s10 }
 0x48f   : > { %v2963_v54 = vpop.permute.xlu0 %2962 }
 0x490   : > { %3292 = vrot.lane.b32.xlu0 %v9027_v14, %s7492_s10  ;;  %3011 = vst.msk [vmem:[#allocation5 + $0x80] sm:$0xff] %vm384_vm3, %v2963_v54 }
 0x491   : > { %3191 = vrot.lane.b32.xlu1 %v8999_v13, %s7491_s9 }
 0x493   : > { %v2967_v48 = vpop.permute.xlu0 %2966 }
 0x494   : > { %3300 = vrot.lane.b32.xlu0 %v9084_v21, %s7492_s10  ;;  %3013 = vst.msk [vmem:[#allocation5 + $0x90] sm:$0xff] %vm384_vm3, %v2967_v48 }
 0x495   : > { %3195 = vrot.lane.b32.xlu1 %v9027_v14, %s7491_s9 }
 0x497   : > { %v9562_v48 = vld [vmem:[#allocation5 + $0x80] sm:$0xff] }
 0x498   : > { %3308 = vrot.lane.b32.xlu0 %v9130_v43, %s7492_s10  ;;  %12016 = vst [vmem:[#allocation72_spill] sm:$0xff] %v9562_v48 }
 0x499   : > { %3199 = vrot.lane.b32.xlu1 %v9057_v57, %s7491_s9  ;;  %v2971_v15 = vpop.permute.xlu0 %2970 }
 0x49a   : > { %3015 = vst.msk [vmem:[#allocation5 + $0xa0] sm:$0xff] %vm384_vm3, %v2971_v15 }
 0x49c   : > { %3316 = vrot.lane.b32.xlu0 %v9171_v62, %s7492_s10 }
 0x49d   : > { %3207 = vrot.lane.b32.xlu1 %v9109_v17, %s7491_s9  ;;  %v2975_v63 = vpop.permute.xlu0 %2974 }
 0x49e   : > { %v3202_v14 = vpop.permute.xlu1 %3201  ;;  %3017 = vst.msk [vmem:[#allocation5 + $0xb0] sm:$0xff] %vm384_vm3, %v2975_v63 }
 0x49f   : > { %3244 = vst.msk [vmem:[#allocation5 + $0x230] sm:$0xff] %vm384_vm3, %v3202_v14 }
 0x4a0   : > { %3418 = vrot.lane.b32.xlu0 %v9011_v46, %s7491_s9 }
 0x4a1   : > { %3215 = vrot.lane.b32.xlu1 %v9151_v31, %s7491_s9  ;;  %v2979_v29 = vpop.permute.xlu0 %2978  ;;  %v9554_v51 = vld [vmem:[#allocation5 + $0xa0] sm:$0xff] }
 0x4a2   : > { %3019 = vst.msk [vmem:[#allocation5 + $0xc0] sm:$0xff] %vm384_vm3, %v2979_v29  ;;  %12015 = vst [vmem:[#allocation66_spill] sm:$0xff] %v9554_v51  ;;  %v3858_v14 = vcombine.low %v9562_v48, %v9554_v51 }
 0x4a4   : > { %3426 = vrot.lane.b32.xlu0 %v9069_v30, %s7491_s9  ;;  %v3210_v32 = vpop.permute.xlu1 %3209 }
 0x4a5   : > { %3288 = vrot.lane.b32.xlu1 %v8999_v13, %s7492_s10  ;;  %v2983_v53 = vpop.permute.xlu0 %2982  ;;  %3248 = vst.msk [vmem:[#allocation5 + $0x250] sm:$0xff] %vm384_vm3, %v3210_v32  ;;  %v9542_v43 = vld [vmem:[#allocation5 + $0xb0] sm:$0xff]  ;;  %v12018_v32 = vld [vmem:[#allocation14_spill] sm:$0xff] }
 0x4a6   : > { %3021 = vst.msk [vmem:[#allocation5 + $0xd0] sm:$0xff] %vm384_vm3, %v2983_v53  ;;  %v12017_v53 = vld [vmem:[#allocation17_spill] sm:$0xff] }
 0x4a8   : > { %3434 = vrot.lane.b32.xlu0 %v9117_v60, %s7491_s9 }
 0x4a9   : > { %3296 = vrot.lane.b32.xlu1 %v9057_v57, %s7492_s10 }
 0x4aa   : > { %v2987_v21 = vpop.permute.xlu0 %2986 }
 0x4ab   : > { %3023 = vst.msk [vmem:[#allocation5 + $0xe0] sm:$0xff] %vm384_vm3, %v2987_v21 }
 0x4ac   : > { %3442 = vrot.lane.b32.xlu0 %v9159_v18, %s7491_s9 }
 0x4ad   : > { %3304 = vrot.lane.b32.xlu1 %v9109_v17, %s7492_s10  ;;  %v9552_v17 = vld [vmem:[#allocation5 + $0x90] sm:$0xff] }
 0x4ae   : > { %v2991_v13 = vpop.permute.xlu0 %2990  ;;  %v3874_v62 = vcombine.low %v9552_v17, %v9542_v43  ;;  %v9564_v15 = vld [vmem:[#allocation5 + $0xd0] sm:$0xff] }
 0x4af   : > { %v3218_v16 = vpop.permute.xlu1 %3217  ;;  %3025 = vst.msk [vmem:[#allocation5 + $0xf0] sm:$0xff] %vm384_vm3, %v2991_v13 }
 0x4b0   : > { %3252 = vst.msk [vmem:[#allocation5 + $0x270] sm:$0xff] %vm384_vm3, %v3218_v16  ;;  %3416 = vrot.lane.b32.xlu0 %v9001_v45, %s7491_s9  ;;  %v9579_v21 = vrot.slane %v3874_v62, %v7784_v61  ;;  %v12022_v62 = vld [vmem:[#allocation31_spill] sm:$0xff] }
 0x4b1   : > { %3312 = vrot.lane.b32.xlu1 %v9151_v31, %s7492_s10  ;;  %v9556_v31 = vld [vmem:[#allocation5 + $0xc0] sm:$0xff] }
 0x4b2   : > { %v3060_v57 = vpop.permute.xlu0 %3059  ;;  %v9544_v0 = vld [vmem:[#allocation5 + $0xe0] sm:$0xff]  ;;  %12019 = vst [vmem:[#allocation17_spill] sm:$0xff] %v9579_v21 }
 0x4b3   : > { %v3291_v28 = vpop.permute.xlu1 %3290  ;;  %3108 = vst.msk [vmem:[#allocation5 + $0x100] sm:$0xff] %vm384_vm3, %v3060_v57  ;;  %v3890_v7 = vcombine.low %v9556_v31, %v9544_v0 }
 0x4b4   : > { %3337 = vst.msk [vmem:[#allocation5 + $0x290] sm:$0xff] %vm384_vm3, %v3291_v28  ;;  %3424 = vrot.lane.b32.xlu0 %v9059_v19, %s7491_s9 }
 0x4b5   : > { %3422 = vrot.lane.b32.xlu1 %v9039_v49, %s7491_s9  ;;  %v9582_v13 = vrot.slane %v3890_v7, %v7784_v61  ;;  %v12023_v7 = vld [vmem:[#allocation15_spill] sm:$0xff] }
 0x4b6   : > { %v3064_v22 = vpop.permute.xlu0 %3063  ;;  %v9566_v63 = vld [vmem:[#allocation5 + $0xf0] sm:$0xff] }
 0x4b7   : > { %v3299_v54 = vpop.permute.xlu1 %3298  ;;  %3110 = vst.msk [vmem:[#allocation5 + $0x110] sm:$0xff] %vm384_vm3, %v3064_v22  ;;  %v3906_v29 = vcombine.low %v9564_v15, %v9566_v63  ;;  %12020 = vst [vmem:[#allocation14_spill] sm:$0xff] %v9582_v13  ;;  %v9590_v22 = vrot.slane %v3858_v14, %v7784_v61 }
 0x4b8   : > { %3341 = vst.msk [vmem:[#allocation5 + $0x2b0] sm:$0xff] %vm384_vm3, %v3299_v54  ;;  %3432 = vrot.lane.b32.xlu0 %v12017_v53, %s7491_s9 }
 0x4b9   : > { %3430 = vrot.lane.b32.xlu1 %v12018_v32, %s7491_s9  ;;  %v9585_v16 = vrot.slane %v3906_v29, %v7784_v61  ;;  %12021 = vst [vmem:[#allocation73_spill] sm:$0xff] %v9590_v22  ;;  %v3922_v29 = vcombine.low %v9590_v22, %v9579_v21 }
 0x4ba   : > { %v3068_v57 = vpop.permute.xlu0 %3067 }
 0x4bb   : > { %v3307_v28 = vpop.permute.xlu1 %3306  ;;  %3112 = vst.msk [vmem:[#allocation5 + $0x120] sm:$0xff] %vm384_vm3, %v3068_v57  ;;  %v3954_v54 = vcombine.low %v9582_v13, %v9585_v16  ;;  %v12025_v57 = vld [vmem:[#allocation9_spill] sm:$0xff]  ;;  %v9694_v13 = vld [vmem:[#allocation5 + $0x100] sm:$0xff] }
 0x4bc   : > { %3345 = vst.msk [vmem:[#allocation5 + $0x2d0] sm:$0xff] %vm384_vm3, %v3307_v28  ;;  %3440 = vrot.lane.b32.xlu0 %v12022_v62, %s7491_s9  ;;  %v9610_v28 = vrot.slane %v3922_v29, %v7809_v11 }
 0x4bd   : > { %3438 = vrot.lane.b32.xlu1 %v12023_v7, %s7491_s9  ;;  %v9603_v14 = vrot.slane %v3954_v54, %v7809_v11  ;;  %v12029_v54 = vld [vmem:[#allocation28_spill] sm:$0xff] }
 0x4be   : > { %v3072_v55 = vpop.permute.xlu0 %3071  ;;  %12026 = vst [vmem:[#allocation15_spill] sm:$0xff] %v9610_v28 }
 0x4bf   : > { %v3315_v8 = vpop.permute.xlu1 %3314  ;;  %3114 = vst.msk [vmem:[#allocation5 + $0x130] sm:$0xff] %vm384_vm3, %v3072_v55  ;;  %12024 = vst [vmem:[#allocation31_spill] sm:$0xff] %v9603_v14 }
 0x4c0   : > { %3349 = vst.msk [vmem:[#allocation5 + $0x2f0] sm:$0xff] %vm384_vm3, %v3315_v8  ;;  %3515 = vrot.lane.b32.xlu0 %v9011_v46, %s7492_s10  ;;  %v12027_v46 = vld [vmem:[#allocation12_spill] sm:$0xff] }
 0x4c1   : > { %3446 = vrot.lane.b32.xlu1 %v12025_v57, %s7491_s9  ;;  %v12028_v8 = vld [vmem:[#allocation44_spill] sm:$0xff] }
 0x4c2   : > { %v3076_v41 = vpop.permute.xlu0 %3075  ;;  %v3739_v25 = vcombine.high %v12029_v54, %v12028_v8  ;;  %v12036_v8 = vld [vmem:[#allocation46_spill] sm:$0xff]  ;;  %12059 = vst [vmem:[#allocation44_spill] sm:$0xff] %v9694_v13 }
 0x4c3   : > { %v2965_v20 = vpop.permute.xlu1 %2964  ;;  %3116 = vst.msk [vmem:[#allocation5 + $0x140] sm:$0xff] %vm384_vm3, %v3076_v41  ;;  %v12033_v41 = vld [vmem:[#allocation61_spill] sm:$0xff]  ;;  %v4131_v54 = vcombine.high %v12036_v8, %v12035_v1  ;;  %v12044_v8 = vld [vmem:[#allocation60_spill] sm:$0xff] }
 0x4c4   : > { %3012 = vst.msk [vmem:[#allocation5 + $0x88] sm:$0xff] %vm384_vm3, %v2965_v20  ;;  %3523 = vrot.lane.b32.xlu0 %v9069_v30, %s7492_s10  ;;  %v12032_v20 = vld [vmem:[#allocation32_spill] sm:$0xff]  ;;  %v12034_v30 = vld [vmem:[#allocation13_spill] sm:$0xff]  ;;  %v3753_v10 = vrot.slane %v3739_v25, %v7784_v61  ;;  %v12043_v25 = vld [vmem:[#allocation43_spill] sm:$0xff] }
 0x4c5   : > { %3420 = vrot.lane.b32.xlu1 %v12027_v46, %s7491_s9  ;;  %v3723_v55 = vcombine.high %v12033_v41, %v12032_v20  ;;  %v12040_v20 = vld [vmem:[#allocation37_spill] sm:$0xff]  ;;  %v3755_v14 = vcombine.high %v12044_v8, %v12043_v25 }
 0x4c6   : > { %v3080_v29 = vpop.permute.xlu0 %3079  ;;  %v4179_v41 = vcombine.high %v12040_v20, %v12039_v50  ;;  %v4145_v50 = vrot.slane %v4131_v54, %v7784_v61  ;;  %v9657_v25 = vld [vmem:[#allocation5 + $0x130] sm:$0xff]  ;;  %v12048_v8 = vld [vmem:[#allocation45_spill] sm:$0xff] }
 0x4c7   : > { %v2969_v5 = vpop.permute.xlu1 %2968  ;;  %3118 = vst.msk [vmem:[#allocation5 + $0x150] sm:$0xff] %vm384_vm3, %v3080_v29  ;;  %v3737_v1 = vrot.slane %v3723_v55, %v7784_v61 }
 0x4c8   : > { %3014 = vst.msk [vmem:[#allocation5 + $0x98] sm:$0xff] %vm384_vm3, %v2969_v5  ;;  %3531 = vrot.lane.b32.xlu0 %v9117_v60, %s7492_s10  ;;  %v4161_v5 = vrot.slane %v4147_v52, %v7784_v61  ;;  %v12041_v60 = vld [vmem:[#allocation36_spill] sm:$0xff] }
 0x4c9   : > { %3428 = vrot.lane.b32.xlu1 %v12034_v30, %s7491_s9  ;;  %v4195_v28 = vcombine.high %v12042_v59, %v12041_v60  ;;  %v12045_v52 = vld [vmem:[#allocation16_spill] sm:$0xff]  ;;  %v3785_v59 = vrot.slane %v3771_v39, %v7784_v61  ;;  %v3802_v55 = vcombine.low %v3737_v1, %v3753_v10  ;;  %v3803_v21 = vcombine.high %v3737_v1, %v3753_v10  ;;  %v12052_v10 = vld [vmem:[#allocation33_spill] sm:$0xff]  ;;  %v9678_v1 = vld [vmem:[#allocation5 + $0x120] sm:$0xff] }
 0x4ca   : > { %v3084_v29 = vpop.permute.xlu0 %3083  ;;  %v4210_v54 = vcombine.low %v4145_v50, %v4161_v5  ;;  %v4211_v39 = vcombine.high %v4145_v50, %v4161_v5  ;;  %12054 = vst [vmem:[#allocation12_spill] sm:$0xff] %v9678_v1  ;;  %v12056_v5 = vld [vmem:[#allocation27_spill] sm:$0xff] }
 0x4cb   : > { %v2973_v44 = vpop.permute.xlu1 %2972  ;;  %3120 = vst.msk [vmem:[#allocation5 + $0x160] sm:$0xff] %vm384_vm3, %v3084_v29  ;;  %v4163_v29 = vcombine.high %v12047_v42, %v12046_v26  ;;  %v12050_v26 = vld [vmem:[#allocation42_spill] sm:$0xff] }
 0x4cc   : > { %3016 = vst.msk [vmem:[#allocation5 + $0xa8] sm:$0xff] %vm384_vm3, %v2973_v44  ;;  %3539 = vrot.lane.b32.xlu0 %v9159_v18, %s7492_s10  ;;  %v3787_v44 = vcombine.high %v9287_v33, %v9267_v2  ;;  %v12049_v18 = vld [vmem:[#allocation35_spill] sm:$0xff]  ;;  %v9667_v2 = vrot.slane %v4195_v28, %v7809_v11  ;;  %v3769_v33 = vrot.slane %v3755_v14, %v7784_v61  ;;  %v12051_v42 = vld [vmem:[#allocation30_spill] sm:$0xff]  ;;  %v12055_v14 = vld [vmem:[#allocation24_spill] sm:$0xff] }
 0x4cd   : > { %3436 = vrot.lane.b32.xlu1 %v12045_v52, %s7491_s9  ;;  %v4227_v22 = vcombine.high %v12049_v18, %v12048_v8  ;;  %v9662_v52 = vrot.slane %v4179_v41, %v7784_v61  ;;  %v4947_v48 = vcombine.high %v12051_v42, %v12050_v26  ;;  %v9676_v41 = vld [vmem:[#allocation5 + $0x110] sm:$0xff]  ;;  %v3819_v28 = vcombine.high %v9333_v40, %v9343_v34  ;;  %v12057_v18 = vld [vmem:[#allocation39_spill] sm:$0xff]  ;;  %v12058_v26 = vld [vmem:[#allocation38_spill] sm:$0xff] }
 0x4ce   : > { %v3088_v20 = vpop.permute.xlu0 %3087  ;;  %12053 = vst [vmem:[#allocation9_spill] sm:$0xff] %v9676_v41  ;;  %v5355_v50 = vcombine.high %v12056_v5, %v12055_v14  ;;  %v3834_v8 = vcombine.low %v3769_v33, %v3785_v59  ;;  %v4963_v42 = vcombine.high %v12058_v26, %v12057_v18  ;;  %v3835_v14 = vcombine.high %v3769_v33, %v3785_v59  ;;  %v9723_v59 = vld [vmem:[#allocation5 + $0x140] sm:$0xff]  ;;  %v9743_v26 = vld [vmem:[#allocation5 + $0x150] sm:$0xff] }
 0x4cf   : > { %v2977_v60 = vpop.permute.xlu1 %2976  ;;  %3122 = vst.msk [vmem:[#allocation5 + $0x170] sm:$0xff] %vm384_vm3, %v3088_v20  ;;  %v9683_v20 = vrot.slane %v4163_v29, %v7784_v61  ;;  %v9699_v34 = vrot.slane %v4227_v22, %v7809_v11  ;;  %v9702_v29 = vrot.slane %v3802_v55, %v7809_v11  ;;  %v3994_v5 = vcombine.low %v9694_v13, %v9678_v1  ;;  %v12064_v13 = vld [vmem:[#allocation29_spill] sm:$0xff] }
 0x4d0   : > { %3018 = vst.msk [vmem:[#allocation5 + $0xb8] sm:$0xff] %vm384_vm3, %v2977_v60  ;;  %3513 = vrot.lane.b32.xlu0 %v9001_v45, %s7492_s10  ;;  %v4010_v60 = vcombine.low %v9676_v41, %v9657_v25  ;;  %v9690_v45 = vrot.slane %v3787_v44, %v7809_v11  ;;  %v9711_v18 = vrot.slane %v3803_v21, %v7809_v11  ;;  %12062 = vst [vmem:[#allocation57_spill] sm:$0xff] %v9723_v59 }
 0x4d1   : > { %3444 = vrot.lane.b32.xlu1 %v12052_v10, %s7491_s9  ;;  %v4242_v44 = vcombine.low %v9683_v20, %v9662_v52  ;;  %v9714_v22 = vrot.slane %v4210_v54, %v7809_v11  ;;  %v9717_v55 = vrot.slane %v4211_v39, %v7809_v11  ;;  %v9729_v21 = vrot.slane %v4947_v48, %v7784_v61 }
 0x4d2   : > { %v3190_v10 = vpop.permute.xlu0 %3189  ;;  %v9696_v40 = vld [vmem:[#allocation5 + $0x160] sm:$0xff]  ;;  %v9732_v54 = vrot.slane %v5355_v50, %v7784_v61  ;;  %v4018_v33 = vrot.slane %v4010_v60, %v7784_v61  ;;  %12063 = vst [vmem:[#allocation32_spill] sm:$0xff] %v9743_v26  ;;  %v12065_v50 = vld [vmem:[#allocation68_spill] sm:$0xff]  ;;  %v12068_v60 = vld [vmem:[#allocation67_spill] sm:$0xff] }
 0x4d3   : > { %v2981_v51 = vpop.permute.xlu1 %2980  ;;  %12060 = vst [vmem:[#allocation28_spill] sm:$0xff] %v9696_v40  ;;  %3238 = vst.msk [vmem:[#allocation5 + $0x200] sm:$0xff] %vm384_vm3, %v3190_v10  ;;  %v4026_v39 = vcombine.low %v9723_v59, %v9696_v40  ;;  %v4259_v1 = vcombine.high %v12065_v50, %v12064_v13  ;;  %v9752_v59 = vrot.slane %v3835_v14, %v7809_v11  ;;  %v12067_v50 = vld [vmem:[#allocation26_spill] sm:$0xff] }
 0x4d4   : > { %3020 = vst.msk [vmem:[#allocation5 + $0xc8] sm:$0xff] %vm384_vm3, %v2981_v51  ;;  %12061 = vst [vmem:[#allocation34_spill] sm:$0xff] %v9717_v55  ;;  %3521 = vrot.lane.b32.xlu0 %v9059_v19, %s7492_s10  ;;  %v9726_v51 = vrot.slane %v3819_v28, %v7809_v11  ;;  %v9738_v19 = vrot.slane %v3834_v8, %v7809_v11  ;;  %v9755_v8 = vrot.slane %v4242_v44, %v7809_v11 }
 0x4d5   : > { %3519 = vrot.lane.b32.xlu1 %v9039_v49, %s7492_s10  ;;  %v9741_v49 = vrot.slane %v4963_v42, %v7784_v61  ;;  %v4002_v42 = vrot.slane %v3994_v5, %v7784_v61  ;;  %v4995_v41 = vcombine.high %v12068_v60, %v12067_v50  ;;  %v12069_v5 = vld [vmem:[#allocation63_spill] sm:$0xff] }
 0x4d6   : > { %v3194_v10 = vpop.permute.xlu0 %3193  ;;  %v9745_v48 = vld [vmem:[#allocation5 + $0x170] sm:$0xff]  ;;  %12066 = vst [vmem:[#allocation61_spill] sm:$0xff] %v9755_v8  ;;  %v12104_v56 = vcombine.low %v9690_v45, %v9726_v51 }
 0x4d7   : > { %v2985_v28 = vpop.permute.xlu1 %2984  ;;  %3240 = vst.msk [vmem:[#allocation5 + $0x210] sm:$0xff] %vm384_vm3, %v3194_v10  ;;  %v4042_v40 = vcombine.low %v9743_v26, %v9745_v48  ;;  %v4979_v10 = vcombine.high %v12069_v5, %v9310_v58  ;;  %v4058_v50 = vcombine.low %v4002_v42, %v4018_v33  ;;  %v4243_v58 = vcombine.high %v9683_v20, %v9662_v52  ;;  %v12070_v20 = vld [vmem:[#allocation25_spill] sm:$0xff] }
 0x4d8   : > { %3022 = vst.msk [vmem:[#allocation5 + $0xd8] sm:$0xff] %vm384_vm3, %v2985_v28  ;;  %3529 = vrot.lane.b32.xlu0 %v12017_v53, %s7492_s10  ;;  %v4034_v28 = vrot.slane %v4026_v39, %v7784_v61  ;;  %v4059_v39 = vcombine.high %v4002_v42, %v4018_v33  ;;  %v9791_v53 = vrot.slane %v4995_v41, %v7784_v61  ;;  %v12074_v33 = vld [vmem:[#allocation23_spill] sm:$0xff] }
 0x4d9   : > { %3527 = vrot.lane.b32.xlu1 %v12018_v32, %s7492_s10  ;;  %v4050_v13 = vrot.slane %v4042_v40, %v7784_v61  ;;  %v9800_v52 = vrot.slane %v4979_v10, %v7784_v61  ;;  %v5011_v10 = vcombine.high %v9338_v47, %v9350_v37  ;;  %v9829_v47 = vrot.slane %v4243_v58, %v7809_v11 }
 0x4da   : > { %v3198_v60 = vpop.permute.xlu0 %3197 }
 0x4db   : > { %v2989_v26 = vpop.permute.xlu1 %2988  ;;  %3242 = vst.msk [vmem:[#allocation5 + $0x220] sm:$0xff] %vm384_vm3, %v3198_v60  ;;  %v4090_v40 = vcombine.low %v4034_v28, %v4050_v13  ;;  %v4091_v5 = vcombine.high %v4034_v28, %v4050_v13  ;;  %v9805_v13 = vrot.slane %v4058_v50, %v7809_v11  ;;  %v5026_v50 = vcombine.low %v9729_v21, %v9741_v49 }
 0x4dc   : > { %3024 = vst.msk [vmem:[#allocation5 + $0xe8] sm:$0xff] %vm384_vm3, %v2989_v26  ;;  %3537 = vrot.lane.b32.xlu0 %v12022_v62, %s7492_s10  ;;  %v12071_v26 = vld [vmem:[#allocation56_spill] sm:$0xff]  ;;  %12078 = vst [vmem:[#allocation46_spill] sm:$0xff] %v9829_v47  ;;  %v9851_v37 = vrot.slane %v5011_v10, %v7809_v11 }
 0x4dd   : > { %3535 = vrot.lane.b32.xlu1 %v12023_v7, %s7492_s10  ;;  %v5403_v60 = vcombine.high %v12071_v26, %v12070_v20  ;;  %12072 = vst [vmem:[#allocation13_spill] sm:$0xff] %v9805_v13  ;;  %v9808_v41 = vrot.slane %v4090_v40, %v7809_v11  ;;  %v9811_v62 = vrot.slane %v4091_v5, %v7809_v11  ;;  %v12075_v7 = vld [vmem:[#allocation22_spill] sm:$0xff]  ;;  %v12076_v26 = vld [vmem:[#allocation55_spill] sm:$0xff]  ;;  %v12077_v40 = vld [vmem:[#allocation64_spill] sm:$0xff] }
 0x4de   : > { %v5371_v42 = vcombine.high %v12075_v7, %v12074_v33  ;;  %v3206_v28 = vpop.permute.xlu0 %3205  ;;  %v5043_v20 = vcombine.high %v9371_v38, %v9356_v4  ;;  %v5387_v14 = vcombine.high %v12077_v40, %v12076_v26  ;;  %v4073_v33 = vrot.slane %v4059_v39, %v7809_v11  ;;  %12079 = vst [vmem:[#allocation58_spill] sm:$0xff] %v9851_v37 }
 0x4df   : > { %12073 = vst [vmem:[#allocation59_spill] sm:$0xff] %v9808_v41  ;;  %v2993_v44 = vpop.permute.xlu1 %2992  ;;  %3246 = vst.msk [vmem:[#allocation5 + $0x240] sm:$0xff] %vm384_vm3, %v3206_v28  ;;  %v4123_v5 = vcombine.high %v9805_v13, %v9808_v41  ;;  %v5058_v4 = vcombine.low %v9800_v52, %v9791_v53  ;;  %v5419_v38 = vcombine.high %v9394_v23, %v9353_v6  ;;  %v12100_v23 = vld [vmem:[#allocation15_spill] sm:$0xff] }
 0x4e0   : > { %3026 = vst.msk [vmem:[#allocation5 + $0xf8] sm:$0xff] %vm384_vm3, %v2993_v44  ;;  %v5451_v44 = vcombine.high %v9374_v35, %v9359_v24  ;;  %v9842_v39 = vrot.slane %v5403_v60, %v7784_v61  ;;  %v4124_v7 = vcombine.low %v4073_v33, %v9811_v62  ;;  %v9854_v6 = vrot.slane %v5043_v20, %v7809_v11 }
 0x4e1   : > { %3543 = vrot.lane.b32.xlu1 %v12025_v57, %s7492_s10  ;;  %v7205_v58 = vpack.i.bf16 %v4259_v1, %v4123_v5  ;;  %v9848_v57 = vrot.slane %v5371_v42, %v7784_v61  ;;  %v9857_v24 = vrot.slane %v5387_v14, %v7784_v61  ;;  %v5027_v35 = vcombine.high %v9729_v21, %v9741_v49 }
 0x4e2   : > { %v3214_v26 = vpop.permute.xlu0 %3213  ;;  %12080 = vst [vmem:[#allocation54_spill] sm:$0xff] %v9854_v6  ;;  %v9869_v60 = vrot.slane %v5026_v50, %v7809_v11  ;;  %v9872_v14 = vrot.slane %v5058_v4, %v7809_v11  ;;  %v9877_v21 = vrot.slane %v5419_v38, %v7809_v11  ;;  %v9880_v49 = vrot.slane %v5451_v44, %v7809_v11 }
 0x4e3   : > { %v3062_v40 = vpop.permute.xlu1 %3061  ;;  %3250 = vst.msk [vmem:[#allocation5 + $0x260] sm:$0xff] %vm384_vm3, %v3214_v26  ;;  %7206 = vrot.lane.b32.xlu0 %v7205_v58, %s7498_s14  ;;  %v5466_v42 = vcombine.low %v9857_v24, %v9842_v39  ;;  %v12085_v20 = vcombine.low %v9667_v2, %v9699_v34  ;;  %v4125_v5 = vcombine.high %v4073_v33, %v9811_v62  ;;  %v9993_v33 = vld [vmem:[#allocation5 + $0xd8] sm:$0xff] }
 0x4e4   : > { %3109 = vst.msk [vmem:[#allocation5 + $0x108] sm:$0xff] %vm384_vm3, %v3062_v40  ;;  %12081 = vst [vmem:[#allocation11_spill] sm:$0xff] %v9869_v60  ;;  %v5434_v4 = vcombine.low %v9732_v54, %v9848_v57  ;;  %v9899_v40 = vrot.slane %v5027_v35, %v7809_v11  ;;  %v5059_v62 = vcombine.high %v9800_v52, %v9791_v53  ;;  %v12089_v35 = vld [vmem:[#allocation14_spill] sm:$0xff]  ;;  %v12101_v58 = vld [vmem:[#allocation33_spill] sm:$0xff] }
 0x4e5   : > { %12082 = vst [vmem:[#allocation37_spill] sm:$0xff] %v9872_v14  ;;  %3517 = vrot.lane.b32.xlu1 %v12027_v46, %s7492_s10  ;;  %12083 = vst [vmem:[#allocation36_spill] sm:$0xff] %v9877_v21  ;;  %v7215_v50 = vpack.i.bf16 %v12085_v20, %v4124_v7  ;;  %v3907_v46 = vcombine.high %v9564_v15, %v9566_v63  ;;  %v3875_v15 = vcombine.high %v9552_v17, %v9542_v43 }
 0x4e6   : > { %12084 = vst [vmem:[#allocation69_spill] sm:$0xff] %v9880_v49  ;;  %v3287_v38 = vpop.permute.xlu0 %3286  ;;  %12086 = vst [vmem:[#allocation43_spill] sm:$0xff] %v9899_v40  ;;  %v3891_v63 = vcombine.high %v9556_v31, %v9544_v0  ;;  %v9919_v52 = vrot.slane %v5466_v42, %v7809_v11  ;;  %v5435_v43 = vcombine.high %v9732_v54, %v9848_v57  ;;  %v9937_v54 = vld [vmem:[#allocation5 + $0x270] sm:$0xff]  ;;  %v12094_v57 = vld [vmem:[#allocation17_spill] sm:$0xff] }
 0x4e7   : > { %v3066_v44 = vpop.permute.xlu1 %3065  ;;  %3335 = vst.msk [vmem:[#allocation5 + $0x280] sm:$0xff] %vm384_vm3, %v3287_v38  ;;  %7216 = vrot.lane.b32.xlu0 %v7215_v50, %s7495_s11  ;;  %v5467_v0 = vcombine.high %v9857_v24, %v9842_v39  ;;  %v12088_v17 = vcombine.high %v9667_v2, %v9699_v34  ;;  %v3955_v20 = vcombine.high %v12089_v35, %v9585_v16  ;;  %v12091_v50 = vld [vmem:[#allocation72_spill] sm:$0xff]  ;;  %v12095_v24 = vld [vmem:[#allocation73_spill] sm:$0xff]  ;;  %v9958_v35 = vld [vmem:[#allocation5 + $0x220] sm:$0xff] }
 0x4e8   : > { %3111 = vst.msk [vmem:[#allocation5 + $0x118] sm:$0xff] %vm384_vm3, %v3066_v44  ;;  %12087 = vst [vmem:[#allocation60_spill] sm:$0xff] %v9919_v52  ;;  %v9933_v44 = vrot.slane %v3907_v46, %v7784_v61  ;;  %v9944_v16 = vrot.slane %v5434_v4, %v7809_v11  ;;  %v9947_v34 = vrot.slane %v5059_v62, %v7809_v11  ;;  %v9960_v4 = vld [vmem:[#allocation5 + $0x240] sm:$0xff]  ;;  %v9962_v62 = vld [vmem:[#allocation5 + $0xf8] sm:$0xff] }
 0x4e9   : > { %3525 = vrot.lane.b32.xlu1 %v12034_v30, %s7492_s10  ;;  %v7225_v31 = vpack.i.bf16 %v12088_v17, %v4125_v5  ;;  %v12090_v30 = vld [vmem:[#allocation66_spill] sm:$0xff]  ;;  %v3923_v5 = vcombine.high %v12095_v24, %v12094_v57  ;;  %v9955_v46 = vrot.slane %v3875_v15, %v7784_v61  ;;  %v3905_v17 = vrot.slane %v3891_v63, %v7784_v61  ;;  %v9974_v63 = vld [vmem:[#allocation5 + $0xb8] sm:$0xff]  ;;  %v9989_v39 = vld [vmem:[#allocation5 + $0x210] sm:$0xff] }
 0x4ea   : > { %v3859_v38 = vcombine.high %v12091_v50, %v12090_v30  ;;  %v3295_v42 = vpop.permute.xlu0 %3294  ;;  %v9935_v53 = vld [vmem:[#allocation5 + $0x260] sm:$0xff]  ;;  %12092 = vst [vmem:[#allocation62_spill] sm:$0xff] %v9944_v16  ;;  %12093 = vst [vmem:[#allocation47_spill] sm:$0xff] %v9947_v34  ;;  %v9970_v50 = vld [vmem:[#allocation5 + $0x250] sm:$0xff]  ;;  %v9979_v57 = vrot.slane %v5435_v43, %v7809_v11  ;;  %v9982_v24 = vrot.slane %v5467_v0, %v7809_v11 }
 0x4eb   : > { %v3070_v10 = vpop.permute.xlu1 %3069  ;;  %3339 = vst.msk [vmem:[#allocation5 + $0x2a0] sm:$0xff] %vm384_vm3, %v3295_v42  ;;  %7226 = vrot.lane.b32.xlu0 %v7225_v31, %s7499_s15  ;;  %v9968_v31 = vld [vmem:[#allocation5 + $0x200] sm:$0xff]  ;;  %v4298_v15 = vcombine.low %v9960_v4, %v9935_v53  ;;  %v3970_v2 = vcombine.low %v3905_v17, %v9933_v44  ;;  %v4314_v7 = vcombine.low %v9970_v50, %v9937_v54  ;;  %v9995_v42 = vld [vmem:[#allocation5 + $0xe8] sm:$0xff]  ;;  %v10089_v34 = vld [vmem:[#allocation5 + $0x290] sm:$0xff] }
 0x4ec   : > { %3113 = vst.msk [vmem:[#allocation5 + $0x128] sm:$0xff] %vm384_vm3, %v3070_v10  ;;  %v12096_v10 = vld [vmem:[#allocation16_spill] sm:$0xff]  ;;  %12097 = vst [vmem:[#allocation45_spill] sm:$0xff] %v9979_v57  ;;  %v3873_v30 = vrot.slane %v3859_v38, %v7784_v61  ;;  %v12099_v0 = vld [vmem:[#allocation31_spill] sm:$0xff]  ;;  %v4266_v38 = vcombine.low %v9968_v31, %v9958_v35  ;;  %v5130_v28 = vcombine.low %v9993_v33, %v9962_v62 }
 0x4ed   : > { %3533 = vrot.lane.b32.xlu1 %v12096_v10, %s7492_s10  ;;  %12098 = vst [vmem:[#allocation35_spill] sm:$0xff] %v9982_v24  ;;  %v9985_v10 = vrot.slane %v3955_v20, %v7809_v11  ;;  %v3987_v26 = vcombine.high %v12100_v23, %v12099_v0  ;;  %v9999_v20 = vld [vmem:[#allocation5 + $0x230] sm:$0xff]  ;;  %v3937_v32 = vrot.slane %v3923_v5, %v7809_v11  ;;  %v10013_v23 = vld [vmem:[#allocation5 + $0x98] sm:$0xff]  ;;  %v10015_v57 = vld [vmem:[#allocation5 + $0xa8] sm:$0xff] }
 0x4ee   : > { %v3303_v43 = vpop.permute.xlu0 %3302  ;;  %v3938_v41 = vcombine.low %v3873_v30, %v9955_v46  ;;  %v3939_v13 = vcombine.high %v3873_v30, %v9955_v46  ;;  %v3971_v0 = vcombine.high %v3905_v17, %v9933_v44  ;;  %v10017_v24 = vld [vmem:[#allocation5 + $0xc8] sm:$0xff]  ;;  %v10024_v5 = vrot.slane %v4298_v15, %v7784_v61 }
 0x4ef   : > { %v3074_v1 = vpop.permute.xlu1 %3073  ;;  %3343 = vst.msk [vmem:[#allocation5 + $0x2c0] sm:$0xff] %vm384_vm3, %v3303_v43  ;;  %v5098_v46 = vcombine.low %v10013_v23, %v9974_v63  ;;  %v5114_v44 = vcombine.low %v10017_v24, %v9995_v42  ;;  %v3988_v17 = vcombine.low %v3937_v32, %v9985_v10  ;;  %v10032_v30 = vrot.slane %v3970_v2, %v7809_v11 }
 0x4f0   : > { %3115 = vst.msk [vmem:[#allocation5 + $0x138] sm:$0xff] %vm384_vm3, %v3074_v1  ;;  %v4282_v1 = vcombine.low %v9989_v39, %v9999_v20  ;;  %v10035_v43 = vrot.slane %v4314_v7, %v7784_v61  ;;  %v4315_v15 = vcombine.high %v9970_v50, %v9937_v54  ;;  %v7185_v12 = vpack.i.bf16 %v3987_v26, %v12102_v36 }
 0x4f1   : > { %3541 = vrot.lane.b32.xlu1 %v12101_v58, %s7492_s10  ;;  %v10037_v58 = vld [vmem:[#allocation5 + $0x88] sm:$0xff]  ;;  %v10047_v60 = vrot.slane %v4266_v38, %v7784_v61  ;;  %v10052_v2 = vrot.slane %v5130_v28, %v7784_v61  ;;  %v3989_v54 = vcombine.high %v3937_v32, %v9985_v10  ;;  %v3946_v50 = vrot.slane %v3938_v41, %v7809_v11  ;;  %v10064_v38 = vld [vmem:[#allocation5 + $0x280] sm:$0xff]  ;;  %v10066_v28 = vld [vmem:[#allocation5 + $0x2b0] sm:$0xff] }
 0x4f2   : > { %v3311_v49 = vpop.permute.xlu0 %3310  ;;  %v10044_v14 = vld [vmem:[#allocation5 + $0x2a0] sm:$0xff]  ;;  %v5082_v7 = vcombine.low %v10037_v58, %v10015_v57  ;;  %v10059_v36 = vrot.slane %v3971_v0, %v7809_v11  ;;  %v4362_v32 = vcombine.low %v10024_v5, %v10035_v43  ;;  %v10074_v41 = vrot.slane %v5098_v46, %v7784_v61 }
 0x4f3   : > { %v3078_v21 = vpop.permute.xlu1 %3077  ;;  %3347 = vst.msk [vmem:[#allocation5 + $0x2e0] sm:$0xff] %vm384_vm3, %v3311_v49  ;;  %v10069_v49 = vrot.slane %v4282_v1, %v7784_v61  ;;  %v3990_v10 = vcombine.low %v3946_v50, %v10032_v30  ;;  %v3953_v0 = vrot.slane %v3939_v13, %v7809_v11  ;;  %v10084_v26 = vrot.slane %v4315_v15, %v7784_v61 }
 0x4f4   : > { %3117 = vst.msk [vmem:[#allocation5 + $0x148] sm:$0xff] %vm384_vm3, %v3078_v21  ;;  %v10077_v21 = vrot.slane %v5114_v44, %v7784_v61  ;;  %v7190_v46 = vpack.i.bf16 %v3988_v17, %v12104_v56  ;;  %v10091_v44 = vld [vmem:[#allocation5 + $0x2f0] sm:$0xff]  ;;  %v10096_v47 = vrot.slane %v5082_v7, %v7784_v61  ;;  %v12105_v56 = vcombine.high %v9690_v45, %v9726_v51 }
 0x4f5   : > { %7186 = vrot.lane.b32.xlu1 %v7185_v12, %s7498_s14  ;;  %v4402_v12 = vcombine.low %v10064_v38, %v10044_v14  ;;  %12103 = vst [vmem:[#allocation42_spill] sm:$0xff] %v10084_v26  ;;  %v4330_v40 = vcombine.low %v10047_v60, %v10069_v49  ;;  %v3991_v15 = vcombine.high %v3946_v50, %v10032_v30  ;;  %v10110_v7 = vld [vmem:[#allocation5 + $0x2d0] sm:$0xff] }
 0x4f6   : > { %v3204_v1 = vpop.permute.xlu0 %3203  ;;  %v5178_v13 = vcombine.low %v10077_v21, %v10052_v2  ;;  %v7195_v17 = vpack.i.bf16 %v3989_v54, %v12105_v56  ;;  %v4418_v55 = vcombine.low %v10089_v34, %v10066_v28  ;;  %v3992_v6 = vcombine.low %v3953_v0, %v10059_v36  ;;  %v12108_v45 = vld [vmem:[#allocation32_spill] sm:$0xff] }
 0x4f7   : > { %v3082_v9 = vpop.permute.xlu1 %3081  ;;  %3245 = vst.msk [vmem:[#allocation5 + $0x238] sm:$0xff] %vm384_vm3, %v3204_v1  ;;  %v10113_v37 = vrot.slane %v4362_v32, %v7809_v11  ;;  %v4043_v51 = vcombine.high %v12108_v45, %v9745_v48  ;;  %v5146_v30 = vcombine.low %v10096_v47, %v10074_v41  ;;  %v12109_v54 = vcombine.low %v9702_v29, %v9738_v19  ;;  %v12111_v45 = vld [vmem:[#allocation12_spill] sm:$0xff] }
 0x4f8   : > { %3119 = vst.msk [vmem:[#allocation5 + $0x158] sm:$0xff] %vm384_vm3, %v3082_v9  ;;  %v12107_v9 = vld [vmem:[#allocation9_spill] sm:$0xff]  ;;  %v4450_v56 = vcombine.low %v10110_v7, %v10091_v44  ;;  %v3993_v32 = vcombine.high %v3953_v0, %v10059_v36  ;;  %v10133_v48 = vrot.slane %v4330_v40, %v7809_v11  ;;  %v12112_v26 = vld [vmem:[#allocation44_spill] sm:$0xff]  ;;  %v10140_v3 = vrot.slane %v5178_v13, %v7809_v11 }
 0x4f9   : > { %7191 = vrot.lane.b32.xlu1 %v7190_v46, %s7495_s11  ;;  %12106 = vst [vmem:[#allocation30_spill] sm:$0xff] %v10113_v37  ;;  %v4011_v1 = vcombine.high %v12107_v9, %v9657_v25  ;;  %v7200_v50 = vpack.i.bf16 %v3990_v10, %v12109_v54  ;;  %v4410_v46 = vrot.slane %v4402_v12, %v7784_v61  ;;  %v10128_v25 = vld [vmem:[#allocation5 + $0x2c0] sm:$0xff]  ;;  %v12113_v10 = vld [vmem:[#allocation28_spill] sm:$0xff]  ;;  %v12114_v54 = vld [vmem:[#allocation57_spill] sm:$0xff] }
 0x4fa   : > { %v3212_v16 = vpop.permute.xlu0 %3211  ;;  %v10130_v9 = vld [vmem:[#allocation5 + $0x2e0] sm:$0xff]  ;;  %12110 = vst [vmem:[#allocation24_spill] sm:$0xff] %v10133_v48  ;;  %v3995_v27 = vcombine.high %v12112_v26, %v12111_v45  ;;  %v4027_v12 = vcombine.high %v12114_v54, %v12113_v10  ;;  %12115 = vst [vmem:[#allocation27_spill] sm:$0xff] %v10140_v3  ;;  %v12116_v36 = vcombine.high %v9702_v29, %v9738_v19 }
 0x4fb   : > { %v3086_v52 = vpop.permute.xlu1 %3085  ;;  %3249 = vst.msk [vmem:[#allocation5 + $0x258] sm:$0xff] %vm384_vm3, %v3212_v16  ;;  %v4426_v40 = vrot.slane %v4418_v55, %v7784_v61  ;;  %v4434_v8 = vcombine.low %v10128_v25, %v10130_v9  ;;  %v12117_v26 = vcombine.low %v9711_v18, %v9752_v59  ;;  %v4025_v16 = vrot.slane %v4011_v1, %v7784_v61 }
 0x4fc   : > { %3121 = vst.msk [vmem:[#allocation5 + $0x168] sm:$0xff] %vm384_vm3, %v3086_v52  ;;  %v7210_v0 = vpack.i.bf16 %v3991_v15, %v12116_v36  ;;  %v10158_v52 = vrot.slane %v4043_v51, %v7784_v61  ;;  %v10161_v29 = vrot.slane %v5146_v30, %v7809_v11  ;;  %v4458_v13 = vrot.slane %v4450_v56, %v7784_v61 }
 0x4fd   : > { %v10153_v45 = vpack.i.bf16 %v3992_v6, %v12117_v26  ;;  %7196 = vrot.lane.b32.xlu1 %v7195_v17, %s7499_s15  ;;  %v4442_v19 = vrot.slane %v4434_v8, %v7784_v61  ;;  %v4466_v15 = vcombine.low %v4410_v46, %v4426_v40  ;;  %v4419_v6 = vcombine.high %v10089_v34, %v10066_v28 }
 0x4fe   : > { %12118 = vst [vmem:[#allocation39_spill] sm:$0xff] %v10161_v29  ;;  %v3220_v17 = vpop.permute.xlu0 %3219  ;;  %v12119_v1 = vcombine.high %v9711_v18, %v9752_v59  ;;  %v4009_v30 = vrot.slane %v3995_v27, %v7784_v61  ;;  %v4041_v54 = vrot.slane %v4027_v12, %v7784_v61  ;;  %v4363_v34 = vcombine.high %v10024_v5, %v10035_v43 }
 0x4ff   : > { %v3090_v10 = vpop.permute.xlu1 %3089  ;;  %3253 = vst.msk [vmem:[#allocation5 + $0x278] sm:$0xff] %vm384_vm3, %v3220_v17  ;;  %v4498_v56 = vcombine.low %v4442_v19, %v4458_v13  ;;  %v4467_v28 = vcombine.high %v4410_v46, %v4426_v40  ;;  %v4499_v36 = vcombine.high %v4442_v19, %v4458_v13  ;;  %v10187_v12 = vrot.slane %v4466_v15, %v7809_v11 }
 0x500   : > { %v10172_v51 = vpack.i.bf16 %v3993_v32, %v12119_v1  ;;  %3123 = vst.msk [vmem:[#allocation5 + $0x178] sm:$0xff] %vm384_vm3, %v3090_v10  ;;  %v4074_v18 = vcombine.low %v4009_v30, %v4025_v16  ;;  %v4106_v27 = vcombine.low %v4041_v54, %v10158_v52  ;;  %v4075_v59 = vcombine.high %v4009_v30, %v4025_v16 }
 0x501   : > { %7201 = vrot.lane.b32.xlu1 %v7200_v50, %s7496_s12  ;;  %v5083_v32 = vcombine.high %v10037_v58, %v10015_v57  ;;  %12120 = vst [vmem:[#allocation38_spill] sm:$0xff] %v10187_v12  ;;  %v10190_v26 = vrot.slane %v4498_v56, %v7809_v11  ;;  %v4331_v5 = vcombine.high %v10047_v60, %v10069_v49  ;;  %v10236_v56 = vld [vmem:[#allocation5 + $0x128] sm:$0xff] }
 0x502   : > { %v10195_v43 = vrot.slane %v4499_v36, %v7809_v11  ;;  %v3293_v50 = vpop.permute.xlu0 %3292  ;;  %v4107_v40 = vcombine.high %v4041_v54, %v10158_v52  ;;  %v5099_v16 = vcombine.high %v10013_v23, %v9974_v63  ;;  %v10201_v57 = vrot.slane %v4419_v6, %v7784_v61  ;;  %v10213_v63 = vld [vmem:[#allocation5 + $0x138] sm:$0xff] }
 0x503   : > { %12121 = vst [vmem:[#allocation26_spill] sm:$0xff] %v10190_v26  ;;  %v3192_v46 = vpop.permute.xlu1 %3191  ;;  %v4451_v58 = vcombine.high %v10110_v7, %v10091_v44  ;;  %3338 = vst.msk [vmem:[#allocation5 + $0x298] sm:$0xff] %vm384_vm3, %v3293_v50  ;;  %v4395_v60 = vcombine.high %v10133_v48, %v10113_v37  ;;  %v4531_v49 = vcombine.high %v10187_v12, %v10190_v26  ;;  %v10215_v19 = vld [vmem:[#allocation5 + $0x168] sm:$0xff] }
 0x504   : > { %3239 = vst.msk [vmem:[#allocation5 + $0x208] sm:$0xff] %vm384_vm3, %v3192_v46  ;;  %v4377_v52 = vrot.slane %v4363_v34, %v7809_v11  ;;  %v4481_v23 = vrot.slane %v4467_v28, %v7809_v11  ;;  %v10219_v13 = vrot.slane %v4074_v18, %v7809_v11  ;;  %v10222_v15 = vrot.slane %v4106_v27, %v7809_v11  ;;  %v10238_v34 = vld [vmem:[#allocation5 + $0x148] sm:$0xff] }
 0x505   : > { %7211 = vrot.lane.b32.xlu1 %v7210_v0, %s7500_s16  ;;  %v10225_v6 = vrot.slane %v4075_v59, %v7809_v11  ;;  %v5131_v17 = vcombine.high %v9993_v33, %v9962_v62  ;;  %v7240_v10 = vpack.i.bf16 %v4531_v49, %v4395_v60  ;;  %v4345_v1 = vrot.slane %v4331_v5, %v7809_v11  ;;  %v10234_v0 = vld [vmem:[#allocation5 + $0x118] sm:$0xff]  ;;  %v10261_v50 = vld [vmem:[#allocation5 + $0x108] sm:$0xff] }
 0x506   : > { %v4532_v30 = vcombine.low %v4481_v23, %v10195_v43  ;;  %v10232_v54 = vrot.slane %v5083_v32, %v7784_v61  ;;  %v3301_v28 = vpop.permute.xlu0 %3300  ;;  %v5147_v18 = vcombine.high %v10096_v47, %v10074_v41  ;;  %v10243_v33 = vrot.slane %v5099_v16, %v7784_v61  ;;  %v10245_v62 = vld [vmem:[#allocation5 + $0x158] sm:$0xff] }
 0x507   : > { %v3196_v36 = vpop.permute.xlu1 %3195  ;;  %v10247_v27 = vld [vmem:[#allocation5 + $0x178] sm:$0xff]  ;;  %v5234_v59 = vcombine.low %v10234_v0, %v10213_v63  ;;  %v5250_v32 = vcombine.low %v10238_v34, %v10215_v19  ;;  %3342 = vst.msk [vmem:[#allocation5 + $0x2b8] sm:$0xff] %vm384_vm3, %v3301_v28  ;;  %7241 = vrot.lane.b32.xlu0 %v7240_v10, %s7498_s14  ;;  %v4396_v47 = vcombine.low %v4345_v1, %v4377_v52 }
 0x508   : > { %3241 = vst.msk [vmem:[#allocation5 + $0x218] sm:$0xff] %vm384_vm3, %v3196_v36  ;;  %v10257_v41 = vrot.slane %v4107_v40, %v7809_v11  ;;  %v5115_v5 = vcombine.high %v10017_v24, %v9995_v42  ;;  %v5266_v46 = vcombine.low %v10245_v62, %v10247_v27  ;;  %v4126_v16 = vcombine.low %v10219_v13, %v10222_v15  ;;  %v10425_v26 = vld [vmem:[#allocation5 + $0x278] sm:$0xff] }
 0x509   : > { %7221 = vrot.lane.b32.xlu1 %v10153_v45, %s7497_s13  ;;  %v10270_v60 = vrot.slane %v5131_v17, %v7784_v61  ;;  %v5218_v40 = vcombine.low %v10261_v50, %v10236_v56  ;;  %v7250_v24 = vpack.i.bf16 %v4532_v30, %v4396_v47  ;;  %v4533_v49 = vcombine.high %v4481_v23, %v10195_v43 }
 0x50a   : > { %v5179_v10 = vcombine.high %v10077_v21, %v10052_v2  ;;  %v10280_v45 = vrot.slane %v5266_v46, %v7784_v61  ;;  %v3309_v28 = vpop.permute.xlu0 %3308  ;;  %v4299_v17 = vcombine.high %v9960_v4, %v9935_v53  ;;  %v4435_v8 = vcombine.high %v10128_v25, %v10130_v9 }
 0x50b   : > { %v3200_v36 = vpop.permute.xlu1 %3199  ;;  %v10287_v55 = vrot.slane %v5234_v59, %v7784_v61  ;;  %v10290_v30 = vrot.slane %v5250_v32, %v7784_v61  ;;  %3346 = vst.msk [vmem:[#allocation5 + $0x2d8] sm:$0xff] %vm384_vm3, %v3309_v28  ;;  %7251 = vrot.lane.b32.xlu0 %v7250_v24, %s7495_s11  ;;  %v4397_v2 = vcombine.high %v4345_v1, %v4377_v52  ;;  %v12125_v24 = vld [vmem:[#allocation41_spill] sm:$0xff] }
 0x50c   : > { %3243 = vst.msk [vmem:[#allocation5 + $0x228] sm:$0xff] %vm384_vm3, %v3200_v36  ;;  %v4127_v21 = vcombine.high %v10219_v13, %v10222_v15  ;;  %v10298_v53 = vrot.slane %v5115_v5, %v7784_v61  ;;  %v4267_v4 = vcombine.high %v9968_v31, %v9958_v35  ;;  %v4283_v25 = vcombine.high %v9989_v39, %v9999_v20 }
 0x50d   : > { %7231 = vrot.lane.b32.xlu1 %v10172_v51, %s7501_s17  ;;  %v4403_v9 = vcombine.high %v10064_v38, %v10044_v14  ;;  %v10309_v43 = vrot.slane %v5218_v40, %v7784_v61  ;;  %v5314_v52 = vcombine.low %v10290_v30, %v10280_v45  ;;  %v7260_v23 = vpack.i.bf16 %v4533_v49, %v4397_v2  ;;  %v12122_v14 = vld [vmem:[#allocation61_spill] sm:$0xff]  ;;  %v12129_v2 = vld [vmem:[#allocation42_spill] sm:$0xff] }
 0x50e   : > { %v5211_v13 = vcombine.high %v10161_v29, %v10140_v3  ;;  %v10316_v35 = vrot.slane %v5179_v10, %v7809_v11  ;;  %v5194_v31 = vcombine.low %v10298_v53, %v10270_v60  ;;  %v3317_v39 = vpop.permute.xlu0 %3316  ;;  %v12123_v38 = vcombine.low %v9714_v22, %v12122_v14  ;;  %v12126_v49 = vld [vmem:[#allocation21_spill] sm:$0xff]  ;;  %v12137_v3 = vld [vmem:[#allocation46_spill] sm:$0xff] }
 0x50f   : > { %v3208_v20 = vpop.permute.xlu1 %3207  ;;  %v10324_v15 = vrot.slane %v4299_v17, %v7784_v61  ;;  %v10327_v1 = vrot.slane %v4435_v8, %v7784_v61  ;;  %v5282_v59 = vcombine.low %v10309_v43, %v10287_v55  ;;  %3350 = vst.msk [vmem:[#allocation5 + $0x2f8] sm:$0xff] %vm384_vm3, %v3317_v39  ;;  %7261 = vrot.lane.b32.xlu0 %v7260_v23, %s7499_s15  ;;  %v12132_v23 = vld [vmem:[#allocation62_spill] sm:$0xff] }
 0x510   : > { %v7235_v51 = vpack.i.bf16 %v12123_v38, %v4126_v16  ;;  %3247 = vst.msk [vmem:[#allocation5 + $0x248] sm:$0xff] %vm384_vm3, %v3208_v20  ;;  %v10335_v32 = vrot.slane %v5147_v18, %v7809_v11  ;;  %v5162_v47 = vcombine.low %v10232_v54, %v10243_v33  ;;  %v10340_v5 = vrot.slane %v4267_v4, %v7784_v61  ;;  %v10392_v39 = vld [vmem:[#allocation5 + $0x300] sm:$0xff] }
 0x511   : > { %v10346_v8 = vrot.slane %v4451_v58, %v7784_v61  ;;  %v4128_v46 = vcombine.low %v10225_v6, %v10257_v41  ;;  %v4129_v18 = vcombine.high %v10225_v6, %v10257_v41  ;;  %v10354_v16 = vrot.slane %v4403_v9, %v7784_v61  ;;  %v12136_v20 = vld [vmem:[#allocation34_spill] sm:$0xff] }
 0x512   : > { %7236 = vrot.lane.b32.xlu1 %v7235_v51, %s7496_s12  ;;  %v10357_v40 = vrot.slane %v5314_v52, %v7809_v11  ;;  %v12127_v10 = vcombine.high %v12125_v24, %v12126_v49  ;;  %v5212_v7 = vcombine.low %v10335_v32, %v10316_v35  ;;  %v10365_v58 = vrot.slane %v5194_v31, %v7809_v11  ;;  %v3419_v6 = vpop.permute.xlu0 %3418  ;;  %v10390_v31 = vld [vmem:[#allocation5 + $0x320] sm:$0xff]  ;;  %v10401_v51 = vld [vmem:[#allocation5 + $0x310] sm:$0xff] }
 0x513   : > { %v10368_v28 = vrot.slane %v4283_v25, %v7784_v61  ;;  %v3216_v41 = vpop.permute.xlu1 %3215  ;;  %v12128_v36 = vcombine.high %v9714_v22, %v12122_v14  ;;  %v4378_v4 = vcombine.low %v10324_v15, %v12129_v2  ;;  %v4514_v9 = vcombine.low %v10327_v1, %v10346_v8  ;;  %3466 = vst.msk [vmem:[#allocation5 + $0x388] sm:$0xff] %vm384_vm3, %v3419_v6  ;;  %v10399_v38 = vld [vmem:[#allocation5 + $0x228] sm:$0xff] }
 0x514   : > { %12124 = vst [vmem:[#allocation67_spill] sm:$0xff] %v10357_v40  ;;  %v7290_v44 = vpack.i.bf16 %v5211_v13, %v12127_v10  ;;  %v10378_v52 = vrot.slane %v5282_v59, %v7809_v11  ;;  %3251 = vst.msk [vmem:[#allocation5 + $0x268] sm:$0xff] %vm384_vm3, %v3216_v41  ;;  %v10384_v25 = vrot.slane %v5162_v47, %v7809_v11  ;;  %v10403_v59 = vld [vmem:[#allocation5 + $0x330] sm:$0xff] }
 0x515   : > { %v7245_v17 = vpack.i.bf16 %v12128_v36, %v4127_v21  ;;  %v4346_v22 = vcombine.low %v10340_v5, %v10368_v28  ;;  %v12131_v21 = vld [vmem:[#allocation60_spill] sm:$0xff]  ;;  %v4482_v14 = vcombine.low %v10354_v16, %v10201_v57  ;;  %v12133_v36 = vld [vmem:[#allocation58_spill] sm:$0xff]  ;;  %v12138_v29 = vcombine.low %v12136_v20, %v12137_v3 }
 0x516   : > { %12130 = vst [vmem:[#allocation63_spill] sm:$0xff] %v10378_v52  ;;  %7291 = vrot.lane.b32.xlu0 %v7290_v44, %s7498_s14  ;;  %v10407_v10 = vld [vmem:[#allocation5 + $0x370] sm:$0xff]  ;;  %v5213_v47 = vcombine.high %v10335_v32, %v10316_v35  ;;  %v5214_v24 = vcombine.low %v10384_v25, %v10365_v58  ;;  %v3427_v6 = vpop.permute.xlu0 %3426  ;;  %v12139_v41 = vcombine.high %v12136_v20, %v12137_v3  ;;  %v10438_v35 = vld [vmem:[#allocation5 + $0x208] sm:$0xff]  ;;  %v10440_v32 = vld [vmem:[#allocation5 + $0x218] sm:$0xff] }
 0x517   : > { %7246 = vrot.lane.b32.xlu1 %v7245_v17, %s7500_s16  ;;  %v10409_v44 = vld [vmem:[#allocation5 + $0x350] sm:$0xff]  ;;  %v12134_v17 = vld [vmem:[#allocation54_spill] sm:$0xff]  ;;  %v7255_v49 = vpack.i.bf16 %v12138_v29, %v4128_v46  ;;  %v3289_v12 = vpop.permute.xlu1 %3288  ;;  %3470 = vst.msk [vmem:[#allocation5 + $0x3a8] sm:$0xff] %vm384_vm3, %v3427_v6  ;;  %v10446_v3 = vrot.slane %v4346_v22, %v7809_v11  ;;  %v4379_v46 = vcombine.high %v10324_v15, %v12129_v2  ;;  %v10462_v20 = vld [vmem:[#allocation5 + $0x238] sm:$0xff] }
 0x518   : > { %v12135_v42 = vcombine.low %v12133_v36, %v12134_v17  ;;  %v7265_v37 = vpack.i.bf16 %v12139_v41, %v4129_v18  ;;  %3336 = vst.msk [vmem:[#allocation5 + $0x288] sm:$0xff] %vm384_vm3, %v3289_v12  ;;  %v4490_v12 = vrot.slane %v4482_v14, %v7809_v11  ;;  %v5267_v22 = vcombine.high %v10245_v62, %v10247_v27  ;;  %v12141_v41 = vld [vmem:[#allocation11_spill] sm:$0xff]  ;;  %v12142_v18 = vld [vmem:[#allocation37_spill] sm:$0xff] }
 0x519   : > { %v12140_v2 = vcombine.high %v12133_v36, %v12134_v17  ;;  %v5315_v14 = vcombine.high %v10290_v30, %v10280_v45  ;;  %v5251_v36 = vcombine.high %v10238_v34, %v10215_v19  ;;  %v5283_v45 = vcombine.high %v10309_v43, %v10287_v55 }
 0x51a   : > { %v7295_v13 = vpack.i.bf16 %v5212_v7, %v12135_v42  ;;  %v10431_v42 = vrot.slane %v4378_v4, %v7809_v11  ;;  %v10434_v7 = vrot.slane %v4514_v9, %v7809_v11  ;;  %v10452_v4 = vld [vmem:[#allocation5 + $0x258] sm:$0xff]  ;;  %v5490_v9 = vcombine.low %v10438_v35, %v10399_v38 }
 0x51b   : > { %7256 = vrot.lane.b32.xlu1 %v7255_v49, %s7497_s13  ;;  %v5538_v15 = vcombine.low %v10452_v4, %v10425_v26  ;;  %v7300_v6 = vpack.i.bf16 %v5213_v47, %v12140_v2  ;;  %v12143_v49 = vcombine.low %v12141_v41, %v12142_v18  ;;  %v3297_v62 = vpop.permute.xlu1 %3296  ;;  %v4515_v47 = vcombine.high %v10327_v1, %v10346_v8  ;;  %v10485_v17 = vld [vmem:[#allocation5 + $0x268] sm:$0xff] }
 0x51c   : > { %7296 = vrot.lane.b32.xlu0 %v7295_v13, %s7495_s11  ;;  %v5235_v13 = vcombine.high %v10234_v0, %v10213_v63  ;;  %v5506_v63 = vcombine.low %v10440_v32, %v10462_v20  ;;  %v3435_v0 = vpop.permute.xlu0 %3434  ;;  %v4398_v27 = vcombine.low %v10446_v3, %v10431_v42  ;;  %v4534_v48 = vcombine.low %v4490_v12, %v10434_v7 }
 0x51d   : > { %v7305_v29 = vpack.i.bf16 %v5214_v24, %v12143_v49  ;;  %v10483_v24 = vld [vmem:[#allocation5 + $0x248] sm:$0xff]  ;;  %3474 = vst.msk [vmem:[#allocation5 + $0x3c8] sm:$0xff] %vm384_vm3, %v3435_v0  ;;  %3340 = vst.msk [vmem:[#allocation5 + $0x2a8] sm:$0xff] %vm384_vm3, %v3297_v62  ;;  %v5219_v30 = vcombine.high %v10261_v50, %v10236_v56  ;;  %v10495_v1 = vrot.slane %v5490_v9, %v7784_v61  ;;  %v12145_v0 = vld [vmem:[#allocation18_spill] sm:$0xff] }
 0x51e   : > { %v5522_v19 = vcombine.low %v10483_v24, %v10485_v17  ;;  %v4483_v34 = vcombine.high %v10354_v16, %v10201_v57  ;;  %v10503_v8 = vrot.slane %v5235_v13, %v7784_v61  ;;  %v10506_v2 = vrot.slane %v5267_v22, %v7784_v61 }
 0x51f   : > { %7266 = vrot.lane.b32.xlu1 %v7265_v37, %s7501_s17  ;;  %v10509_v55 = vrot.slane %v5538_v15, %v7784_v61  ;;  %v5347_v56 = vcombine.high %v10378_v52, %v10357_v40  ;;  %v10514_v50 = vrot.slane %v5315_v14, %v7809_v11  ;;  %v10517_v37 = vrot.slane %v5506_v63, %v7784_v61  ;;  %v3305_v16 = vpop.permute.xlu1 %3304  ;;  %v12144_v63 = vld [vmem:[#allocation70_spill] sm:$0xff] }
 0x520   : > { %7301 = vrot.lane.b32.xlu0 %v7300_v6, %s7499_s15  ;;  %v10520_v57 = vrot.slane %v5522_v19, %v7784_v61  ;;  %v3443_v43 = vpop.permute.xlu0 %3442  ;;  %v7270_v9 = vpack.i.bf16 %v4534_v48, %v4398_v27  ;;  %v4535_v13 = vcombine.high %v4490_v12, %v10434_v7  ;;  %v10524_v22 = vrot.slane %v4515_v47, %v7809_v11 }
 0x521   : > { %v10527_v15 = vrot.slane %v5251_v36, %v7784_v61  ;;  %3478 = vst.msk [vmem:[#allocation5 + $0x3e8] sm:$0xff] %vm384_vm3, %v3443_v43  ;;  %3344 = vst.msk [vmem:[#allocation5 + $0x2c8] sm:$0xff] %vm384_vm3, %v3305_v16  ;;  %v5297_v6 = vrot.slane %v5283_v45, %v7809_v11  ;;  %v10534_v49 = vrot.slane %v4379_v46, %v7809_v11 }
 0x522   : > { %v5554_v48 = vcombine.low %v10495_v1, %v10517_v37  ;;  %v5586_v7 = vcombine.low %v10520_v57, %v10509_v55  ;;  %v4399_v12 = vcombine.high %v10446_v3, %v10431_v42  ;;  %v4497_v14 = vrot.slane %v4483_v34, %v7809_v11 }
 0x523   : > { %7271 = vrot.lane.b32.xlu1 %v7270_v9, %s7496_s12  ;;  %v5330_v46 = vcombine.low %v10527_v15, %v10506_v2  ;;  %v12146_v62 = vcombine.high %v12144_v63, %v12145_v0  ;;  %v5348_v47 = vcombine.low %v5297_v6, %v10514_v50  ;;  %v5163_v36 = vcombine.high %v10232_v54, %v10243_v33  ;;  %v3313_v3 = vpop.permute.xlu1 %3312  ;;  %v12162_v63 = vld [vmem:[#allocation43_spill] sm:$0xff] }
 0x524   : > { %7306 = vrot.lane.b32.xlu0 %v7305_v29, %s7496_s12  ;;  %v10545_v29 = vrot.slane %v5219_v30, %v7784_v61  ;;  %v10556_v45 = vrot.slane %v5586_v7, %v7809_v11  ;;  %v3417_v42 = vpop.permute.xlu0 %3416  ;;  %v7275_v19 = vpack.i.bf16 %v4535_v13, %v4399_v12  ;;  %v12147_v30 = vcombine.high %v10340_v5, %v10368_v28  ;;  %v10565_v16 = vld [vmem:[#allocation5 + $0x2a8] sm:$0xff]  ;;  %v7471_v13 = vld [vmem:[#allocation5 + $0x360] sm:$0xff] }
 0x525   : > { %v7310_v27 = vpack.i.bf16 %v12146_v62, %v5347_v56  ;;  %v4536_v43 = vcombine.low %v4497_v14, %v10524_v22  ;;  %3465 = vst.msk [vmem:[#allocation5 + $0x380] sm:$0xff] %vm384_vm3, %v3417_v42  ;;  %3348 = vst.msk [vmem:[#allocation5 + $0x2e8] sm:$0xff] %vm384_vm3, %v3313_v3  ;;  %v10571_v54 = vrot.slane %v5554_v48, %v7809_v11  ;;  %v7472_v7 = vld [vmem:[#allocation5 + $0x340] sm:$0xff]  ;;  %v12152_v3 = vld [vmem:[#allocation36_spill] sm:$0xff] }
 0x526   : > { %v4361_v34 = vrot.slane %v12147_v30, %v7809_v11  ;;  %v5298_v56 = vcombine.low %v10545_v29, %v10503_v8  ;;  %v12148_v33 = vcombine.high %v10392_v39, %v10390_v31  ;;  %v12149_v28 = vcombine.high %v10401_v51, %v10403_v59  ;;  %v10596_v51 = vld [vmem:[#allocation5 + $0x2b8] sm:$0xff] }
 0x527   : > { %v4571_v12 = vcombine.high %v7472_v7, %v7471_v13  ;;  %7276 = vrot.lane.b32.xlu1 %v7275_v19, %s7500_s16  ;;  %v10588_v62 = vrot.slane %v5330_v46, %v7809_v11  ;;  %v12150_v31 = vcombine.high %v10298_v53, %v10270_v60  ;;  %v12151_v59 = vcombine.high %v10409_v44, %v10407_v10  ;;  %v12153_v19 = vld [vmem:[#allocation69_spill] sm:$0xff]  ;;  %v3423_v13 = vpop.permute.xlu1 %3422 }
 0x528   : > { %7311 = vrot.lane.b32.xlu0 %v7310_v27, %s7498_s14  ;;  %v10577_v5 = vrot.slane %v12148_v33, %v7784_v61  ;;  %v10583_v9 = vrot.slane %v12149_v28, %v7784_v61  ;;  %v4400_v48 = vcombine.low %v4361_v34, %v10534_v49  ;;  %v10594_v27 = vld [vmem:[#allocation5 + $0x288] sm:$0xff]  ;;  %v12154_v30 = vcombine.low %v12152_v3, %v12153_v19  ;;  %v3425_v28 = vpop.permute.xlu0 %3424 }
 0x529   : > { %v5209_v39 = vrot.slane %v12150_v31, %v7809_v11  ;;  %v10602_v42 = vrot.slane %v12151_v59, %v7784_v61  ;;  %v5349_v33 = vcombine.high %v5297_v6, %v10514_v50  ;;  %v5626_v60 = vcombine.low %v10594_v27, %v10565_v16  ;;  %v10617_v59 = vld [vmem:[#allocation5 + $0x298] sm:$0xff]  ;;  %3469 = vst.msk [vmem:[#allocation5 + $0x3a0] sm:$0xff] %vm384_vm3, %v3425_v28  ;;  %v12156_v28 = vld [vmem:[#allocation35_spill] sm:$0xff] }
 0x52a   : > { %v7320_v46 = vpack.i.bf16 %v12154_v30, %v5348_v47  ;;  %v7280_v7 = vpack.i.bf16 %v4536_v43, %v4400_v48  ;;  %v4537_v31 = vcombine.high %v4497_v14, %v10524_v22  ;;  %v10614_v10 = vrot.slane %v5298_v56, %v7809_v11  ;;  %v10619_v47 = vld [vmem:[#allocation5 + $0x2f8] sm:$0xff]  ;;  %3468 = vst.msk [vmem:[#allocation5 + $0x398] sm:$0xff] %vm384_vm3, %v3423_v13 }
 0x52b   : > { %v5177_v44 = vrot.slane %v5163_v36, %v7809_v11  ;;  %v5215_v50 = vcombine.high %v10384_v25, %v10365_v58  ;;  %v5642_v22 = vcombine.low %v10617_v59, %v10596_v51  ;;  %v10629_v6 = vrot.slane %v4571_v12, %v7784_v61  ;;  %v3669_v48 = vld [vmem:[#allocation5 + $0x2d8] sm:$0xff]  ;;  %v3431_v40 = vpop.permute.xlu1 %3430 }
 0x52c   : > { %7321 = vrot.lane.b32.xlu0 %v7320_v46, %s7495_s11  ;;  %v4618_v14 = vcombine.low %v10577_v5, %v10583_v9  ;;  %7281 = vrot.lane.b32.xlu1 %v7280_v7, %s7497_s13  ;;  %v4401_v36 = vcombine.high %v4361_v34, %v10534_v49  ;;  %v5350_v43 = vcombine.low %v10614_v10, %v10588_v62  ;;  %v12157_v13 = vld [vmem:[#allocation45_spill] sm:$0xff]  ;;  %v3433_v7 = vpop.permute.xlu0 %3432  ;;  %v3667_v34 = vld [vmem:[#allocation5 + $0x2c8] sm:$0xff] }
 0x52d   : > { %v5216_v56 = vcombine.low %v5177_v44, %v5209_v39  ;;  %v5217_v30 = vcombine.high %v5177_v44, %v5209_v39  ;;  %v12155_v58 = vcombine.high %v12152_v3, %v12153_v19  ;;  %v5634_v12 = vrot.slane %v5626_v60, %v7784_v61  ;;  %v3671_v52 = vld [vmem:[#allocation5 + $0x2e8] sm:$0xff]  ;;  %3473 = vst.msk [vmem:[#allocation5 + $0x3c0] sm:$0xff] %vm384_vm3, %v3433_v7 }
 0x52e   : > { %v5674_v46 = vcombine.low %v3669_v48, %v10619_v47  ;;  %v7285_v49 = vpack.i.bf16 %v4537_v31, %v4401_v36  ;;  %v12158_v39 = vld [vmem:[#allocation19_spill] sm:$0xff]  ;;  %v4650_v3 = vcombine.low %v10629_v6, %v10602_v42  ;;  %3472 = vst.msk [vmem:[#allocation5 + $0x3b8] sm:$0xff] %vm384_vm3, %v3431_v40  ;;  %v12160_v19 = vcombine.high %v12141_v41, %v12142_v18 }
 0x52f   : > { %v7330_v25 = vpack.i.bf16 %v12155_v58, %v5349_v33  ;;  %v12159_v44 = vld [vmem:[#allocation71_spill] sm:$0xff]  ;;  %v5650_v60 = vrot.slane %v5642_v22, %v7784_v61  ;;  %v5658_v31 = vcombine.low %v3667_v34, %v3671_v52  ;;  %v10658_v36 = vrot.slane %v4618_v14, %v7809_v11 }
 0x530   : > { %v7315_v33 = vpack.i.bf16 %v5215_v50, %v12160_v19  ;;  %7286 = vrot.lane.b32.xlu1 %v7285_v49, %s7501_s17  ;;  %v12161_v58 = vcombine.low %v12132_v23, %v12131_v21  ;;  %v12163_v40 = vld [vmem:[#allocation47_spill] sm:$0xff]  ;;  %v5299_v50 = vcombine.high %v10545_v29, %v10503_v8  ;;  %v5682_v14 = vrot.slane %v5674_v46, %v7784_v61  ;;  %v3441_v53 = vpop.permute.xlu0 %3440 }
 0x531   : > { %7331 = vrot.lane.b32.xlu0 %v7330_v25, %s7499_s15  ;;  %v12164_v0 = vcombine.low %v12162_v63, %v12163_v40  ;;  %v12165_v18 = vcombine.high %v12162_v63, %v12163_v40  ;;  %v5666_v22 = vrot.slane %v5658_v31, %v7784_v61  ;;  %v5690_v49 = vcombine.low %v5634_v12, %v5650_v60  ;;  %v10745_v31 = vld [vmem:[#allocation5 + $0x3a8] sm:$0xff] }
 0x532   : > { %v7340_v7 = vpack.i.bf16 %v12161_v58, %v5350_v43  ;;  %v5659_v19 = vcombine.high %v3667_v34, %v3671_v52  ;;  %v3439_v43 = vpop.permute.xlu1 %3438  ;;  %v5587_v58 = vcombine.high %v10520_v57, %v10509_v55  ;;  %v5539_v63 = vcombine.high %v10452_v4, %v10425_v26  ;;  %3477 = vst.msk [vmem:[#allocation5 + $0x3e0] sm:$0xff] %vm384_vm3, %v3441_v53 }
 0x533   : > { %v7325_v25 = vpack.i.bf16 %v5216_v56, %v12164_v0  ;;  %v10670_v41 = vpack.i.bf16 %v5217_v30, %v12165_v18  ;;  %v5523_v0 = vcombine.high %v10483_v24, %v10485_v17  ;;  %v5675_v56 = vcombine.high %v3669_v48, %v10619_v47  ;;  %3476 = vst.msk [vmem:[#allocation5 + $0x3d8] sm:$0xff] %vm384_vm3, %v3439_v43  ;;  %v10750_v18 = vld [vmem:[#allocation5 + $0x3e8] sm:$0xff] }
 0x534   : > { %v5722_v52 = vcombine.low %v5666_v22, %v5682_v14  ;;  %v5691_v30 = vcombine.high %v5634_v12, %v5650_v60  ;;  %v5723_v46 = vcombine.high %v5666_v22, %v5682_v14  ;;  %v5627_v55 = vcombine.high %v10594_v27, %v10565_v16  ;;  %7316 = vrot.lane.b32.xlu1 %v7315_v33, %s7500_s16  ;;  %v10743_v60 = vld [vmem:[#allocation5 + $0x398] sm:$0xff] }
 0x535   : > { %7341 = vrot.lane.b32.xlu0 %v7340_v7, %s7496_s12  ;;  %v5555_v24 = vcombine.high %v10495_v1, %v10517_v37  ;;  %v5331_v26 = vcombine.high %v10527_v15, %v10506_v2  ;;  %v5491_v4 = vcombine.high %v10438_v35, %v10399_v38  ;;  %v5643_v17 = vcombine.high %v10617_v59, %v10596_v51  ;;  %v3516_v37 = vpop.permute.xlu0 %3515  ;;  %v10720_v51 = vld [vmem:[#allocation5 + $0x3b8] sm:$0xff] }
 0x536   : > { %v10698_v57 = vrot.slane %v5690_v49, %v7809_v11  ;;  %v10701_v53 = vrot.slane %v5722_v52, %v7809_v11  ;;  %v10704_v16 = vrot.slane %v5723_v46, %v7809_v11  ;;  %v10707_v1 = vrot.slane %v5659_v19, %v7784_v61  ;;  %v3447_v2 = vpop.permute.xlu1 %3446  ;;  %3563 = vst.msk [vmem:[#allocation5 + $0x408] sm:$0xff] %vm384_vm3, %v3516_v37 }
 0x537   : > { %v10710_v15 = vrot.slane %v5587_v58, %v7809_v11  ;;  %v5507_v38 = vcombine.high %v10440_v32, %v10462_v20  ;;  %v10715_v35 = vrot.slane %v5523_v0, %v7784_v61  ;;  %v10718_v27 = vrot.slane %v5675_v56, %v7784_v61  ;;  %3480 = vst.msk [vmem:[#allocation5 + $0x3f8] sm:$0xff] %vm384_vm3, %v3447_v2 }
 0x538   : > { %v5619_v59 = vcombine.high %v10571_v54, %v10556_v45  ;;  %v5755_v47 = vcombine.high %v10698_v57, %v10701_v53  ;;  %v5705_v32 = vrot.slane %v5691_v30, %v7809_v11  ;;  %v10730_v20 = vrot.slane %v5627_v55, %v7784_v61  ;;  %7326 = vrot.lane.b32.xlu1 %v7325_v25, %s7497_s13 }
 0x539   : > { %v5569_v48 = vrot.slane %v5555_v24, %v7809_v11  ;;  %v10735_v12 = vrot.slane %v5491_v4, %v7784_v61  ;;  %v10738_v34 = vrot.slane %v5539_v63, %v7784_v61  ;;  %v10741_v33 = vrot.slane %v5643_v17, %v7784_v61  ;;  %v3524_v14 = vpop.permute.xlu0 %3523  ;;  %v10764_v63 = vld [vmem:[#allocation5 + $0x388] sm:$0xff]  ;;  %v12167_v4 = vld [vmem:[#allocation10_spill] sm:$0xff] }
 0x53a   : > { %v7345_v7 = vpack.i.bf16 %v5755_v47, %v5619_v59  ;;  %v5756_v40 = vcombine.low %v5705_v32, %v10704_v16  ;;  %v5738_v25 = vcombine.low %v10707_v1, %v10718_v27  ;;  %v5914_v22 = vcombine.low %v10743_v60, %v10720_v51  ;;  %v3421_v49 = vpop.permute.xlu1 %3420  ;;  %3567 = vst.msk [vmem:[#allocation5 + $0x428] sm:$0xff] %vm384_vm3, %v3524_v14 }
 0x53b   : > { %v5351_v19 = vcombine.high %v10614_v10, %v10588_v62  ;;  %v10757_v43 = vrot.slane %v5331_v26, %v7809_v11  ;;  %v10760_v58 = vrot.slane %v5507_v38, %v7784_v61  ;;  %v5602_v0 = vcombine.low %v10715_v35, %v10738_v34  ;;  %3467 = vst.msk [vmem:[#allocation5 + $0x390] sm:$0xff] %vm384_vm3, %v3421_v49  ;;  %v10772_v10 = vld [vmem:[#allocation5 + $0x3c8] sm:$0xff]  ;;  %v12166_v26 = vld [vmem:[#allocation49_spill] sm:$0xff] }
 0x53c   : > { %7346 = vrot.lane.b32.xlu0 %v7345_v7, %s7498_s14  ;;  %v5620_v56 = vcombine.low %v5569_v48, %v10710_v15  ;;  %v5706_v62 = vcombine.low %v10730_v20, %v10741_v33  ;;  %v5898_v52 = vcombine.low %v10764_v63, %v10745_v31  ;;  %7336 = vrot.lane.b32.xlu1 %v10670_v41, %s7501_s17 }
 0x53d   : > { %v5313_v46 = vrot.slane %v5299_v50, %v7809_v11  ;;  %v5570_v55 = vcombine.low %v10735_v12, %v10760_v58  ;;  %v5930_v24 = vcombine.low %v10772_v10, %v10750_v18  ;;  %v5827_v17 = vcombine.high %v12167_v4, %v12166_v26  ;;  %v3532_v8 = vpop.permute.xlu0 %3531 }
 0x53e   : > { %v7355_v37 = vpack.i.bf16 %v5756_v40, %v5620_v56  ;;  %v5757_v2 = vcombine.high %v5705_v32, %v10704_v16  ;;  %v10792_v38 = vrot.slane %v5738_v25, %v7809_v11  ;;  %v10795_v41 = vrot.slane %v5914_v22, %v7784_v61  ;;  %v3429_v29 = vpop.permute.xlu1 %3428  ;;  %v10804_v40 = vld [vmem:[#allocation5 + $0x3d8] sm:$0xff]  ;;  %3571 = vst.msk [vmem:[#allocation5 + $0x448] sm:$0xff] %vm384_vm3, %v3532_v8 }
 0x53f   : > { %v12168_v50 = vcombine.high %v12132_v23, %v12131_v21  ;;  %v5352_v47 = vcombine.low %v5313_v46, %v10757_v43  ;;  %v10802_v7 = vrot.slane %v5602_v0, %v7809_v11  ;;  %v10806_v16 = vld [vmem:[#allocation5 + $0x3f8] sm:$0xff]  ;;  %v10812_v32 = vrot.slane %v4650_v3, %v7809_v11  ;;  %3471 = vst.msk [vmem:[#allocation5 + $0x3b0] sm:$0xff] %vm384_vm3, %v3429_v29 }
 0x540   : > { %7356 = vrot.lane.b32.xlu0 %v7355_v37, %s7495_s11  ;;  %v5621_v21 = vcombine.high %v5569_v48, %v10710_v15  ;;  %v10819_v23 = vrot.slane %v5706_v62, %v7809_v11  ;;  %v10822_v25 = vrot.slane %v5898_v52, %v7784_v61  ;;  %v5946_v22 = vcombine.low %v10804_v40, %v10806_v16  ;;  %v12169_v15 = vld [vmem:[#allocation48_spill] sm:$0xff] }
 0x541   : > { %v7350_v59 = vpack.i.bf16 %v12168_v50, %v5351_v19  ;;  %v10828_v3 = vrot.slane %v5570_v55, %v7809_v11  ;;  %v10831_v14 = vrot.slane %v5930_v24, %v7784_v61  ;;  %v10834_v49 = vrot.slane %v5827_v17, %v7809_v11  ;;  %v12170_v48 = vld [vmem:[#allocation52_spill] sm:$0xff]  ;;  %v3540_v55 = vpop.permute.xlu0 %3539 }
 0x542   : > { %v5859_v19 = vcombine.high %v12170_v48, %v12169_v15  ;;  %v7365_v0 = vpack.i.bf16 %v5757_v2, %v5621_v21  ;;  %v5758_v56 = vcombine.low %v10819_v23, %v10792_v38  ;;  %v10841_v62 = vrot.slane %v5946_v22, %v7784_v61  ;;  %v3437_v26 = vpop.permute.xlu1 %3436  ;;  %3575 = vst.msk [vmem:[#allocation5 + $0x468] sm:$0xff] %vm384_vm3, %v3540_v55 }
 0x543   : > { %7351 = vrot.lane.b32.xlu1 %v7350_v59, %s7500_s16  ;;  %v5962_v52 = vcombine.low %v10822_v25, %v10795_v41  ;;  %v12171_v24 = vcombine.low %v12157_v13, %v12156_v28  ;;  %v5353_v17 = vcombine.high %v5313_v46, %v10757_v43  ;;  %v5739_v37 = vcombine.high %v10707_v1, %v10718_v27  ;;  %v12172_v46 = vld [vmem:[#allocation53_spill] sm:$0xff]  ;;  %v12173_v1 = vld [vmem:[#allocation7_spill] sm:$0xff] }
 0x544   : > { %v4619_v2 = vcombine.high %v10577_v5, %v10583_v9  ;;  %3475 = vst.msk [vmem:[#allocation5 + $0x3d0] sm:$0xff] %vm384_vm3, %v3437_v26  ;;  %7366 = vrot.lane.b32.xlu0 %v7365_v0, %s7499_s15  ;;  %v5622_v8 = vcombine.low %v10828_v3, %v10802_v7  ;;  %v5994_v29 = vcombine.low %v10831_v14, %v10841_v62  ;;  %v7480_v59 = vld [vmem:[#allocation5 + $0x358] sm:$0xff] }
 0x545   : > { %v7360_v4 = vpack.i.bf16 %v12171_v24, %v5352_v47  ;;  %v4651_v43 = vcombine.high %v10629_v6, %v10602_v42  ;;  %v4603_v27 = vcombine.high %v12173_v1, %v12172_v46  ;;  %v5603_v5 = vcombine.high %v10715_v35, %v10738_v34  ;;  %v3514_v35 = vpop.permute.xlu0 %3513  ;;  %v7476_v46 = vld [vmem:[#allocation5 + $0x318] sm:$0xff] }
 0x546   : > { %v5707_v9 = vcombine.high %v10730_v20, %v10741_v33  ;;  %v4670_v50 = vcombine.low %v10658_v36, %v10812_v32  ;;  %v7375_v47 = vpack.i.bf16 %v5758_v56, %v5622_v8  ;;  %v10874_v42 = vrot.slane %v5962_v52, %v7809_v11  ;;  %v3445_v34 = vpop.permute.xlu1 %3444  ;;  %v3696_v0 = vld [vmem:[#allocation5 + $0x3b0] sm:$0xff]  ;;  %3562 = vst.msk [vmem:[#allocation5 + $0x400] sm:$0xff] %vm384_vm3, %v3514_v35  ;;  %v7474_v8 = vld [vmem:[#allocation5 + $0x308] sm:$0xff]  ;;  %v3698_v35 = vld [vmem:[#allocation5 + $0x3c0] sm:$0xff] }
 0x547   : > { %7361 = vrot.lane.b32.xlu1 %v7360_v4, %s7497_s13  ;;  %v10877_v6 = vrot.slane %v5994_v29, %v7809_v11  ;;  %v10880_v21 = vrot.slane %v5859_v19, %v7809_v11  ;;  %v12174_v20 = vcombine.high %v12157_v13, %v12156_v28  ;;  %v5759_v22 = vcombine.high %v10819_v23, %v10792_v38  ;;  %v3692_v13 = vld [vmem:[#allocation5 + $0x390] sm:$0xff]  ;;  %v3694_v19 = vld [vmem:[#allocation5 + $0x3a0] sm:$0xff] }
 0x548   : > { %v5571_v15 = vcombine.high %v10735_v12, %v10760_v58  ;;  %v10890_v48 = vrot.slane %v5739_v37, %v7809_v11  ;;  %3479 = vst.msk [vmem:[#allocation5 + $0x3f0] sm:$0xff] %vm384_vm3, %v3445_v34  ;;  %7376 = vrot.lane.b32.xlu0 %v7375_v47, %s7496_s12  ;;  %v10898_v38 = vrot.slane %v4619_v2, %v7809_v11  ;;  %v3690_v4 = vld [vmem:[#allocation5 + $0x380] sm:$0xff]  ;;  %v7473_v2 = vld [vmem:[#allocation5 + $0x328] sm:$0xff]  ;;  %v12176_v34 = vld [vmem:[#allocation40_spill] sm:$0xff] }
 0x549   : > { %v7370_v33 = vpack.i.bf16 %v12174_v20, %v5353_v17  ;;  %v6027_v28 = vcombine.high %v10874_v42, %v10877_v6  ;;  %v10901_v12 = vrot.slane %v4651_v43, %v7809_v11  ;;  %v10904_v58 = vrot.slane %v4603_v27, %v7809_v11  ;;  %v3702_v17 = vld [vmem:[#allocation5 + $0x3e0] sm:$0xff]  ;;  %v7475_v43 = vld [vmem:[#allocation5 + $0x338] sm:$0xff] }
 0x54a   : > { %v5623_v23 = vcombine.high %v10828_v3, %v10802_v7  ;;  %v10910_v56 = vrot.slane %v5603_v5, %v7809_v11  ;;  %v10913_v52 = vrot.slane %v5707_v9, %v7809_v11  ;;  %v4691_v55 = vcombine.high %v3692_v13, %v3696_v0  ;;  %v3522_v3 = vpop.permute.xlu0 %3521  ;;  %v3520_v1 = vpop.permute.xlu1 %3519  ;;  %v12177_v20 = vld [vmem:[#allocation65_spill] sm:$0xff] }
 0x54b   : > { %7371 = vrot.lane.b32.xlu1 %v7370_v33, %s7501_s17  ;;  %v12175_v26 = vcombine.high %v12159_v44, %v12158_v39  ;;  %v4690_v37 = vcombine.low %v3692_v13, %v3696_v0  ;;  %v5763_v29 = vcombine.high %v7474_v8, %v7473_v2  ;;  %v5779_v7 = vcombine.high %v7476_v46, %v7475_v43  ;;  %v12179_v13 = vld [vmem:[#allocation50_spill] sm:$0xff] }
 0x54c   : > { %v7385_v27 = vpack.i.bf16 %v5759_v22, %v5623_v23  ;;  %v5585_v5 = vrot.slane %v5571_v15, %v7809_v11  ;;  %v5760_v9 = vcombine.low %v10913_v52, %v10890_v48  ;;  %v4675_v47 = vcombine.high %v3690_v4, %v3694_v19  ;;  %3566 = vst.msk [vmem:[#allocation5 + $0x420] sm:$0xff] %vm384_vm3, %v3522_v3  ;;  %v7477_v23 = vld [vmem:[#allocation5 + $0x368] sm:$0xff] }
 0x54d   : > { %v7380_v24 = vpack.i.bf16 %v6027_v28, %v12175_v26  ;;  %3565 = vst.msk [vmem:[#allocation5 + $0x418] sm:$0xff] %vm384_vm3, %v3520_v1  ;;  %v4667_v33 = vcombine.high %v12177_v20, %v12176_v34  ;;  %v4674_v0 = vcombine.low %v3690_v4, %v3694_v19  ;;  %v12178_v28 = vld [vmem:[#allocation51_spill] sm:$0xff]  ;;  %v10931_v8 = vrot.slane %v4691_v55, %v7784_v61 }
 0x54e   : > { %v4635_v22 = vcombine.high %v12179_v13, %v12178_v28  ;;  %v7478_v15 = vld [vmem:[#allocation5 + $0x348] sm:$0xff]  ;;  %v5624_v2 = vcombine.low %v5585_v5, %v10910_v56  ;;  %v4707_v43 = vcombine.high %v3698_v35, %v3702_v17  ;;  %v10936_v46 = vrot.slane %v4690_v37, %v7784_v61  ;;  %v3530_v1 = vpop.permute.xlu0 %3529  ;;  %v7479_v37 = vld [vmem:[#allocation5 + $0x378] sm:$0xff] }
 0x54f   : > { %7381 = vrot.lane.b32.xlu0 %v7380_v24, %s7498_s14  ;;  %v5795_v26 = vcombine.high %v7478_v15, %v7477_v23  ;;  %7386 = vrot.lane.b32.xlu1 %v7385_v27, %s7500_s16  ;;  %v4706_v19 = vcombine.low %v3698_v35, %v3702_v17  ;;  %v10939_v4 = vrot.slane %v5763_v29, %v7784_v61  ;;  %v3528_v27 = vpop.permute.xlu1 %3527  ;;  %v3700_v15 = vld [vmem:[#allocation5 + $0x3d0] sm:$0xff] }
 0x550   : > { %v10942_v3 = vrot.slane %v5779_v7, %v7784_v61  ;;  %v7400_v23 = vpack.i.bf16 %v5760_v9, %v5624_v2  ;;  %v5761_v55 = vcombine.high %v10913_v52, %v10890_v48  ;;  %v3704_v30 = vld [vmem:[#allocation5 + $0x3f0] sm:$0xff]  ;;  %v10947_v24 = vrot.slane %v4675_v47, %v7784_v61  ;;  %3570 = vst.msk [vmem:[#allocation5 + $0x440] sm:$0xff] %vm384_vm3, %v3530_v1 }
 0x551   : > { %v5811_v17 = vcombine.high %v7480_v59, %v7479_v37  ;;  %3569 = vst.msk [vmem:[#allocation5 + $0x438] sm:$0xff] %vm384_vm3, %v3528_v27  ;;  %v5625_v29 = vcombine.high %v5585_v5, %v10910_v56  ;;  %v4723_v7 = vcombine.high %v3700_v15, %v3704_v30  ;;  %v4682_v9 = vrot.slane %v4674_v0, %v7784_v61 }
 0x552   : > { %v4722_v35 = vcombine.low %v3700_v15, %v3704_v30  ;;  %v4721_v48 = vrot.slane %v4707_v43, %v7784_v61  ;;  %v4754_v52 = vcombine.low %v10947_v24, %v10931_v8  ;;  %v5995_v59 = vcombine.high %v10831_v14, %v10841_v62  ;;  %v3538_v0 = vpop.permute.xlu0 %3537 }
 0x553   : > { %7401 = vrot.lane.b32.xlu1 %v7400_v23, %s7497_s13  ;;  %v5947_v47 = vcombine.high %v10804_v40, %v10806_v16  ;;  %v4737_v2 = vrot.slane %v4723_v7, %v7784_v61  ;;  %v4714_v56 = vrot.slane %v4706_v19, %v7784_v61  ;;  %v4738_v30 = vcombine.low %v4682_v9, %v10936_v46  ;;  %v3536_v1 = vpop.permute.xlu1 %3535 }
 0x554   : > { %v4730_v5 = vrot.slane %v4722_v35, %v7784_v61  ;;  %v7415_v43 = vpack.i.bf16 %v5761_v55, %v5625_v29  ;;  %v5963_v27 = vcombine.high %v10822_v25, %v10795_v41  ;;  %v5915_v14 = vcombine.high %v10743_v60, %v10720_v51  ;;  %3574 = vst.msk [vmem:[#allocation5 + $0x460] sm:$0xff] %vm384_vm3, %v3538_v0  ;;  %v11057_v13 = vld [vmem:[#allocation5 + $0x418] sm:$0xff] }
 0x555   : > { %v5931_v40 = vcombine.high %v10772_v10, %v10750_v18  ;;  %3573 = vst.msk [vmem:[#allocation5 + $0x458] sm:$0xff] %vm384_vm3, %v3536_v1  ;;  %v4786_v16 = vcombine.low %v4721_v48, %v4737_v2  ;;  %v10974_v19 = vrot.slane %v5795_v26, %v7784_v61  ;;  %v5899_v23 = vcombine.high %v10764_v63, %v10745_v31 }
 0x556   : > { %v4770_v62 = vcombine.low %v4714_v56, %v4730_v5  ;;  %v4762_v41 = vrot.slane %v4754_v52, %v7809_v11  ;;  %v10981_v51 = vrot.slane %v5995_v59, %v7809_v11  ;;  %v4787_v60 = vcombine.high %v4721_v48, %v4737_v2 }
 0x557   : > { %7416 = vrot.lane.b32.xlu1 %v7415_v43, %s7501_s17  ;;  %v10984_v18 = vrot.slane %v5947_v47, %v7784_v61  ;;  %v4794_v10 = vrot.slane %v4786_v16, %v7809_v11  ;;  %v10988_v25 = vrot.slane %v4738_v30, %v7809_v11  ;;  %v4771_v31 = vcombine.high %v4714_v56, %v4730_v5  ;;  %v3544_v63 = vpop.permute.xlu1 %3543  ;;  %v11032_v5 = vld [vmem:[#allocation5 + $0x468] sm:$0xff] }
 0x558   : > { %v10991_v26 = vrot.slane %v4770_v62, %v7809_v11  ;;  %v10994_v55 = vrot.slane %v5963_v27, %v7809_v11  ;;  %v10997_v15 = vrot.slane %v5811_v17, %v7784_v61  ;;  %v11000_v37 = vrot.slane %v5915_v14, %v7784_v61  ;;  %3577 = vst.msk [vmem:[#allocation5 + $0x478] sm:$0xff] %vm384_vm3, %v3544_v63  ;;  %v11061_v14 = vld [vmem:[#allocation5 + $0x448] sm:$0xff] }
 0x559   : > { %v11003_v29 = vrot.slane %v5931_v40, %v7784_v61  ;;  %v4806_v7 = vcombine.low %v4762_v41, %v4794_v10  ;;  %v4755_v48 = vcombine.high %v10947_v24, %v10931_v8  ;;  %v4739_v52 = vcombine.high %v4682_v9, %v10936_v46  ;;  %v11030_v9 = vld [vmem:[#allocation5 + $0x438] sm:$0xff]  ;;  %v11077_v63 = vld [vmem:[#allocation5 + $0x408] sm:$0xff] }
 0x55a   : > { %v4803_v35 = vcombine.high %v10988_v25, %v10991_v26  ;;  %v6028_v17 = vcombine.low %v10994_v55, %v10981_v51  ;;  %v11014_v59 = vrot.slane %v4787_v60, %v7809_v11  ;;  %v11017_v47 = vrot.slane %v5899_v23, %v7784_v61 }
 0x55b   : > { %v6011_v2 = vcombine.high %v11003_v29, %v10984_v18  ;;  %v7430_v56 = vpack.i.bf16 %v4806_v7, %v4670_v50  ;;  %v4807_v24 = vcombine.high %v4762_v41, %v4794_v10  ;;  %v11028_v46 = vrot.slane %v4771_v31, %v7809_v11  ;;  %v3518_v30 = vpop.permute.xlu1 %3517 }
 0x55c   : > { %v7390_v8 = vpack.i.bf16 %v4803_v35, %v4667_v33  ;;  %v5892_v0 = vcombine.low %v10834_v49, %v10880_v21  ;;  %v11040_v50 = vrot.slane %v4635_v22, %v7809_v11  ;;  %v5843_v33 = vcombine.high %v10939_v4, %v10942_v3  ;;  %3564 = vst.msk [vmem:[#allocation5 + $0x410] sm:$0xff] %vm384_vm3, %v3518_v30  ;;  %v11059_v22 = vld [vmem:[#allocation5 + $0x428] sm:$0xff] }
 0x55d   : > { %v5979_v1 = vcombine.high %v11017_v47, %v11000_v37  ;;  %7431 = vrot.lane.b32.xlu1 %v7430_v56, %s7496_s12  ;;  %v11050_v43 = vrot.slane %v4755_v48, %v7809_v11  ;;  %v11053_v27 = vrot.slane %v4739_v52, %v7809_v11  ;;  %v5875_v28 = vcombine.high %v10974_v19, %v10997_v15 }
 0x55e   : > { %7391 = vrot.lane.b32.xlu0 %v7390_v8, %s7498_s14  ;;  %v7395_v40 = vpack.i.bf16 %v6028_v17, %v5892_v0  ;;  %v11064_v16 = vrot.slane %v6011_v2, %v7809_v11  ;;  %v6050_v62 = vcombine.low %v11057_v13, %v11030_v9  ;;  %v6066_v23 = vcombine.low %v11061_v14, %v11032_v5 }
 0x55f   : > { %v12180_v41 = vcombine.high %v10658_v36, %v10812_v32  ;;  %v4808_v10 = vcombine.low %v11050_v43, %v11014_v59  ;;  %v4804_v31 = vcombine.low %v11053_v27, %v11028_v46  ;;  %v3526_v35 = vpop.permute.xlu1 %3525  ;;  %v4672_v48 = vcombine.low %v10898_v38, %v10901_v12  ;;  %v11088_v32 = vld [vmem:[#allocation5 + $0x458] sm:$0xff] }
 0x560   : > { %v4668_v52 = vcombine.low %v10904_v58, %v11040_v50  ;;  %v11086_v36 = vrot.slane %v5979_v1, %v7809_v11  ;;  %v11090_v17 = vld [vmem:[#allocation5 + $0x478] sm:$0xff]  ;;  %v6034_v2 = vcombine.low %v11077_v63, %v11059_v22  ;;  %3568 = vst.msk [vmem:[#allocation5 + $0x430] sm:$0xff] %vm384_vm3, %v3526_v35  ;;  %v11098_v56 = vrot.slane %v5843_v33, %v7809_v11 }
 0x561   : > { %v7440_v60 = vpack.i.bf16 %v4807_v24, %v12180_v41  ;;  %v11101_v8 = vrot.slane %v5875_v28, %v7809_v11  ;;  %v6082_v24 = vcombine.low %v11088_v32, %v11090_v17  ;;  %v6029_v0 = vcombine.high %v10994_v55, %v10981_v51 }
 0x562   : > { %7396 = vrot.lane.b32.xlu0 %v7395_v40, %s7495_s11  ;;  %v6033_v30 = vcombine.high %v11086_v36, %v11064_v16  ;;  %v6010_v1 = vcombine.low %v11003_v29, %v10984_v18  ;;  %v11112_v40 = vrot.slane %v6050_v62, %v7784_v61  ;;  %v7450_v33 = vpack.i.bf16 %v4808_v10, %v4672_v48 }
 0x563   : > { %7441 = vrot.lane.b32.xlu1 %v7440_v60, %s7500_s16  ;;  %v7405_v41 = vpack.i.bf16 %v4804_v31, %v4668_v52  ;;  %v11115_v28 = vrot.slane %v6066_v23, %v7784_v61  ;;  %v11118_v60 = vrot.slane %v6082_v24, %v7784_v61  ;;  %v3534_v35 = vpop.permute.xlu1 %3533  ;;  %v5893_v7 = vcombine.high %v10834_v49, %v10880_v21 }
 0x564   : > { %v5874_v51 = vcombine.low %v10974_v19, %v10997_v15  ;;  %v11125_v18 = vrot.slane %v6034_v2, %v7784_v61  ;;  %3572 = vst.msk [vmem:[#allocation5 + $0x450] sm:$0xff] %vm384_vm3, %v3534_v35  ;;  %v5897_v55 = vcombine.high %v11098_v56, %v11101_v8  ;;  %v5978_v29 = vcombine.low %v11017_v47, %v11000_v37  ;;  %v3714_v35 = vld [vmem:[#allocation5 + $0x440] sm:$0xff] }
 0x565   : > { %v6130_v49 = vcombine.low %v11115_v28, %v11118_v60  ;;  %v5842_v21 = vcombine.low %v10939_v4, %v10942_v3  ;;  %v6018_v19 = vrot.slane %v6010_v1, %v7809_v11  ;;  %v7410_v23 = vpack.i.bf16 %v6029_v0, %v5893_v7  ;;  %v3706_v0 = vld [vmem:[#allocation5 + $0x400] sm:$0xff] }
 0x566   : > { %7406 = vrot.lane.b32.xlu0 %v7405_v41, %s7495_s11  ;;  %v6098_v15 = vcombine.low %v11125_v18, %v11112_v40  ;;  %v7455_v62 = vpack.i.bf16 %v6033_v30, %v5897_v55  ;;  %v4809_v10 = vcombine.high %v11050_v43, %v11014_v59  ;;  %v4805_v31 = vcombine.high %v11053_v27, %v11028_v46  ;;  %v3710_v43 = vld [vmem:[#allocation5 + $0x420] sm:$0xff] }
 0x567   : > { %7451 = vrot.lane.b32.xlu1 %v7450_v33, %s7497_s13  ;;  %v3542_v37 = vpop.permute.xlu1 %3541  ;;  %v4673_v47 = vcombine.high %v10898_v38, %v10901_v12  ;;  %v11147_v48 = vld [vmem:[#allocation5 + $0x430] sm:$0xff]  ;;  %v11150_v4 = vrot.slane %v6130_v49, %v7809_v11  ;;  %v4669_v3 = vcombine.high %v10904_v58, %v11040_v50  ;;  %v5882_v59 = vrot.slane %v5874_v51, %v7809_v11  ;;  %v3718_v58 = vld [vmem:[#allocation5 + $0x460] sm:$0xff]  ;;  %v11170_v51 = vpop.permute.xlu0 %7206 }
 0x568   : > { %3576 = vst.msk [vmem:[#allocation5 + $0x470] sm:$0xff] %vm384_vm3, %v3542_v37  ;;  %v5986_v46 = vrot.slane %v5978_v29, %v7809_v11  ;;  %v5850_v38 = vrot.slane %v5842_v21, %v7809_v11  ;;  %v3708_v12 = vld [vmem:[#allocation5 + $0x410] sm:$0xff]  ;;  %v11161_v27 = vrot.slane %v6098_v15, %v7809_v11  ;;  %v4810_v33 = vcombine.low %v3706_v0, %v3710_v43 }
 0x569   : > { %v7460_v7 = vpack.i.bf16 %v4809_v10, %v4673_v47  ;;  %v7420_v52 = vpack.i.bf16 %v4805_v31, %v4669_v3  ;;  %v4826_v24 = vcombine.low %v3708_v12, %v11147_v48  ;;  %v4842_v49 = vcombine.low %v3714_v35, %v3718_v58 }
 0x56a   : > { %7411 = vrot.lane.b32.xlu0 %v7410_v23, %s7499_s15  ;;  %v6030_v2 = vcombine.low %v5986_v46, %v6018_v19  ;;  %v6162_v50 = vcombine.low %v11161_v27, %v11150_v4  ;;  %v5894_v1 = vcombine.low %v5850_v38, %v5882_v59  ;;  %v6031_v41 = vcombine.high %v5986_v46, %v6018_v19 }
 0x56b   : > { %7456 = vrot.lane.b32.xlu1 %v7455_v62, %s7501_s17  ;;  %v11164_v30 = vpop.permute.xlu1 %7186  ;;  %v4834_v29 = vrot.slane %v4826_v24, %v7784_v61  ;;  %v5895_v15 = vcombine.high %v5850_v38, %v5882_v59  ;;  %v3716_v62 = vld [vmem:[#allocation5 + $0x450] sm:$0xff]  ;;  %v4818_v10 = vrot.slane %v4810_v33, %v7784_v61  ;;  %v6032_v19 = vcombine.low %v11086_v36, %v11064_v16  ;;  %v11188_v33 = vpop.permute.xlu0 %7216 }
 0x56c   : > { %v7425_v55 = vpack.i.bf16 %v6030_v2, %v5894_v1  ;;  %v4843_v3 = vcombine.high %v3714_v35, %v3718_v58  ;;  %v4850_v46 = vrot.slane %v4842_v49, %v7784_v61  ;;  %v4827_v59 = vcombine.high %v3708_v12, %v11147_v48 }
 0x56d   : > { %v7435_v47 = vpack.i.bf16 %v6031_v41, %v5895_v15  ;;  %v5896_v2 = vcombine.low %v11098_v56, %v11101_v8  ;;  %v4811_v24 = vcombine.high %v3706_v0, %v3710_v43  ;;  %v6051_v1 = vcombine.high %v11057_v13, %v11030_v9 }
 0x56e   : > { %7421 = vrot.lane.b32.xlu0 %v7420_v52, %s7499_s15  ;;  %v4875_v52 = vcombine.high %v4818_v10, %v4834_v29  ;;  %v4874_v36 = vcombine.low %v4818_v10, %v4834_v29  ;;  %v11195_v12 = vrot.slane %v4843_v3, %v7784_v61  ;;  %v6035_v56 = vcombine.high %v11077_v63, %v11059_v22 }
 0x56f   : > { %7461 = vrot.lane.b32.xlu1 %v7460_v7, %s7501_s17  ;;  %v11173_v21 = vpop.permute.xlu1 %7191  ;;  %v3720_v23 = vld [vmem:[#allocation5 + $0x470] sm:$0xff]  ;;  %v7445_v48 = vpack.i.bf16 %v6032_v19, %v5896_v2  ;;  %v6083_v9 = vcombine.high %v11088_v32, %v11090_v17  ;;  %v11207_v0 = vrot.slane %v4827_v59, %v7784_v61  ;;  %v6099_v22 = vcombine.high %v11125_v18, %v11112_v40  ;;  %v11230_v18 = vpop.permute.xlu0 %7226 }
 0x570   : > { %v4858_v31 = vcombine.low %v3716_v62, %v3720_v23  ;;  %v4859_v37 = vcombine.high %v3716_v62, %v3720_v23  ;;  %v4889_v13 = vrot.slane %v4875_v52, %v7809_v11  ;;  %v6067_v63 = vcombine.high %v11061_v14, %v11032_v5 }
 0x571   : > { %v11218_v17 = vrot.slane %v4874_v36, %v7809_v11  ;;  %v11223_v49 = vrot.slane %v6051_v1, %v7784_v61  ;;  %v6131_v15 = vcombine.high %v11115_v28, %v11118_v60  ;;  %v11228_v40 = vrot.slane %v6083_v9, %v7784_v61 }
 0x572   : > { %7426 = vrot.lane.b32.xlu0 %v7425_v55, %s7496_s12  ;;  %v4866_v7 = vrot.slane %v4858_v31, %v7784_v61  ;;  %v11192_v41 = vrot.slane %v4859_v37, %v7784_v61  ;;  %v11210_v55 = vrot.slane %v4811_v24, %v7784_v61  ;;  %v6163_v5 = vcombine.high %v11161_v27, %v11150_v4 }
 0x573   : > { %v11182_v38 = vpop.permute.xlu1 %7196  ;;  %v11238_v62 = vrot.slane %v6035_v56, %v7784_v61  ;;  %v7189_v28 = vunpack.i.h.bf16 %v11164_v30  ;;  %v6113_v10 = vrot.slane %v6099_v22, %v7809_v11  ;;  %v11245_v31 = vrot.slane %v6067_v63, %v7784_v61 }
 0x574   : > { %v4907_v16 = vcombine.high %v4850_v46, %v4866_v7  ;;  %v4906_v58 = vcombine.low %v4850_v46, %v4866_v7  ;;  %v4922_v29 = vcombine.low %v11195_v12, %v11192_v41  ;;  %v4890_v14 = vcombine.low %v11210_v55, %v11207_v0 }
 0x575   : > { %v7188_v37 = vunpack.i.l.bf16 %v11164_v30  ;;  %v6114_v3 = vcombine.low %v11238_v62, %v11223_v49  ;;  %v7194_v46 = vunpack.i.h.bf16 %v11173_v21  ;;  %v7193_v7 = vunpack.i.l.bf16 %v11173_v21  ;;  %v12182_v21 = vld [vmem:[#allocation31_spill] sm:$0xff] }
 0x576   : > { %7436 = vrot.lane.b32.xlu0 %v7435_v47, %s7500_s16  ;;  %v4921_v8 = vrot.slane %v4907_v16, %v7809_v11  ;;  %v11204_v43 = vrot.slane %v4906_v58, %v7809_v11  ;;  %v4930_v19 = vrot.slane %v4922_v29, %v7809_v11  ;;  %v6145_v52 = vrot.slane %v6131_v15, %v7809_v11  ;;  %v12181_v16 = vld [vmem:[#allocation15_spill] sm:$0xff] }
 0x577   : > { %v7202_v35 = vpop.permute.xlu1 %7201  ;;  %v6146_v61 = vcombine.low %v11245_v31, %v11228_v40  ;;  %v7199_v59 = vunpack.i.h.bf16 %v11182_v38  ;;  %v7198_v30 = vunpack.i.l.bf16 %v11182_v38  ;;  %v4898_v1 = vrot.slane %v4890_v14, %v7809_v11 }
 0x578   : > { %v4940_v32 = vcombine.low %v4889_v13, %v4921_v8  ;;  %v4938_v23 = vcombine.low %v11218_v17, %v11204_v43  ;;  %v4941_v47 = vcombine.high %v4889_v13, %v4921_v8  ;;  %v4939_v24 = vcombine.high %v11218_v17, %v11204_v43  ;;  %v12184_v13 = vld [vmem:[#allocation20_spill] sm:$0xff] }
 0x579   : > { %v11259_v2 = vpop.permute.xlu0 %7241  ;;  %v12183_v36 = vcombine.low %v12181_v16, %v12182_v21  ;;  %v7203_v56 = vunpack.i.l.bf16 %v7202_v35  ;;  %v4923_v38 = vcombine.high %v11195_v12, %v11192_v41  ;;  %v12185_v8 = vld [vmem:[#allocation8_spill] sm:$0xff]  ;;  %v4942_v15 = vcombine.low %v4898_v1, %v4930_v19 }
 0x57a   : > { %7446 = vrot.lane.b32.xlu0 %v7445_v48, %s7497_s13  ;;  %6231 = vrot.lane.b32.xlu1 %v4940_v32, %s7495_s11  ;;  %v7204_v48 = vunpack.i.h.bf16 %v7202_v35  ;;  %v12186_v22 = vcombine.low %v12184_v13, %v12185_v8 }
 0x57b   : > { %v7212_v60 = vpop.permute.xlu1 %7211  ;;  %v6675_v58 = vsel %vm384_vm3, %v12183_v36, %v7189_v28  ;;  %v4937_v21 = vrot.slane %v4923_v38, %v7809_v11 }
 0x57c   : > { %v6674_v63 = vsel %vm384_vm3, %v12186_v22, %v7188_v37  ;;  %v7214_v32 = vunpack.i.h.bf16 %v7212_v60  ;;  %v7213_v29 = vunpack.i.l.bf16 %v7212_v60  ;;  %v6684_v14 = vsel %vm2302_vm4, %v6675_v58, %v7194_v46 }
 0x57d   : > { %v6693_v41 = vsel %vm2308_vm5, %v6684_v14, %v7199_v59  ;;  %v11280_v12 = vpop.permute.xlu0 %7251  ;;  %v6164_v37 = vcombine.low %v6113_v10, %v6145_v52  ;;  %v4891_v60 = vcombine.high %v11210_v55, %v11207_v0  ;;  %v4943_v46 = vcombine.high %v4898_v1, %v4930_v19 }
 0x57e   : > { %6447 = vrot.lane.b32.xlu0 %v6163_v5, %s7498_s14  ;;  %6267 = vrot.lane.b32.xlu1 %v4941_v47, %s7499_s15  ;;  %v6683_v5 = vsel %vm2302_vm4, %v6674_v63, %v7193_v7  ;;  %v6702_v7 = vsel %vm2314_vm6, %v6693_v41, %v7204_v48  ;;  %v6165_v19 = vcombine.high %v6113_v10, %v6145_v52  ;;  %v12187_v41 = vld [vmem:[#allocation68_spill] sm:$0xff] }
 0x57f   : > { %v7222_v9 = vpop.permute.xlu1 %7221  ;;  %v6692_v47 = vsel %vm2308_vm5, %v6683_v5, %v7198_v30  ;;  %v6711_v59 = vsel %vm2320_vm7, %v6702_v7, %v7214_v32  ;;  %v4905_v1 = vrot.slane %v4891_v60, %v7809_v11  ;;  %v6122_v22 = vrot.slane %v6114_v3, %v7809_v11 }
 0x580   : > { %v7224_v28 = vunpack.i.h.bf16 %v7222_v9  ;;  %v7223_v35 = vunpack.i.l.bf16 %v7222_v9  ;;  %v6154_v9 = vrot.slane %v6146_v61, %v7809_v11  ;;  %v6147_v52 = vcombine.high %v11245_v31, %v11228_v40 }
 0x581   : > { %v4944_v8 = vcombine.low %v4905_v1, %v4937_v21  ;;  %v7209_v32 = vunpack.i.h.bf16 %v11170_v51  ;;  %v4945_v5 = vcombine.high %v4905_v1, %v4937_v21  ;;  %v6115_v14 = vcombine.high %v11238_v62, %v11223_v49 }
 0x582   : > { %6195 = vrot.lane.b32.xlu0 %v4939_v24, %s7498_s14  ;;  %6303 = vrot.lane.b32.xlu1 %v4942_v15, %s7496_s12  ;;  %v6701_v24 = vsel %vm2314_vm6, %v6692_v47, %v7203_v56  ;;  %v6720_v55 = vsel %vm2326_vm8, %v6711_v59, %v7224_v28  ;;  %v11294_v56 = vpop.permute.xlu0 %7261  ;;  %v6166_v10 = vcombine.low %v6122_v22, %v6154_v9  ;;  %v7208_v15 = vunpack.i.l.bf16 %v11170_v51 }
 0x583   : > { %v7232_v16 = vpop.permute.xlu1 %7231  ;;  %v6710_v30 = vsel %vm2320_vm7, %v6701_v24, %v7213_v29  ;;  %v7219_v3 = vunpack.i.h.bf16 %v11188_v33  ;;  %v7218_v28 = vunpack.i.l.bf16 %v11188_v33  ;;  %v7228_v47 = vunpack.i.l.bf16 %v11230_v18  ;;  %v12190_v33 = vld [vmem:[#allocation13_spill] sm:$0xff] }
 0x584   : > { %v7234_v36 = vunpack.i.h.bf16 %v7232_v16  ;;  %v7233_v58 = vunpack.i.l.bf16 %v7232_v16  ;;  %v6719_v0 = vsel %vm2326_vm8, %v6710_v30, %v7223_v35  ;;  %v7229_v35 = vunpack.i.h.bf16 %v11230_v18  ;;  %v12191_v16 = vld [vmem:[#allocation59_spill] sm:$0xff] }
 0x585   : > { %v6167_v31 = vcombine.high %v6122_v22, %v6154_v9  ;;  %v6161_v51 = vrot.slane %v6147_v52, %v7809_v11  ;;  %v6129_v59 = vrot.slane %v6115_v14, %v7809_v11 }
 0x586   : > { %6483 = vrot.lane.b32.xlu0 %v6164_v37, %s7495_s11  ;;  %6339 = vrot.lane.b32.xlu1 %v4943_v46, %s7500_s16  ;;  %v11299_v48 = vsel %vm2332_vm9, %v6719_v0, %v7233_v58  ;;  %v11302_v38 = vsel %vm2332_vm9, %v6720_v55, %v7234_v36  ;;  %v12188_v37 = vld [vmem:[#allocation29_spill] sm:$0xff]  ;;  %v12192_v46 = vcombine.low %v12190_v33, %v12191_v16  ;;  %v7263_v33 = vunpack.i.l.bf16 %v11294_v56  ;;  %s307_s11 = scalar_lea.vmem %s11573_s2, %s6986_s22 }
 0x587   : > { %v7237_v13 = vpop.permute.xlu1 %7236  ;;  %v7008_v61 = vpack.c.bf16 %v11302_v38, %v11299_v48  ;;  %v12189_v60 = vcombine.low %v12187_v41, %v12188_v37  ;;  %v6801_v41 = vld [vmem:[%s11577_s6] sm:$0xff] }
 0x588   : > { %v11308_v63 = vpop.permute.xlu0 %7291  ;;  %v7239_v62 = vunpack.i.h.bf16 %v7237_v13  ;;  %v7238_v24 = vunpack.i.l.bf16 %v7237_v13  ;;  %v6676_v18 = vsel %vm384_vm3, %v12192_v46, %v7208_v15  ;;  %v6168_v13 = vcombine.low %v6129_v59, %v6161_v51 }
 0x589   : > { %v6677_v49 = vsel %vm384_vm3, %v12189_v60, %v7209_v32  ;;  %v6685_v36 = vsel %vm2302_vm4, %v6676_v18, %v7218_v28 }
 0x58a   : > { %6519 = vrot.lane.b32.xlu0 %v6165_v19, %s7499_s15  ;;  %6375 = vrot.lane.b32.xlu1 %v4944_v8, %s7497_s13  ;;  %v6686_v58 = vsel %vm2302_vm4, %v6677_v49, %v7219_v3  ;;  %v6694_v55 = vsel %vm2308_vm5, %v6685_v36, %v7228_v47  ;;  %v6169_v3 = vcombine.high %v6129_v59, %v6161_v51  ;;  %v7244_v51 = vunpack.i.h.bf16 %v11259_v2  ;;  %v12194_v59 = vld [vmem:[#allocation30_spill] sm:$0xff] }
 0x58b   : > { %v7247_v29 = vpop.permute.xlu1 %7246  ;;  %v6695_v19 = vsel %vm2308_vm5, %v6686_v58, %v7229_v35  ;;  %v6703_v22 = vsel %vm2314_vm6, %v6694_v55, %v7238_v24  ;;  %v7243_v49 = vunpack.i.l.bf16 %v11259_v2  ;;  %v7253_v24 = vunpack.i.l.bf16 %v11280_v12  ;;  %v12196_v2 = vld [vmem:[#allocation38_spill] sm:$0xff] }
 0x58c   : > { %v7249_v21 = vunpack.i.h.bf16 %v7247_v29  ;;  %v7248_v30 = vunpack.i.l.bf16 %v7247_v29  ;;  %v6704_v8 = vsel %vm2314_vm6, %v6695_v19, %v7239_v62  ;;  %v7254_v62 = vunpack.i.h.bf16 %v11280_v12 }
 0x58e   : > { %6555 = vrot.lane.b32.xlu0 %v6166_v10, %s7496_s12  ;;  %v11322_v40 = vpop.permute.xlu0 %7296  ;;  %6411 = vrot.lane.b32.xlu1 %v4945_v5, %s7501_s17  ;;  %v6712_v11 = vsel %vm2320_vm7, %v6703_v22, %v7248_v30  ;;  %v6713_v52 = vsel %vm2320_vm7, %v6704_v8, %v7249_v21  ;;  %v12193_v30 = vld [vmem:[#allocation24_spill] sm:$0xff]  ;;  %s6997_s12 = sshll.u32 %s12221_s25, 4 }
 0x58f   : > { %v7257_v7 = vpop.permute.xlu1 %7256  ;;  %v12195_v36 = vcombine.low %v12193_v30, %v12194_v59  ;;  %s312_s15 = scalar_lea.vmem %s11578_s7, %s6997_s12 }
 0x590   : > { %v7259_v9 = vunpack.i.h.bf16 %v7257_v7  ;;  %v7258_v0 = vunpack.i.l.bf16 %v7257_v7  ;;  %v7264_v7 = vunpack.i.h.bf16 %v11294_v56 }
 0x591   : > { %v6678_v58 = vsel %vm384_vm3, %v12195_v36, %v7243_v49 }
 0x592   : > { %6591 = vrot.lane.b32.xlu0 %v6167_v31, %s7500_s16  ;;  %v11340_v1 = vpop.permute.xlu0 %7301  ;;  %v6721_v15 = vsel %vm2326_vm8, %v6712_v11, %v7258_v0  ;;  %v6722_v5 = vsel %vm2326_vm8, %v6713_v52, %v7259_v9  ;;  %v12197_v9 = vld [vmem:[#allocation26_spill] sm:$0xff] }
 0x593   : > { %v7267_v10 = vpop.permute.xlu1 %7266  ;;  %v12198_v0 = vcombine.low %v12196_v2, %v12197_v9  ;;  %v7304_v30 = vunpack.i.h.bf16 %v11340_v1  ;;  %v7303_v59 = vunpack.i.l.bf16 %v11340_v1 }
 0x594   : > { %v7269_v32 = vunpack.i.h.bf16 %v7267_v10  ;;  %v7268_v29 = vunpack.i.l.bf16 %v7267_v10 }
 0x595   : > { %v6679_v55 = vsel %vm384_vm3, %v12198_v0, %v7244_v51  ;;  %v12199_v0 = vld [vmem:[#allocation41_spill] sm:$0xff] }
 0x596   : > { %6627 = vrot.lane.b32.xlu0 %v6168_v13, %s7497_s13  ;;  %v11349_v14 = vpop.permute.xlu0 %7306  ;;  %v11352_v28 = vsel %vm2332_vm9, %v6721_v15, %v7268_v29  ;;  %v11355_v35 = vsel %vm2332_vm9, %v6722_v5, %v7269_v32  ;;  %v6687_v13 = vsel %vm2302_vm4, %v6678_v58, %v7253_v24  ;;  %v6688_v56 = vsel %vm2302_vm4, %v6679_v55, %v7254_v62  ;;  %v12200_v55 = vld [vmem:[#allocation21_spill] sm:$0xff] }
 0x597   : > { %v7272_v47 = vpop.permute.xlu1 %7271  ;;  %v7012_v31 = vpack.c.bf16 %v11355_v35, %v11352_v28  ;;  %v6696_v10 = vsel %vm2308_vm5, %v6687_v13, %v7263_v33  ;;  %v6697_v11 = vsel %vm2308_vm5, %v6688_v56, %v7264_v7  ;;  %v7294_v33 = vunpack.i.h.bf16 %v11308_v63  ;;  %v12203_v13 = vld [vmem:[#allocation27_spill] sm:$0xff] }
 0x598   : > { %v7274_v46 = vunpack.i.h.bf16 %v7272_v47  ;;  %v7273_v18 = vunpack.i.l.bf16 %v7272_v47  ;;  %v7309_v58 = vunpack.i.h.bf16 %v11349_v14  ;;  %v7308_v2 = vunpack.i.l.bf16 %v11349_v14 }
 0x59a   : > { %6663 = vrot.lane.b32.xlu0 %v6169_v3, %s7501_s17  ;;  %v11363_v37 = vpop.permute.xlu0 %7311  ;;  %v6706_v52 = vsel %vm2314_vm6, %v6697_v11, %v7274_v46  ;;  %v6705_v32 = vsel %vm2314_vm6, %v6696_v10, %v7273_v18  ;;  %v7293_v46 = vunpack.i.l.bf16 %v11308_v63  ;;  %v7299_v18 = vunpack.i.h.bf16 %v11322_v40  ;;  %v12202_v63 = vld [vmem:[#allocation39_spill] sm:$0xff] }
 0x59b   : > { %v7277_v60 = vpop.permute.xlu1 %7276  ;;  %v12204_v56 = vcombine.low %v12202_v63, %v12203_v13 }
 0x59c   : > { %v7279_v12 = vunpack.i.h.bf16 %v7277_v60  ;;  %v7278_v19 = vunpack.i.l.bf16 %v7277_v60 }
 0x59e   : > { %6804 = vperm.xlu0 %7184, %v6801_v41   ;;  %v11371_v16 = vpop.permute.xlu0 %7321  ;;  %v6714_v15 = vsel %vm2320_vm7, %v6705_v32, %v7278_v19  ;;  %v6715_v5 = vsel %vm2320_vm7, %v6706_v52, %v7279_v12  ;;  %v12201_v12 = vcombine.low %v12199_v0, %v12200_v55 }
 0x59f   : > { %v7282_v21 = vpop.permute.xlu1 %7281  ;;  %v7324_v0 = vunpack.i.h.bf16 %v11371_v16  ;;  %v7323_v55 = vunpack.i.l.bf16 %v11371_v16 }
 0x5a0   : > { %v7284_v8 = vunpack.i.h.bf16 %v7282_v21  ;;  %v7283_v22 = vunpack.i.l.bf16 %v7282_v21  ;;  %v7298_v21 = vunpack.i.l.bf16 %v11322_v40  ;;  %v6737_v19 = vsel %vm384_vm3, %v12201_v12, %v7293_v46 }
 0x5a1   : > { %v6738_v40 = vsel %vm384_vm3, %v12204_v56, %v7294_v33 }
 0x5a2   : > { %v6723_v60 = vsel %vm2326_vm8, %v6714_v15, %v7283_v22  ;;  %v6724_v51 = vsel %vm2326_vm8, %v6715_v5, %v7284_v8  ;;  %v6746_v1 = vsel %vm2302_vm4, %v6737_v19, %v7298_v21  ;;  %v6747_v10 = vsel %vm2302_vm4, %v6738_v40, %v7299_v18  ;;  %v12205_v40 = vld [vmem:[#allocation70_spill] sm:$0xff] }
 0x5a3   : > { %v7287_v29 = vpop.permute.xlu1 %7286  ;;  %v11389_v3 = vpop.permute.xlu0 %7331  ;;  %v6755_v14 = vsel %vm2308_vm5, %v6746_v1, %v7303_v59  ;;  %v6756_v32 = vsel %vm2308_vm5, %v6747_v10, %v7304_v30  ;;  %v12208_v1 = vld [vmem:[#allocation63_spill] sm:$0xff] }
 0x5a4   : > { %v7289_v47 = vunpack.i.h.bf16 %v7287_v29  ;;  %v7288_v41 = vunpack.i.l.bf16 %v7287_v29  ;;  %v6764_v15 = vsel %vm2314_vm6, %v6755_v14, %v7308_v2  ;;  %v6765_v5 = vsel %vm2314_vm6, %v6756_v32, %v7309_v58  ;;  %v12209_v10 = vld [vmem:[#allocation67_spill] sm:$0xff] }
 0x5a5   : > { %v7314_v2 = vunpack.i.h.bf16 %v11363_v37  ;;  %v7313_v58 = vunpack.i.l.bf16 %v11363_v37  ;;  %v7334_v12 = vunpack.i.h.bf16 %v11389_v3  ;;  %v7333_v19 = vunpack.i.l.bf16 %v11389_v3 }
 0x5a6   : > { %v11394_v49 = vsel %vm2332_vm9, %v6723_v60, %v7288_v41  ;;  %v11397_v62 = vsel %vm2332_vm9, %v6724_v51, %v7289_v47  ;;  %v12210_v16 = vcombine.low %v12208_v1, %v12209_v10 }
 0x5a7   : > { %v7317_v24 = vpop.permute.xlu1 %7316  ;;  %v7016_v7 = vpack.c.bf16 %v11397_v62, %v11394_v49  ;;  %v7342_v36 = vpop.permute.xlu0 %7341  ;;  %v12214_v49 = vcombine.low %v10988_v25, %v10991_v26 }
 0x5a8   : > { %v7319_v8 = vunpack.i.h.bf16 %v7317_v24  ;;  %v7318_v22 = vunpack.i.l.bf16 %v7317_v24  ;;  %v7344_v63 = vunpack.i.h.bf16 %v7342_v36  ;;  %v7343_v13 = vunpack.i.l.bf16 %v7342_v36 }
 0x5aa   : > { %v6773_v51 = vsel %vm2320_vm7, %v6764_v15, %v7318_v22  ;;  %v6774_v24 = vsel %vm2320_vm7, %v6765_v5, %v7319_v8  ;;  %v12206_v8 = vld [vmem:[#allocation18_spill] sm:$0xff] }
 0x5ab   : > { %v7327_v9 = vpop.permute.xlu1 %7326  ;;  %v12207_v37 = vcombine.low %v12205_v40, %v12206_v8 }
 0x5ac   : > { %v7329_v11 = vunpack.i.h.bf16 %v7327_v9  ;;  %v7328_v52 = vunpack.i.l.bf16 %v7327_v9 }
 0x5ad   : > { %v6740_v22 = vsel %vm384_vm3, %v12207_v37, %v7314_v2  ;;  %v12211_v37 = vcombine.low %v10571_v54, %v10556_v45 }
 0x5ae   : > { %v11421_v29 = vpop.permute.xlu0 %7346  ;;  %v6782_v33 = vsel %vm2326_vm8, %v6773_v51, %v7328_v52  ;;  %v6783_v46 = vsel %vm2326_vm8, %v6774_v24, %v7329_v11  ;;  %v6739_v11 = vsel %vm384_vm3, %v12210_v16, %v7313_v58  ;;  %v6749_v48 = vsel %vm2302_vm4, %v6740_v22, %v7324_v0 }
 0x5af   : > { %v7337_v47 = vpop.permute.xlu1 %7336  ;;  %v6748_v3 = vsel %vm2302_vm4, %v6739_v11, %v7323_v55  ;;  %v6758_v32 = vsel %vm2308_vm5, %v6749_v48, %v7334_v12  ;;  %v7349_v58 = vunpack.i.h.bf16 %v11421_v29  ;;  %v7348_v0 = vunpack.i.l.bf16 %v11421_v29 }
 0x5b0   : > { %v7339_v41 = vunpack.i.h.bf16 %v7337_v47  ;;  %v7338_v60 = vunpack.i.l.bf16 %v7337_v47  ;;  %v6757_v36 = vsel %vm2308_vm5, %v6748_v3, %v7333_v19  ;;  %v6767_v47 = vsel %vm2314_vm6, %v6758_v32, %v7344_v63 }
 0x5b1   : > { %v6766_v5 = vsel %vm2314_vm6, %v6757_v36, %v7343_v13  ;;  %v6741_v22 = vsel %vm384_vm3, %v12211_v37, %v7348_v0  ;;  %v12212_v29 = vcombine.low %v10698_v57, %v10701_v53  ;;  %v12213_v0 = vcombine.low %v12177_v20, %v12176_v34 }
 0x5b2   : > { %v6791_v18 = vsel %vm2332_vm9, %v6782_v33, %v7338_v60  ;;  %v6792_v21 = vsel %vm2332_vm9, %v6783_v46, %v7339_v41  ;;  %v7357_v9 = vpop.permute.xlu0 %7356 }
 0x5b3   : > { %v7006_v59 = vpack.c.bf16 %v6792_v21, %v6791_v18  ;;  %v7359_v12 = vunpack.i.h.bf16 %v7357_v9  ;;  %v7358_v19 = vunpack.i.l.bf16 %v7357_v9  ;;  %v6742_v9 = vsel %vm384_vm3, %v12212_v29, %v7349_v58 }
 0x5b5   : > { %v7352_v30 = vpop.permute.xlu1 %7351  ;;  %7007 = vmatprep.subr.bf16.mxu1 %v7006_v59  ;;  %v6750_v16 = vsel %vm2302_vm4, %v6741_v22, %v7358_v19  ;;  %v6751_v28 = vsel %vm2302_vm4, %v6742_v9, %v7359_v12 }
 0x5b6   : > { %7009 = vmatpush1.bf16.msra.mxu1 %v7008_v61  ;;  %v7354_v52 = vunpack.i.h.bf16 %v7352_v30  ;;  %v7353_v14 = vunpack.i.l.bf16 %v7352_v30  ;;  %v7367_v15 = vpop.permute.xlu0 %7366 }
 0x5b7   : > { %v7369_v63 = vunpack.i.h.bf16 %v7367_v15  ;;  %v7368_v13 = vunpack.i.l.bf16 %v7367_v15 }
 0x5b8   : > { %v6776_v60 = vsel %vm2320_vm7, %v6767_v47, %v7354_v52  ;;  %v6775_v51 = vsel %vm2320_vm7, %v6766_v5, %v7353_v14 }
 0x5b9   : > { %v7362_v56 = vpop.permute.xlu1 %7361  ;;  %v6759_v11 = vsel %vm2308_vm5, %v6750_v16, %v7368_v13  ;;  %v6760_v52 = vsel %vm2308_vm5, %v6751_v28, %v7369_v63 }
 0x5ba   : > { %v7364_v38 = vunpack.i.h.bf16 %v7362_v56  ;;  %v7363_v61 = vunpack.i.l.bf16 %v7362_v56  ;;  %v7377_v55 = vpop.permute.xlu0 %7376 }
 0x5bb   : > { %v7379_v56 = vunpack.i.h.bf16 %v7377_v55  ;;  %v7378_v40 = vunpack.i.l.bf16 %v7377_v55 }
 0x5bc   : > { %v6784_v46 = vsel %vm2326_vm8, %v6775_v51, %v7363_v61  ;;  %v6785_v18 = vsel %vm2326_vm8, %v6776_v60, %v7364_v38 }
 0x5bd   : > { %v7372_v41 = vpop.permute.xlu1 %7371  ;;  %v6768_v45 = vsel %vm2314_vm6, %v6759_v11, %v7378_v40  ;;  %v6769_v54 = vsel %vm2314_vm6, %v6760_v52, %v7379_v56 }
 0x5be   : > { %v7374_v24 = vunpack.i.h.bf16 %v7372_v41  ;;  %v7373_v33 = vunpack.i.l.bf16 %v7372_v41 }
 0x5c0   : > { %v6793_v21 = vsel %vm2332_vm9, %v6784_v46, %v7373_v33  ;;  %v6794_v30 = vsel %vm2332_vm9, %v6785_v18, %v7374_v24 }
 0x5c1   : > { %v7387_v59 = vpop.permute.xlu1 %7386  ;;  %v7010_v2 = vpack.c.bf16 %v6794_v30, %v6793_v21  ;;  %v7382_v36 = vpop.permute.xlu0 %7381 }
 0x5c2   : > { %v7389_v1 = vunpack.i.h.bf16 %v7387_v59  ;;  %v7388_v10 = vunpack.i.l.bf16 %v7387_v59 }
 0x5c3   : > { %7011 = vmatprep.subr.bf16.mxu1 %v7010_v2 }
 0x5c4   : > { %7013 = vmatpush1.bf16.msra.mxu1 %v7012_v31  ;;  %v6778_v57 = vsel %vm2320_vm7, %v6769_v54, %v7389_v1  ;;  %v6777_v53 = vsel %vm2320_vm7, %v6768_v45, %v7388_v10 }
 0x5c5   : > { %v7402_v8 = vpop.permute.xlu1 %7401 }
 0x5c6   : > { %v7404_v35 = vunpack.i.h.bf16 %v7402_v8  ;;  %v7403_v31 = vunpack.i.l.bf16 %v7402_v8 }
 0x5c8   : > { %v6786_v38 = vsel %vm2326_vm8, %v6777_v53, %v7403_v31  ;;  %v6787_v61 = vsel %vm2326_vm8, %v6778_v57, %v7404_v35  ;;  %v7384_v35 = vunpack.i.h.bf16 %v7382_v36  ;;  %v7383_v31 = vunpack.i.l.bf16 %v7382_v36 }
 0x5c9   : > { %v7417_v14 = vpop.permute.xlu1 %7416 }
 0x5ca   : > { %v7419_v3 = vunpack.i.h.bf16 %v7417_v14  ;;  %v7418_v48 = vunpack.i.l.bf16 %v7417_v14 }
 0x5cc   : > { %v6795_v32 = vsel %vm2332_vm9, %v6786_v38, %v7418_v48  ;;  %v6796_v15 = vsel %vm2332_vm9, %v6787_v61, %v7419_v3 }
 0x5cd   : > { %v7014_v5 = vpack.c.bf16 %v6796_v15, %v6795_v32  ;;  %v12215_v15 = vcombine.low %v12159_v44, %v12158_v39 }
 0x5cf   : > { %7015 = vmatprep.subr.bf16.mxu1 %v7014_v5  ;;  %v7432_v41 = vpop.permute.xlu1 %7431  ;;  %v6743_v36 = vsel %vm384_vm3, %v12215_v15, %v7383_v31  ;;  %v12216_v5 = vcombine.low %v10874_v42, %v10877_v6  ;;  %v6800_v31 = vld [vmem:[%s11575_s4] sm:$0xff] }
 0x5d0   : > { %v7392_v47 = vpop.permute.xlu0 %7391  ;;  %7017 = vmatpush1.bf16.msra.mxu1 %v7016_v7  ;;  %v7434_v19 = vunpack.i.h.bf16 %v7432_v41  ;;  %v7433_v63 = vunpack.i.l.bf16 %v7432_v41 }
 0x5d1   : > { %v7394_v21 = vunpack.i.h.bf16 %v7392_v47  ;;  %v7393_v30 = vunpack.i.l.bf16 %v7392_v47  ;;  %v6744_v47 = vsel %vm384_vm3, %v12216_v5, %v7384_v35 }
 0x5d3   : > { %v6680_v55 = vsel %vm384_vm3, %v12213_v0, %v7393_v30  ;;  %v6681_v62 = vsel %vm384_vm3, %v12214_v49, %v7394_v21 }
 0x5d4   : > { %v7397_v60 = vpop.permute.xlu0 %7396 }
 0x5d5   : > { %v7442_v51 = vpop.permute.xlu1 %7441  ;;  %v7399_v45 = vunpack.i.h.bf16 %v7397_v60  ;;  %v7398_v54 = vunpack.i.l.bf16 %v7397_v60 }
 0x5d6   : > { %v7444_v8 = vunpack.i.h.bf16 %v7442_v51  ;;  %v7443_v37 = vunpack.i.l.bf16 %v7442_v51 }
 0x5d7   : > { %v6753_v51 = vsel %vm2302_vm4, %v6744_v47, %v7399_v45 }
 0x5d8   : > { %v7407_v24 = vpop.permute.xlu0 %7406 }
 0x5d9   : > { %v7452_v33 = vpop.permute.xlu1 %7451  ;;  %v7409_v59 = vunpack.i.h.bf16 %v7407_v24  ;;  %v7408_v2 = vunpack.i.l.bf16 %v7407_v24  ;;  %v6752_v24 = vsel %vm2302_vm4, %v6743_v36, %v7398_v54 }
 0x5da   : > { %v7454_v22 = vunpack.i.h.bf16 %v7452_v33  ;;  %v7453_v29 = vunpack.i.l.bf16 %v7452_v33 }
 0x5db   : > { %v6689_v13 = vsel %vm2302_vm4, %v6680_v55, %v7408_v2  ;;  %v6690_v56 = vsel %vm2302_vm4, %v6681_v62, %v7409_v59 }
 0x5dc   : > { %v7412_v46 = vpop.permute.xlu0 %7411 }
 0x5dd   : > { %v11488_v18 = vpop.permute.xlu1 %7456  ;;  %v7414_v53 = vunpack.i.h.bf16 %v7412_v46  ;;  %v7413_v3 = vunpack.i.l.bf16 %v7412_v46 }
 0x5de   : > { %v7459_v42 = vunpack.i.h.bf16 %v11488_v18  ;;  %v7458_v6 = vunpack.i.l.bf16 %v11488_v18 }
 0x5df   : > { %v6761_v33 = vsel %vm2308_vm5, %v6752_v24, %v7413_v3  ;;  %v6762_v46 = vsel %vm2308_vm5, %v6753_v51, %v7414_v53 }
 0x5e0   : > { %v7422_v58 = vpop.permute.xlu0 %7421 }
 0x5e1   : > { %v7424_v7 = vunpack.i.h.bf16 %v7422_v58  ;;  %v7423_v12 = vunpack.i.l.bf16 %v7422_v58  ;;  %v7462_v40 = vpop.permute.xlu1 %7461 }
 0x5e2   : > { %v7464_v1 = vunpack.i.h.bf16 %v7462_v40  ;;  %v7463_v10 = vunpack.i.l.bf16 %v7462_v40 }
 0x5e3   : > { %v6698_v34 = vsel %vm2308_vm5, %v6689_v13, %v7423_v12  ;;  %v6699_v20 = vsel %vm2308_vm5, %v6690_v56, %v7424_v7 }
 0x5e4   : > { %v6707_v25 = vsel %vm2314_vm6, %v6698_v34, %v7433_v63  ;;  %v6708_v26 = vsel %vm2314_vm6, %v6699_v20, %v7434_v19  ;;  %v7427_v9 = vpop.permute.xlu0 %7426 }
 0x5e5   : > { %v6716_v16 = vsel %vm2320_vm7, %v6707_v25, %v7443_v37  ;;  %v6717_v28 = vsel %vm2320_vm7, %v6708_v26, %v7444_v8  ;;  %v7429_v61 = vunpack.i.h.bf16 %v7427_v9  ;;  %v7428_v32 = vunpack.i.l.bf16 %v7427_v9 }
 0x5e6   : > { %v6725_v11 = vsel %vm2326_vm8, %v6716_v16, %v7453_v29  ;;  %v6726_v52 = vsel %vm2326_vm8, %v6717_v28, %v7454_v22 }
 0x5e7   : > { %v6734_v14 = vsel %vm2332_vm9, %v6725_v11, %v7463_v10  ;;  %v6735_v57 = vsel %vm2332_vm9, %v6726_v52, %v7464_v1  ;;  %v6770_v39 = vsel %vm2314_vm6, %v6761_v33, %v7428_v32  ;;  %v6771_v44 = vsel %vm2314_vm6, %v6762_v46, %v7429_v61  ;;  %v6884_v52 = vld [vmem:[%s307_s11] sm:$0x3] }
 0x5e8   : > { %v7437_v48 = vpop.permute.xlu0 %7436  ;;  %v7020_v38 = vpack.c.bf16 %v6735_v57, %v6734_v14  ;;  %v12217_v57 = vld [vmem:[#allocation6_spill] sm:$0xff] }
 0x5e9   : > { %v7439_v41 = vunpack.i.h.bf16 %v7437_v48  ;;  %v7438_v60 = vunpack.i.l.bf16 %v7437_v48  ;;  %v12218_v53 = vsub.s32 0, %v12217_v57  ;;  %v12219_v61 = vsub.s32 1, %v12217_v57 }
 0x5eb   : > { %v6779_v2 = vsel %vm2320_vm7, %v6770_v39, %v7438_v60  ;;  %v6780_v58 = vsel %vm2320_vm7, %v6771_v44, %v7439_v41  ;;  %v6889_v3 = vrot.slane %v6884_v52, %v12218_v53  ;;  %v6893_v32 = vrot.slane %v6884_v52, %v12219_v61 }
 0x5ec   : > { %v7447_v21 = vpop.permute.xlu0 %7446  ;;  %v6232_v0 = vpop.permute.xlu1 %6231 }
 0x5ed   : > { %v7449_v30 = vunpack.i.h.bf16 %v7447_v21  ;;  %v7448_v59 = vunpack.i.l.bf16 %v7447_v21 }
 0x5ef   : > { %v6788_v55 = vsel %vm2326_vm8, %v6779_v2, %v7448_v59  ;;  %v6789_v49 = vsel %vm2326_vm8, %v6780_v58, %v7449_v30 }
 0x5f0   : > { %v6448_v62 = vpop.permute.xlu0 %6447  ;;  %v6797_v7 = vsel %vm2332_vm9, %v6788_v55, %v7458_v6  ;;  %v6798_v12 = vsel %vm2332_vm9, %v6789_v49, %v7459_v42  ;;  %v6268_v63 = vpop.permute.xlu1 %6267 }
 0x5f1   : > { %v7018_v19 = vpack.c.bf16 %v6798_v12, %v6797_v7  ;;  %v6745_v25 = vsel %vm384_vm3, %v6162_v50, %v6448_v62 }
 0x5f3   : > { %7019 = vmatprep.subr.bf16.mxu1 %v7018_v19 }
 0x5f4   : > { %v6196_v13 = vpop.permute.xlu0 %6195  ;;  %7021 = vmatpush1.bf16.msra.mxu1 %v7020_v38  ;;  %v6304_v56 = vpop.permute.xlu1 %6303 }
 0x5f5   : > { %v6682_v34 = vsel %vm384_vm3, %v4938_v23, %v6196_v13 }
 0x5f6   : > { %v6691_v22 = vsel %vm2302_vm4, %v6682_v34, %v6232_v0 }
 0x5f7   : > { %v6700_v26 = vsel %vm2308_vm5, %v6691_v22, %v6268_v63 }
 0x5f8   : > { %v6484_v18 = vpop.permute.xlu0 %6483  ;;  %v6340_v8 = vpop.permute.xlu1 %6339  ;;  %v6709_v17 = vsel %vm2314_vm6, %v6700_v26, %v6304_v56 }
 0x5f9   : > { %v6754_v9 = vsel %vm2302_vm4, %v6745_v25, %v6484_v18  ;;  %v6718_v4 = vsel %vm2320_vm7, %v6709_v17, %v6340_v8 }
 0x5fc   : > { %v6520_v40 = vpop.permute.xlu0 %6519  ;;  %v6376_v29 = vpop.permute.xlu1 %6375 }
 0x5fd   : > { %v6763_v10 = vsel %vm2308_vm5, %v6754_v9, %v6520_v40  ;;  %v6727_v28 = vsel %vm2326_vm8, %v6718_v4, %v6376_v29 }
 0x600   : > { %v6556_v37 = vpop.permute.xlu0 %6555  ;;  %v6412_v23 = vpop.permute.xlu1 %6411 }
 0x601   : > { %v6772_v43 = vsel %vm2314_vm6, %v6763_v10, %v6556_v37  ;;  %v6736_v11 = vsel %vm2332_vm9, %v6727_v28, %v6412_v23 }
 0x604   : > { %v6592_v20 = vpop.permute.xlu0 %6591 }
 0x605   : > { %v6781_v16 = vsel %vm2320_vm7, %v6772_v43, %v6592_v20 }
 0x608   : > { %v6628_v1 = vpop.permute.xlu0 %6627 }
 0x609   : > { %v6790_v27 = vsel %vm2326_vm8, %v6781_v16, %v6628_v1 }
 0x60c   : > { %v6664_v50 = vpop.permute.xlu0 %6663 }
 0x60d   : > { %v6799_v35 = vsel %vm2332_vm9, %v6790_v27, %v6664_v50 }
 0x60e   : > { %6827 = vmatprep.subr.mxu1 %v6799_v35 }
 0x60f   : > { %6828 = vmatpush1.msra.mxu1 %v6736_v11 }
 0x610   : > { %6993 = vmatmul.mubr.msk.f32.vlgmr.msra.gmra.mrb[0].mxu1 %vm6807_vm12, %v6800_v31 }
 0x61d   : > { %v6805_v45 = vpop.permute.xlu0 %6804 }
 0x6e3   : > { %v6877_v54 = vpop.f32.mrb[0].mxu1 }
 0x6e4   : > { %v6878_v14 = vadd.f32 %v6877_v54, %v6805_v45  ;;  %v6879_v48 = vpop.f32.mrb[1].mxu1 }
 0x6e5   : > { %v6880_v38 = vadd.f32 %v6879_v48, %v6805_v45 }
 0x6e6   : > { %v6882_v15 = vmax.f32 %v6878_v14, 0.0 }
 0x6e7   : > { %v6883_v36 = vmax.f32 %v6880_v38, 0.0 }
 0x6e8   : > { %v6896_v5 = vmul.f32 %v6889_v3, %v6882_v15 }
 0x6e9   : > { %v6897_v47 = vmul.f32 %v6893_v32, %v6883_v36 }
 0x6ea   : > { %6898 = vst [vmem:[%s312_s15] sm:$0xff] %v6896_v5 }
 0x6eb   : > { %6899 = vst [vmem:[%s312_s15 + $0x8] sm:$0xff] %v6897_v47 }
 0x6ec PF: > { %s17_s24 = sadd.s32 1, %s7487_s24  }
 0x6ed   : > { %p14_p4 = scmp.ge.s32.totalorder %s17_s24, 4  }
 0x6ef   :  { %16 = sbr.rel (!%p14_p4) target bundleno = 1 (0x1), region = 100 }

</bundles_post_ra>
